<compile_context>
chip_gen: v7x
topology: tpu7x:2x2x1
jax: 0.10.0
libtpu: 0.0.40
codegen_flags: <defaults>
</compile_context>

<pallas_src>
import jax
import jax.numpy as jnp
from jax.experimental import pallas as pl
from jax.experimental.pallas import tpu as pltpu

# ----------------------------- KAN constants -------------------------------
GRID_SIZE = 5
SPLINE_ORDER = 3
GRID_RANGE = (-1.0, 1.0)
_H = (GRID_RANGE[1] - GRID_RANGE[0]) / GRID_SIZE
# knots t_j = grid_range[0] + (j - spline_order) * h,  j = 0 .. G + 2k
KNOTS = tuple(GRID_RANGE[0] + (j - SPLINE_ORDER) * _H
              for j in range(GRID_SIZE + 2 * SPLINE_ORDER + 1))   # 12 knots
NUM_BASES = GRID_SIZE + SPLINE_ORDER                              # 8 bases/feature


# ------------------------------ fused kernel --------------------------------
def _make_kan_chain_kernel(num_layers, op_dtype):
    """Kernel over one (C0, tm) token-minor tile; the whole chain runs in VMEM.

    refs = [x_ref, w_0..w_{L-1}, o_ref, slab_0..slab_{L-1}]
      x_ref   : (C0, tm)            f32
      w_l     : (Cout_l, 9*Cin_l)   op_dtype   (packed [base | B_0..B_7] cols)
      o_ref   : (C_last, tm)        f32
      slab_l  : (9*Cin_l, tm)       op_dtype   VMEM scratch
    """

    def kernel(*refs):
        x_ref = refs[0]
        w_refs = refs[1:1 + num_layers]
        o_ref = refs[1 + num_layers]
        slab_refs = refs[2 + num_layers:2 + 2 * num_layers]

        h = x_ref[...]                                        # (Cin, tm) f32
        for w_ref, slab_ref in zip(w_refs, slab_refs):
            cin = h.shape[0]

            # SiLU.  exp -> EUP, approx reciprocal -> EUP (vrcp); keeps the
            # divide out of the saturated VALU slot (~1e-3 rel error).
            sig = pl.reciprocal(1.0 + jnp.exp(-h), approx=True)
            slab_ref[0:cin, :] = (h * sig).astype(op_dtype)

            # Degree-0 indicators, de-duplicated:
            #   [t_j <= x < t_{j+1}]  ==  ge_j - ge_{j+1}
            # (knots ascend, so ge_{j+1} implies ge_j). 12 compares, not 22.
            ge = [(h >= KNOTS[j]).astype(jnp.float32) for j in range(len(KNOTS))]
            bases = [ge[j] - ge[j + 1] for j in range(len(KNOTS) - 1)]

            # Cox-de Boor recursion; knots are compile-time constants so the
            # divides fold into constant multiplies.  Kept in f32 (v5e has no
            # bf16 VPU; exact numerics across the layer chain).
            for k in range(1, SPLINE_ORDER + 1):
                bases = [
                    (h - KNOTS[j]) * (1.0 / (KNOTS[j + k] - KNOTS[j])) * bases[j]
                    + (KNOTS[j + k + 1] - h)
                    * (1.0 / (KNOTS[j + k + 1] - KNOTS[j + 1])) * bases[j + 1]
                    for j in range(len(bases) - 1)
                ]

            # Write bases into the slab with static, sublane-aligned slices
            # (no lane-axis concat -> no XLU relayout).
            for b_idx, b in enumerate(bases):                 # NUM_BASES entries
                slab_ref[(b_idx + 1) * cin:(b_idx + 2) * cin, :] = b.astype(op_dtype)

            # Single fused MXU matmul per layer: (Cout, 9*Cin) @ (9*Cin, tm).
            h = jnp.dot(w_ref[...], slab_ref[...],
                        preferred_element_type=jnp.float32)   # (Cout, tm) f32

        o_ref[...] = h                                        # lane-dense store

    return kernel


# ------------------------------ weight packing -------------------------------
def _fused_weight(base_weight, spline_weight, spline_scaler, dtype):
    """Pack base + scaled spline weights into one (Cout, 9*Cin) matrix.

    Slab row order is [SiLU(x), B_0, ..., B_7] (each Cin tall), so the packed
    columns are [base_weight | ssw[:,:,0] | ... | ssw[:,:,7]].
    """
    ssw = spline_weight * spline_scaler[..., None]            # (Cout, Cin, K)
    parts = [base_weight] + [ssw[:, :, k] for k in range(NUM_BASES)]
    return jnp.concatenate(parts, axis=1).astype(dtype)       # (Cout, 9*Cin)


# ----------------------------- tiling / VMEM helpers -------------------------
def _vmem_limit_bytes():
    """Per-generation scoped-VMEM limit (None -> compiler default)."""
    try:
        kind = jax.devices()[0].device_kind.lower()
    except Exception:
        return None
    if "v7" in kind or "7x" in kind:
        return 48 * 1024 * 1024      # v7x: 64 MiB physical per TC, leave headroom
    if "v5" in kind or "v6" in kind:
        return 96 * 1024 * 1024      # v5e/v6e: 128 MiB physical
    return None


def _pick_tm(m, tm):
    """Token tile: multiple of 128, and at least 2 row-blocks when M allows so
    both TensorCores (megacore / v7x) get a share of the 'parallel' grid."""
    tm = max(128, (tm // 128) * 128)
    two_block = max(128, ((pl.cdiv(m, 2) + 127) // 128) * 128)
    return min(tm, two_block)


# ------------------------------- KAN forward --------------------------------
def kan_forward(x, layer_params, *, tm=256):
    """x: (M, C0) f32; layer_params: list of dicts (base_weight, spline_weight,
    spline_scaler).  Returns (M, C_last) f32.  Mirrors KAN.forward(update_grid=False)."""
    M, c0 = x.shape
    tm = _pick_tm(M, tm)

    dims = [c0] + [int(p["base_weight"].shape[0]) for p in layer_params]

    # bf16 MXU operands (f32 accumulate) when every Cin segment keeps the
    # packed-bf16 sublane alignment (16); otherwise fall back to f32 operands.
    use_bf16 = all(c % 16 == 0 for c in dims[:-1])
    op_dtype = jnp.bfloat16 if use_bf16 else jnp.float32

    fused_ws = [_fused_weight(dtype=op_dtype, **p) for p in layer_params]
    for l, w in enumerate(fused_ws):
        assert w.shape[1] == (NUM_BASES + 1) * dims[l], (w.shape, dims[l])

    # Pad tokens to a multiple of tm, then go token-minor: (C0, m_pad).
    n_blocks = pl.cdiv(M, tm)
    m_pad = n_blocks * tm
    x_t = (jnp.pad(x, ((0, m_pad - M), (0, 0))) if m_pad != M else x).T

    in_specs = [pl.BlockSpec((dims[0], tm), lambda i: (0, i))]
    for w in fused_ws:
        # Constant index_map -> fetched once; single-buffered (no 2x VMEM).
        in_specs.append(
            pl.BlockSpec(tuple(w.shape), lambda i: (0, 0),
                         pipeline_mode=pl.Buffered(1)))

    scratch_shapes = [
        pltpu.VMEM(((NUM_BASES + 1) * dims[l], tm), op_dtype)
        for l in range(len(fused_ws))
    ]

    vmem_limit = _vmem_limit_bytes()
    cparams = pltpu.CompilerParams(
        dimension_semantics=("parallel",),          # megacore / 2-TC shard
        **({"vmem_limit_bytes": vmem_limit} if vmem_limit else {}),
    )

    out_t = pl.pallas_call(
        _make_kan_chain_kernel(len(fused_ws), op_dtype),
        out_shape=jax.ShapeDtypeStruct((dims[-1], m_pad), jnp.float32),
        grid=(n_blocks,),
        in_specs=in_specs,
        out_specs=pl.BlockSpec((dims[-1], tm), lambda i: (0, i)),
        scratch_shapes=scratch_shapes,
        compiler_params=cparams,
    )(x_t, *fused_ws)

    return out_t[:, :M].T                            # back to (M, C_last)


# --------------------------- pure-JAX reference ------------------------------
def _kan_linear_reference(x, base_weight, spline_weight, spline_scaler):
    grid = jnp.asarray(KNOTS, jnp.float32)
    xe = x[..., None]
    b = ((xe >= grid[:-1]) & (xe < grid[1:])).astype(x.dtype)
    for k in range(1, SPLINE_ORDER + 1):
        b = ((xe - grid[:-(k + 1)]) / (grid[k:-1] - grid[:-(k + 1)]) * b[..., :-1]
             + (grid[k + 1:] - xe) / (grid[k + 1:] - grid[1:-k]) * b[..., 1:])
    base = (x * (1.0 / (1.0 + jnp.exp(-x)))) @ base_weight.T
    ssw = spline_weight * spline_scaler[..., None]
    spline = b.reshape(x.shape[0], -1) @ ssw.reshape(ssw.shape[0], -1).T
    return base + spline


def kan_reference(x, layer_params):
    for p in layer_params:
        x = _kan_linear_reference(x, **p)
    return x


# ------------------------------ parameter init -------------------------------
def init_kan_linear_params(key, in_f, out_f):
    k1, k2, k3 = jax.random.split(key, 3)
    bound = 1.0 / jnp.sqrt(jnp.float32(in_f))   # kaiming_uniform(a=sqrt(5)) bound
    return dict(
        base_weight=jax.random.uniform(k1, (out_f, in_f), jnp.float32, -bound, bound),
        spline_weight=jax.random.normal(k2, (out_f, in_f, NUM_BASES), jnp.float32) * 0.02,
        spline_scaler=jax.random.uniform(k3, (out_f, in_f), jnp.float32, -bound, bound),
    )


# ----------------------------------- main ------------------------------------
if __name__ == "__main__":
    M = 256                         # tokens (e.g. B*H*W in UKAN usage)
    layers_hidden = (32, 64, 32)    # KAN([in, hidden, out])

    key = jax.random.PRNGKey(0)
    n_layers = len(layers_hidden) - 1
    keys = jax.random.split(key, n_layers + 1)
    x = jax.random.normal(keys[0], (M, layers_hidden[0]), jnp.float32)
    params = [
        init_kan_linear_params(keys[i + 1], layers_hidden[i], layers_hidden[i + 1])
        for i in range(n_layers)
    ]

    fwd = jax.jit(kan_forward)
    out = jax.block_until_ready(fwd(x, params))
    assert out.shape == (M, layers_hidden[-1]), out.shape
    assert out.dtype == jnp.float32

    ref = kan_reference(x, params)
    err = float(jnp.max(jnp.abs(out - ref)))
    assert err < 5e-2, f"max abs error vs reference: {err}"
    print("KERNEL_OK")
</pallas_src>

<mosaic_0001>
module attributes {stable_mosaic.version = 11 : i64} {
  func.func @kernel(%arg0: i32, %arg1: memref<32x128xf32, #tpu.memory_space<vmem>>, %arg2: memref<64x288xbf16, #tpu.memory_space<vmem>>, %arg3: memref<32x576xbf16, #tpu.memory_space<vmem>>, %arg4: memref<32x128xf32, #tpu.memory_space<vmem>>, %arg5: memref<288x128xbf16, #tpu.memory_space<vmem>>, %arg6: memref<576x128xbf16, #tpu.memory_space<vmem>>) attributes {dimension_semantics = [#tpu.dimension_semantics<parallel>], iteration_bounds = array<i64: 2>, scalar_prefetch = 0 : i64, scratch_operands = 2 : i64, tpu.core_type = #tpu.core_type<tc>, window_params = [{transform_indices = @transform_0, window_bounds = array<i64: 32, 128>}, {pipeline_mode = #tpu.pipeline_mode<synchronous>, transform_indices = @transform_1, window_bounds = array<i64: 64, 288>}, {pipeline_mode = #tpu.pipeline_mode<synchronous>, transform_indices = @transform_2, window_bounds = array<i64: 32, 576>}, {transform_indices = @transform_3, window_bounds = array<i64: 32, 128>}]} {
    %c0 = arith.constant 0 : index
    %c0_0 = arith.constant 0 : index
    %0 = vector.load %arg1[%c0, %c0_0] : memref<32x128xf32, #tpu.memory_space<vmem>>, vector<32x128xf32>
    %cst = arith.constant 0.000000e+00 : f32
    %1 = vector.broadcast %cst : f32 to vector<32x128xf32>
    %2 = arith.subf %1, %0 : vector<32x128xf32>
    %3 = math.exp %2 : vector<32x128xf32>
    %cst_1 = arith.constant 1.000000e+00 : f32
    %4 = vector.broadcast %cst_1 : f32 to vector<32x128xf32>
    %5 = arith.addf %4, %3 : vector<32x128xf32>
    %6 = tpu.reciprocal %5 {approx = true} : vector<32x128xf32> -> vector<32x128xf32>
    %7 = arith.mulf %0, %6 : vector<32x128xf32>
    %8 = arith.truncf %7 : vector<32x128xf32> to vector<32x128xbf16>
    %c0_2 = arith.constant 0 : index
    %c0_3 = arith.constant 0 : index
    %9 = vector.load %arg5[%c0_2, %c0_3] : memref<288x128xbf16, #tpu.memory_space<vmem>>, vector<32x128xbf16>
    tpu.vector_store %arg5[%c0_2, %c0_3], %8 {strides = array<i32>} : memref<288x128xbf16, #tpu.memory_space<vmem>>, vector<32x128xbf16>,
    %cst_4 = arith.constant -2.200000e+00 : f32
    %10 = vector.broadcast %cst_4 : f32 to vector<32x128xf32>
    %11 = arith.cmpf oge, %0, %10 : vector<32x128xf32>
    %12 = arith.extui %11 : vector<32x128xi1> to vector<32x128xi32>
    %13 = arith.sitofp %12 : vector<32x128xi32> to vector<32x128xf32>
    %cst_5 = arith.constant -1.800000e+00 : f32
    %14 = vector.broadcast %cst_5 : f32 to vector<32x128xf32>
    %15 = arith.cmpf oge, %0, %14 : vector<32x128xf32>
    %16 = arith.extui %15 : vector<32x128xi1> to vector<32x128xi32>
    %17 = arith.sitofp %16 : vector<32x128xi32> to vector<32x128xf32>
    %cst_6 = arith.constant -1.400000e+00 : f32
    %18 = vector.broadcast %cst_6 : f32 to vector<32x128xf32>
    %19 = arith.cmpf oge, %0, %18 : vector<32x128xf32>
    %20 = arith.extui %19 : vector<32x128xi1> to vector<32x128xi32>
    %21 = arith.sitofp %20 : vector<32x128xi32> to vector<32x128xf32>
    %cst_7 = arith.constant -1.000000e+00 : f32
    %22 = vector.broadcast %cst_7 : f32 to vector<32x128xf32>
    %23 = arith.cmpf oge, %0, %22 : vector<32x128xf32>
    %24 = arith.extui %23 : vector<32x128xi1> to vector<32x128xi32>
    %25 = arith.sitofp %24 : vector<32x128xi32> to vector<32x128xf32>
    %cst_8 = arith.constant -6.000000e-01 : f32
    %26 = vector.broadcast %cst_8 : f32 to vector<32x128xf32>
    %27 = arith.cmpf oge, %0, %26 : vector<32x128xf32>
    %28 = arith.extui %27 : vector<32x128xi1> to vector<32x128xi32>
    %29 = arith.sitofp %28 : vector<32x128xi32> to vector<32x128xf32>
    %cst_9 = arith.constant -2.000000e-01 : f32
    %30 = vector.broadcast %cst_9 : f32 to vector<32x128xf32>
    %31 = arith.cmpf oge, %0, %30 : vector<32x128xf32>
    %32 = arith.extui %31 : vector<32x128xi1> to vector<32x128xi32>
    %33 = arith.sitofp %32 : vector<32x128xi32> to vector<32x128xf32>
    %cst_10 = arith.constant 2.000000e-01 : f32
    %34 = vector.broadcast %cst_10 : f32 to vector<32x128xf32>
    %35 = arith.cmpf oge, %0, %34 : vector<32x128xf32>
    %36 = arith.extui %35 : vector<32x128xi1> to vector<32x128xi32>
    %37 = arith.sitofp %36 : vector<32x128xi32> to vector<32x128xf32>
    %cst_11 = arith.constant 6.000000e-01 : f32
    %38 = vector.broadcast %cst_11 : f32 to vector<32x128xf32>
    %39 = arith.cmpf oge, %0, %38 : vector<32x128xf32>
    %40 = arith.extui %39 : vector<32x128xi1> to vector<32x128xi32>
    %41 = arith.sitofp %40 : vector<32x128xi32> to vector<32x128xf32>
    %cst_12 = arith.constant 1.000000e+00 : f32
    %42 = vector.broadcast %cst_12 : f32 to vector<32x128xf32>
    %43 = arith.cmpf oge, %0, %42 : vector<32x128xf32>
    %44 = arith.extui %43 : vector<32x128xi1> to vector<32x128xi32>
    %45 = arith.sitofp %44 : vector<32x128xi32> to vector<32x128xf32>
    %cst_13 = arith.constant 1.400000e+00 : f32
    %46 = vector.broadcast %cst_13 : f32 to vector<32x128xf32>
    %47 = arith.cmpf oge, %0, %46 : vector<32x128xf32>
    %48 = arith.extui %47 : vector<32x128xi1> to vector<32x128xi32>
    %49 = arith.sitofp %48 : vector<32x128xi32> to vector<32x128xf32>
    %cst_14 = arith.constant 1.800000e+00 : f32
    %50 = vector.broadcast %cst_14 : f32 to vector<32x128xf32>
    %51 = arith.cmpf oge, %0, %50 : vector<32x128xf32>
    %52 = arith.extui %51 : vector<32x128xi1> to vector<32x128xi32>
    %53 = arith.sitofp %52 : vector<32x128xi32> to vector<32x128xf32>
    %cst_15 = arith.constant 2.200000e+00 : f32
    %54 = vector.broadcast %cst_15 : f32 to vector<32x128xf32>
    %55 = arith.cmpf oge, %0, %54 : vector<32x128xf32>
    %56 = arith.extui %55 : vector<32x128xi1> to vector<32x128xi32>
    %57 = arith.sitofp %56 : vector<32x128xi32> to vector<32x128xf32>
    %58 = arith.subf %13, %17 : vector<32x128xf32>
    %59 = arith.subf %17, %21 : vector<32x128xf32>
    %60 = arith.subf %21, %25 : vector<32x128xf32>
    %61 = arith.subf %25, %29 : vector<32x128xf32>
    %62 = arith.subf %29, %33 : vector<32x128xf32>
    %63 = arith.subf %33, %37 : vector<32x128xf32>
    %64 = arith.subf %37, %41 : vector<32x128xf32>
    %65 = arith.subf %41, %45 : vector<32x128xf32>
    %66 = arith.subf %45, %49 : vector<32x128xf32>
    %67 = arith.subf %49, %53 : vector<32x128xf32>
    %68 = arith.subf %53, %57 : vector<32x128xf32>
    %cst_16 = arith.constant -2.200000e+00 : f32
    %69 = vector.broadcast %cst_16 : f32 to vector<32x128xf32>
    %70 = arith.subf %0, %69 : vector<32x128xf32>
    %cst_17 = arith.constant 2.500000e+00 : f32
    %71 = vector.broadcast %cst_17 : f32 to vector<32x128xf32>
    %72 = arith.mulf %70, %71 : vector<32x128xf32>
    %73 = arith.mulf %72, %58 : vector<32x128xf32>
    %cst_18 = arith.constant -1.400000e+00 : f32
    %74 = vector.broadcast %cst_18 : f32 to vector<32x128xf32>
    %75 = arith.subf %74, %0 : vector<32x128xf32>
    %cst_19 = arith.constant 2.500000e+00 : f32
    %76 = vector.broadcast %cst_19 : f32 to vector<32x128xf32>
    %77 = arith.mulf %75, %76 : vector<32x128xf32>
    %78 = arith.mulf %77, %59 : vector<32x128xf32>
    %79 = arith.addf %73, %78 : vector<32x128xf32>
    %cst_20 = arith.constant -1.800000e+00 : f32
    %80 = vector.broadcast %cst_20 : f32 to vector<32x128xf32>
    %81 = arith.subf %0, %80 : vector<32x128xf32>
    %cst_21 = arith.constant 2.500000e+00 : f32
    %82 = vector.broadcast %cst_21 : f32 to vector<32x128xf32>
    %83 = arith.mulf %81, %82 : vector<32x128xf32>
    %84 = arith.mulf %83, %59 : vector<32x128xf32>
    %cst_22 = arith.constant -1.000000e+00 : f32
    %85 = vector.broadcast %cst_22 : f32 to vector<32x128xf32>
    %86 = arith.subf %85, %0 : vector<32x128xf32>
    %cst_23 = arith.constant 2.500000e+00 : f32
    %87 = vector.broadcast %cst_23 : f32 to vector<32x128xf32>
    %88 = arith.mulf %86, %87 : vector<32x128xf32>
    %89 = arith.mulf %88, %60 : vector<32x128xf32>
    %90 = arith.addf %84, %89 : vector<32x128xf32>
    %cst_24 = arith.constant -1.400000e+00 : f32
    %91 = vector.broadcast %cst_24 : f32 to vector<32x128xf32>
    %92 = arith.subf %0, %91 : vector<32x128xf32>
    %cst_25 = arith.constant 2.500000e+00 : f32
    %93 = vector.broadcast %cst_25 : f32 to vector<32x128xf32>
    %94 = arith.mulf %92, %93 : vector<32x128xf32>
    %95 = arith.mulf %94, %60 : vector<32x128xf32>
    %cst_26 = arith.constant -6.000000e-01 : f32
    %96 = vector.broadcast %cst_26 : f32 to vector<32x128xf32>
    %97 = arith.subf %96, %0 : vector<32x128xf32>
    %cst_27 = arith.constant 2.500000e+00 : f32
    %98 = vector.broadcast %cst_27 : f32 to vector<32x128xf32>
    %99 = arith.mulf %97, %98 : vector<32x128xf32>
    %100 = arith.mulf %99, %61 : vector<32x128xf32>
    %101 = arith.addf %95, %100 : vector<32x128xf32>
    %cst_28 = arith.constant -1.000000e+00 : f32
    %102 = vector.broadcast %cst_28 : f32 to vector<32x128xf32>
    %103 = arith.subf %0, %102 : vector<32x128xf32>
    %cst_29 = arith.constant 2.500000e+00 : f32
    %104 = vector.broadcast %cst_29 : f32 to vector<32x128xf32>
    %105 = arith.mulf %103, %104 : vector<32x128xf32>
    %106 = arith.mulf %105, %61 : vector<32x128xf32>
    %cst_30 = arith.constant -2.000000e-01 : f32
    %107 = vector.broadcast %cst_30 : f32 to vector<32x128xf32>
    %108 = arith.subf %107, %0 : vector<32x128xf32>
    %cst_31 = arith.constant 2.500000e+00 : f32
    %109 = vector.broadcast %cst_31 : f32 to vector<32x128xf32>
    %110 = arith.mulf %108, %109 : vector<32x128xf32>
    %111 = arith.mulf %110, %62 : vector<32x128xf32>
    %112 = arith.addf %106, %111 : vector<32x128xf32>
    %cst_32 = arith.constant -6.000000e-01 : f32
    %113 = vector.broadcast %cst_32 : f32 to vector<32x128xf32>
    %114 = arith.subf %0, %113 : vector<32x128xf32>
    %cst_33 = arith.constant 2.500000e+00 : f32
    %115 = vector.broadcast %cst_33 : f32 to vector<32x128xf32>
    %116 = arith.mulf %114, %115 : vector<32x128xf32>
    %117 = arith.mulf %116, %62 : vector<32x128xf32>
    %cst_34 = arith.constant 2.000000e-01 : f32
    %118 = vector.broadcast %cst_34 : f32 to vector<32x128xf32>
    %119 = arith.subf %118, %0 : vector<32x128xf32>
    %cst_35 = arith.constant 2.500000e+00 : f32
    %120 = vector.broadcast %cst_35 : f32 to vector<32x128xf32>
    %121 = arith.mulf %119, %120 : vector<32x128xf32>
    %122 = arith.mulf %121, %63 : vector<32x128xf32>
    %123 = arith.addf %117, %122 : vector<32x128xf32>
    %cst_36 = arith.constant -2.000000e-01 : f32
    %124 = vector.broadcast %cst_36 : f32 to vector<32x128xf32>
    %125 = arith.subf %0, %124 : vector<32x128xf32>
    %cst_37 = arith.constant 2.500000e+00 : f32
    %126 = vector.broadcast %cst_37 : f32 to vector<32x128xf32>
    %127 = arith.mulf %125, %126 : vector<32x128xf32>
    %128 = arith.mulf %127, %63 : vector<32x128xf32>
    %cst_38 = arith.constant 6.000000e-01 : f32
    %129 = vector.broadcast %cst_38 : f32 to vector<32x128xf32>
    %130 = arith.subf %129, %0 : vector<32x128xf32>
    %cst_39 = arith.constant 2.500000e+00 : f32
    %131 = vector.broadcast %cst_39 : f32 to vector<32x128xf32>
    %132 = arith.mulf %130, %131 : vector<32x128xf32>
    %133 = arith.mulf %132, %64 : vector<32x128xf32>
    %134 = arith.addf %128, %133 : vector<32x128xf32>
    %cst_40 = arith.constant 2.000000e-01 : f32
    %135 = vector.broadcast %cst_40 : f32 to vector<32x128xf32>
    %136 = arith.subf %0, %135 : vector<32x128xf32>
    %cst_41 = arith.constant 2.500000e+00 : f32
    %137 = vector.broadcast %cst_41 : f32 to vector<32x128xf32>
    %138 = arith.mulf %136, %137 : vector<32x128xf32>
    %139 = arith.mulf %138, %64 : vector<32x128xf32>
    %cst_42 = arith.constant 1.000000e+00 : f32
    %140 = vector.broadcast %cst_42 : f32 to vector<32x128xf32>
    %141 = arith.subf %140, %0 : vector<32x128xf32>
    %cst_43 = arith.constant 2.500000e+00 : f32
    %142 = vector.broadcast %cst_43 : f32 to vector<32x128xf32>
    %143 = arith.mulf %141, %142 : vector<32x128xf32>
    %144 = arith.mulf %143, %65 : vector<32x128xf32>
    %145 = arith.addf %139, %144 : vector<32x128xf32>
    %cst_44 = arith.constant 6.000000e-01 : f32
    %146 = vector.broadcast %cst_44 : f32 to vector<32x128xf32>
    %147 = arith.subf %0, %146 : vector<32x128xf32>
    %cst_45 = arith.constant 2.500000e+00 : f32
    %148 = vector.broadcast %cst_45 : f32 to vector<32x128xf32>
    %149 = arith.mulf %147, %148 : vector<32x128xf32>
    %150 = arith.mulf %149, %65 : vector<32x128xf32>
    %cst_46 = arith.constant 1.400000e+00 : f32
    %151 = vector.broadcast %cst_46 : f32 to vector<32x128xf32>
    %152 = arith.subf %151, %0 : vector<32x128xf32>
    %cst_47 = arith.constant 2.500000e+00 : f32
    %153 = vector.broadcast %cst_47 : f32 to vector<32x128xf32>
    %154 = arith.mulf %152, %153 : vector<32x128xf32>
    %155 = arith.mulf %154, %66 : vector<32x128xf32>
    %156 = arith.addf %150, %155 : vector<32x128xf32>
    %cst_48 = arith.constant 1.000000e+00 : f32
    %157 = vector.broadcast %cst_48 : f32 to vector<32x128xf32>
    %158 = arith.subf %0, %157 : vector<32x128xf32>
    %cst_49 = arith.constant 2.500000e+00 : f32
    %159 = vector.broadcast %cst_49 : f32 to vector<32x128xf32>
    %160 = arith.mulf %158, %159 : vector<32x128xf32>
    %161 = arith.mulf %160, %66 : vector<32x128xf32>
    %cst_50 = arith.constant 1.800000e+00 : f32
    %162 = vector.broadcast %cst_50 : f32 to vector<32x128xf32>
    %163 = arith.subf %162, %0 : vector<32x128xf32>
    %cst_51 = arith.constant 2.500000e+00 : f32
    %164 = vector.broadcast %cst_51 : f32 to vector<32x128xf32>
    %165 = arith.mulf %163, %164 : vector<32x128xf32>
    %166 = arith.mulf %165, %67 : vector<32x128xf32>
    %167 = arith.addf %161, %166 : vector<32x128xf32>
    %cst_52 = arith.constant 1.400000e+00 : f32
    %168 = vector.broadcast %cst_52 : f32 to vector<32x128xf32>
    %169 = arith.subf %0, %168 : vector<32x128xf32>
    %cst_53 = arith.constant 2.500000e+00 : f32
    %170 = vector.broadcast %cst_53 : f32 to vector<32x128xf32>
    %171 = arith.mulf %169, %170 : vector<32x128xf32>
    %172 = arith.mulf %171, %67 : vector<32x128xf32>
    %cst_54 = arith.constant 2.200000e+00 : f32
    %173 = vector.broadcast %cst_54 : f32 to vector<32x128xf32>
    %174 = arith.subf %173, %0 : vector<32x128xf32>
    %cst_55 = arith.constant 2.500000e+00 : f32
    %175 = vector.broadcast %cst_55 : f32 to vector<32x128xf32>
    %176 = arith.mulf %174, %175 : vector<32x128xf32>
    %177 = arith.mulf %176, %68 : vector<32x128xf32>
    %178 = arith.addf %172, %177 : vector<32x128xf32>
    %cst_56 = arith.constant -2.200000e+00 : f32
    %179 = vector.broadcast %cst_56 : f32 to vector<32x128xf32>
    %180 = arith.subf %0, %179 : vector<32x128xf32>
    %cst_57 = arith.constant 1.250000e+00 : f32
    %181 = vector.broadcast %cst_57 : f32 to vector<32x128xf32>
    %182 = arith.mulf %180, %181 : vector<32x128xf32>
    %183 = arith.mulf %182, %79 : vector<32x128xf32>
    %cst_58 = arith.constant -1.000000e+00 : f32
    %184 = vector.broadcast %cst_58 : f32 to vector<32x128xf32>
    %185 = arith.subf %184, %0 : vector<32x128xf32>
    %cst_59 = arith.constant 1.250000e+00 : f32
    %186 = vector.broadcast %cst_59 : f32 to vector<32x128xf32>
    %187 = arith.mulf %185, %186 : vector<32x128xf32>
    %188 = arith.mulf %187, %90 : vector<32x128xf32>
    %189 = arith.addf %183, %188 : vector<32x128xf32>
    %cst_60 = arith.constant -1.800000e+00 : f32
    %190 = vector.broadcast %cst_60 : f32 to vector<32x128xf32>
    %191 = arith.subf %0, %190 : vector<32x128xf32>
    %cst_61 = arith.constant 1.250000e+00 : f32
    %192 = vector.broadcast %cst_61 : f32 to vector<32x128xf32>
    %193 = arith.mulf %191, %192 : vector<32x128xf32>
    %194 = arith.mulf %193, %90 : vector<32x128xf32>
    %cst_62 = arith.constant -6.000000e-01 : f32
    %195 = vector.broadcast %cst_62 : f32 to vector<32x128xf32>
    %196 = arith.subf %195, %0 : vector<32x128xf32>
    %cst_63 = arith.constant 1.250000e+00 : f32
    %197 = vector.broadcast %cst_63 : f32 to vector<32x128xf32>
    %198 = arith.mulf %196, %197 : vector<32x128xf32>
    %199 = arith.mulf %198, %101 : vector<32x128xf32>
    %200 = arith.addf %194, %199 : vector<32x128xf32>
    %cst_64 = arith.constant -1.400000e+00 : f32
    %201 = vector.broadcast %cst_64 : f32 to vector<32x128xf32>
    %202 = arith.subf %0, %201 : vector<32x128xf32>
    %cst_65 = arith.constant 1.250000e+00 : f32
    %203 = vector.broadcast %cst_65 : f32 to vector<32x128xf32>
    %204 = arith.mulf %202, %203 : vector<32x128xf32>
    %205 = arith.mulf %204, %101 : vector<32x128xf32>
    %cst_66 = arith.constant -2.000000e-01 : f32
    %206 = vector.broadcast %cst_66 : f32 to vector<32x128xf32>
    %207 = arith.subf %206, %0 : vector<32x128xf32>
    %cst_67 = arith.constant 1.250000e+00 : f32
    %208 = vector.broadcast %cst_67 : f32 to vector<32x128xf32>
    %209 = arith.mulf %207, %208 : vector<32x128xf32>
    %210 = arith.mulf %209, %112 : vector<32x128xf32>
    %211 = arith.addf %205, %210 : vector<32x128xf32>
    %cst_68 = arith.constant -1.000000e+00 : f32
    %212 = vector.broadcast %cst_68 : f32 to vector<32x128xf32>
    %213 = arith.subf %0, %212 : vector<32x128xf32>
    %cst_69 = arith.constant 1.250000e+00 : f32
    %214 = vector.broadcast %cst_69 : f32 to vector<32x128xf32>
    %215 = arith.mulf %213, %214 : vector<32x128xf32>
    %216 = arith.mulf %215, %112 : vector<32x128xf32>
    %cst_70 = arith.constant 2.000000e-01 : f32
    %217 = vector.broadcast %cst_70 : f32 to vector<32x128xf32>
    %218 = arith.subf %217, %0 : vector<32x128xf32>
    %cst_71 = arith.constant 1.250000e+00 : f32
    %219 = vector.broadcast %cst_71 : f32 to vector<32x128xf32>
    %220 = arith.mulf %218, %219 : vector<32x128xf32>
    %221 = arith.mulf %220, %123 : vector<32x128xf32>
    %222 = arith.addf %216, %221 : vector<32x128xf32>
    %cst_72 = arith.constant -6.000000e-01 : f32
    %223 = vector.broadcast %cst_72 : f32 to vector<32x128xf32>
    %224 = arith.subf %0, %223 : vector<32x128xf32>
    %cst_73 = arith.constant 1.250000e+00 : f32
    %225 = vector.broadcast %cst_73 : f32 to vector<32x128xf32>
    %226 = arith.mulf %224, %225 : vector<32x128xf32>
    %227 = arith.mulf %226, %123 : vector<32x128xf32>
    %cst_74 = arith.constant 6.000000e-01 : f32
    %228 = vector.broadcast %cst_74 : f32 to vector<32x128xf32>
    %229 = arith.subf %228, %0 : vector<32x128xf32>
    %cst_75 = arith.constant 1.250000e+00 : f32
    %230 = vector.broadcast %cst_75 : f32 to vector<32x128xf32>
    %231 = arith.mulf %229, %230 : vector<32x128xf32>
    %232 = arith.mulf %231, %134 : vector<32x128xf32>
    %233 = arith.addf %227, %232 : vector<32x128xf32>
    %cst_76 = arith.constant -2.000000e-01 : f32
    %234 = vector.broadcast %cst_76 : f32 to vector<32x128xf32>
    %235 = arith.subf %0, %234 : vector<32x128xf32>
    %cst_77 = arith.constant 1.250000e+00 : f32
    %236 = vector.broadcast %cst_77 : f32 to vector<32x128xf32>
    %237 = arith.mulf %235, %236 : vector<32x128xf32>
    %238 = arith.mulf %237, %134 : vector<32x128xf32>
    %cst_78 = arith.constant 1.000000e+00 : f32
    %239 = vector.broadcast %cst_78 : f32 to vector<32x128xf32>
    %240 = arith.subf %239, %0 : vector<32x128xf32>
    %cst_79 = arith.constant 1.250000e+00 : f32
    %241 = vector.broadcast %cst_79 : f32 to vector<32x128xf32>
    %242 = arith.mulf %240, %241 : vector<32x128xf32>
    %243 = arith.mulf %242, %145 : vector<32x128xf32>
    %244 = arith.addf %238, %243 : vector<32x128xf32>
    %cst_80 = arith.constant 2.000000e-01 : f32
    %245 = vector.broadcast %cst_80 : f32 to vector<32x128xf32>
    %246 = arith.subf %0, %245 : vector<32x128xf32>
    %cst_81 = arith.constant 1.250000e+00 : f32
    %247 = vector.broadcast %cst_81 : f32 to vector<32x128xf32>
    %248 = arith.mulf %246, %247 : vector<32x128xf32>
    %249 = arith.mulf %248, %145 : vector<32x128xf32>
    %cst_82 = arith.constant 1.400000e+00 : f32
    %250 = vector.broadcast %cst_82 : f32 to vector<32x128xf32>
    %251 = arith.subf %250, %0 : vector<32x128xf32>
    %cst_83 = arith.constant 1.250000e+00 : f32
    %252 = vector.broadcast %cst_83 : f32 to vector<32x128xf32>
    %253 = arith.mulf %251, %252 : vector<32x128xf32>
    %254 = arith.mulf %253, %156 : vector<32x128xf32>
    %255 = arith.addf %249, %254 : vector<32x128xf32>
    %cst_84 = arith.constant 6.000000e-01 : f32
    %256 = vector.broadcast %cst_84 : f32 to vector<32x128xf32>
    %257 = arith.subf %0, %256 : vector<32x128xf32>
    %cst_85 = arith.constant 1.250000e+00 : f32
    %258 = vector.broadcast %cst_85 : f32 to vector<32x128xf32>
    %259 = arith.mulf %257, %258 : vector<32x128xf32>
    %260 = arith.mulf %259, %156 : vector<32x128xf32>
    %cst_86 = arith.constant 1.800000e+00 : f32
    %261 = vector.broadcast %cst_86 : f32 to vector<32x128xf32>
    %262 = arith.subf %261, %0 : vector<32x128xf32>
    %cst_87 = arith.constant 1.250000e+00 : f32
    %263 = vector.broadcast %cst_87 : f32 to vector<32x128xf32>
    %264 = arith.mulf %262, %263 : vector<32x128xf32>
    %265 = arith.mulf %264, %167 : vector<32x128xf32>
    %266 = arith.addf %260, %265 : vector<32x128xf32>
    %cst_88 = arith.constant 1.000000e+00 : f32
    %267 = vector.broadcast %cst_88 : f32 to vector<32x128xf32>
    %268 = arith.subf %0, %267 : vector<32x128xf32>
    %cst_89 = arith.constant 1.250000e+00 : f32
    %269 = vector.broadcast %cst_89 : f32 to vector<32x128xf32>
    %270 = arith.mulf %268, %269 : vector<32x128xf32>
    %271 = arith.mulf %270, %167 : vector<32x128xf32>
    %cst_90 = arith.constant 2.200000e+00 : f32
    %272 = vector.broadcast %cst_90 : f32 to vector<32x128xf32>
    %273 = arith.subf %272, %0 : vector<32x128xf32>
    %cst_91 = arith.constant 1.250000e+00 : f32
    %274 = vector.broadcast %cst_91 : f32 to vector<32x128xf32>
    %275 = arith.mulf %273, %274 : vector<32x128xf32>
    %276 = arith.mulf %275, %178 : vector<32x128xf32>
    %277 = arith.addf %271, %276 : vector<32x128xf32>
    %cst_92 = arith.constant -2.200000e+00 : f32
    %278 = vector.broadcast %cst_92 : f32 to vector<32x128xf32>
    %279 = arith.subf %0, %278 : vector<32x128xf32>
    %cst_93 = arith.constant 0.833333313 : f32
    %280 = vector.broadcast %cst_93 : f32 to vector<32x128xf32>
    %281 = arith.mulf %279, %280 : vector<32x128xf32>
    %282 = arith.mulf %281, %189 : vector<32x128xf32>
    %cst_94 = arith.constant -6.000000e-01 : f32
    %283 = vector.broadcast %cst_94 : f32 to vector<32x128xf32>
    %284 = arith.subf %283, %0 : vector<32x128xf32>
    %cst_95 = arith.constant 0.833333313 : f32
    %285 = vector.broadcast %cst_95 : f32 to vector<32x128xf32>
    %286 = arith.mulf %284, %285 : vector<32x128xf32>
    %287 = arith.mulf %286, %200 : vector<32x128xf32>
    %288 = arith.addf %282, %287 : vector<32x128xf32>
    %cst_96 = arith.constant -1.800000e+00 : f32
    %289 = vector.broadcast %cst_96 : f32 to vector<32x128xf32>
    %290 = arith.subf %0, %289 : vector<32x128xf32>
    %cst_97 = arith.constant 0.833333313 : f32
    %291 = vector.broadcast %cst_97 : f32 to vector<32x128xf32>
    %292 = arith.mulf %290, %291 : vector<32x128xf32>
    %293 = arith.mulf %292, %200 : vector<32x128xf32>
    %cst_98 = arith.constant -2.000000e-01 : f32
    %294 = vector.broadcast %cst_98 : f32 to vector<32x128xf32>
    %295 = arith.subf %294, %0 : vector<32x128xf32>
    %cst_99 = arith.constant 0.833333313 : f32
    %296 = vector.broadcast %cst_99 : f32 to vector<32x128xf32>
    %297 = arith.mulf %295, %296 : vector<32x128xf32>
    %298 = arith.mulf %297, %211 : vector<32x128xf32>
    %299 = arith.addf %293, %298 : vector<32x128xf32>
    %cst_100 = arith.constant -1.400000e+00 : f32
    %300 = vector.broadcast %cst_100 : f32 to vector<32x128xf32>
    %301 = arith.subf %0, %300 : vector<32x128xf32>
    %cst_101 = arith.constant 0.833333313 : f32
    %302 = vector.broadcast %cst_101 : f32 to vector<32x128xf32>
    %303 = arith.mulf %301, %302 : vector<32x128xf32>
    %304 = arith.mulf %303, %211 : vector<32x128xf32>
    %cst_102 = arith.constant 2.000000e-01 : f32
    %305 = vector.broadcast %cst_102 : f32 to vector<32x128xf32>
    %306 = arith.subf %305, %0 : vector<32x128xf32>
    %cst_103 = arith.constant 0.833333313 : f32
    %307 = vector.broadcast %cst_103 : f32 to vector<32x128xf32>
    %308 = arith.mulf %306, %307 : vector<32x128xf32>
    %309 = arith.mulf %308, %222 : vector<32x128xf32>
    %310 = arith.addf %304, %309 : vector<32x128xf32>
    %cst_104 = arith.constant -1.000000e+00 : f32
    %311 = vector.broadcast %cst_104 : f32 to vector<32x128xf32>
    %312 = arith.subf %0, %311 : vector<32x128xf32>
    %cst_105 = arith.constant 0.833333313 : f32
    %313 = vector.broadcast %cst_105 : f32 to vector<32x128xf32>
    %314 = arith.mulf %312, %313 : vector<32x128xf32>
    %315 = arith.mulf %314, %222 : vector<32x128xf32>
    %cst_106 = arith.constant 6.000000e-01 : f32
    %316 = vector.broadcast %cst_106 : f32 to vector<32x128xf32>
    %317 = arith.subf %316, %0 : vector<32x128xf32>
    %cst_107 = arith.constant 0.833333313 : f32
    %318 = vector.broadcast %cst_107 : f32 to vector<32x128xf32>
    %319 = arith.mulf %317, %318 : vector<32x128xf32>
    %320 = arith.mulf %319, %233 : vector<32x128xf32>
    %321 = arith.addf %315, %320 : vector<32x128xf32>
    %cst_108 = arith.constant -6.000000e-01 : f32
    %322 = vector.broadcast %cst_108 : f32 to vector<32x128xf32>
    %323 = arith.subf %0, %322 : vector<32x128xf32>
    %cst_109 = arith.constant 0.833333313 : f32
    %324 = vector.broadcast %cst_109 : f32 to vector<32x128xf32>
    %325 = arith.mulf %323, %324 : vector<32x128xf32>
    %326 = arith.mulf %325, %233 : vector<32x128xf32>
    %cst_110 = arith.constant 1.000000e+00 : f32
    %327 = vector.broadcast %cst_110 : f32 to vector<32x128xf32>
    %328 = arith.subf %327, %0 : vector<32x128xf32>
    %cst_111 = arith.constant 0.833333313 : f32
    %329 = vector.broadcast %cst_111 : f32 to vector<32x128xf32>
    %330 = arith.mulf %328, %329 : vector<32x128xf32>
    %331 = arith.mulf %330, %244 : vector<32x128xf32>
    %332 = arith.addf %326, %331 : vector<32x128xf32>
    %cst_112 = arith.constant -2.000000e-01 : f32
    %333 = vector.broadcast %cst_112 : f32 to vector<32x128xf32>
    %334 = arith.subf %0, %333 : vector<32x128xf32>
    %cst_113 = arith.constant 0.833333313 : f32
    %335 = vector.broadcast %cst_113 : f32 to vector<32x128xf32>
    %336 = arith.mulf %334, %335 : vector<32x128xf32>
    %337 = arith.mulf %336, %244 : vector<32x128xf32>
    %cst_114 = arith.constant 1.400000e+00 : f32
    %338 = vector.broadcast %cst_114 : f32 to vector<32x128xf32>
    %339 = arith.subf %338, %0 : vector<32x128xf32>
    %cst_115 = arith.constant 0.833333313 : f32
    %340 = vector.broadcast %cst_115 : f32 to vector<32x128xf32>
    %341 = arith.mulf %339, %340 : vector<32x128xf32>
    %342 = arith.mulf %341, %255 : vector<32x128xf32>
    %343 = arith.addf %337, %342 : vector<32x128xf32>
    %cst_116 = arith.constant 2.000000e-01 : f32
    %344 = vector.broadcast %cst_116 : f32 to vector<32x128xf32>
    %345 = arith.subf %0, %344 : vector<32x128xf32>
    %cst_117 = arith.constant 0.833333313 : f32
    %346 = vector.broadcast %cst_117 : f32 to vector<32x128xf32>
    %347 = arith.mulf %345, %346 : vector<32x128xf32>
    %348 = arith.mulf %347, %255 : vector<32x128xf32>
    %cst_118 = arith.constant 1.800000e+00 : f32
    %349 = vector.broadcast %cst_118 : f32 to vector<32x128xf32>
    %350 = arith.subf %349, %0 : vector<32x128xf32>
    %cst_119 = arith.constant 0.833333313 : f32
    %351 = vector.broadcast %cst_119 : f32 to vector<32x128xf32>
    %352 = arith.mulf %350, %351 : vector<32x128xf32>
    %353 = arith.mulf %352, %266 : vector<32x128xf32>
    %354 = arith.addf %348, %353 : vector<32x128xf32>
    %cst_120 = arith.constant 6.000000e-01 : f32
    %355 = vector.broadcast %cst_120 : f32 to vector<32x128xf32>
    %356 = arith.subf %0, %355 : vector<32x128xf32>
    %cst_121 = arith.constant 0.833333313 : f32
    %357 = vector.broadcast %cst_121 : f32 to vector<32x128xf32>
    %358 = arith.mulf %356, %357 : vector<32x128xf32>
    %359 = arith.mulf %358, %266 : vector<32x128xf32>
    %cst_122 = arith.constant 2.200000e+00 : f32
    %360 = vector.broadcast %cst_122 : f32 to vector<32x128xf32>
    %361 = arith.subf %360, %0 : vector<32x128xf32>
    %cst_123 = arith.constant 0.833333313 : f32
    %362 = vector.broadcast %cst_123 : f32 to vector<32x128xf32>
    %363 = arith.mulf %361, %362 : vector<32x128xf32>
    %364 = arith.mulf %363, %277 : vector<32x128xf32>
    %365 = arith.addf %359, %364 : vector<32x128xf32>
    %366 = arith.truncf %288 : vector<32x128xf32> to vector<32x128xbf16>
    %c32 = arith.constant 32 : index
    %c0_124 = arith.constant 0 : index
    %367 = vector.load %arg5[%c32, %c0_124] : memref<288x128xbf16, #tpu.memory_space<vmem>>, vector<32x128xbf16>
    tpu.vector_store %arg5[%c32, %c0_124], %366 {strides = array<i32>} : memref<288x128xbf16, #tpu.memory_space<vmem>>, vector<32x128xbf16>,
    %368 = arith.truncf %299 : vector<32x128xf32> to vector<32x128xbf16>
    %c64 = arith.constant 64 : index
    %c0_125 = arith.constant 0 : index
    %369 = vector.load %arg5[%c64, %c0_125] : memref<288x128xbf16, #tpu.memory_space<vmem>>, vector<32x128xbf16>
    tpu.vector_store %arg5[%c64, %c0_125], %368 {strides = array<i32>} : memref<288x128xbf16, #tpu.memory_space<vmem>>, vector<32x128xbf16>,
    %370 = arith.truncf %310 : vector<32x128xf32> to vector<32x128xbf16>
    %c96 = arith.constant 96 : index
    %c0_126 = arith.constant 0 : index
    %371 = vector.load %arg5[%c96, %c0_126] : memref<288x128xbf16, #tpu.memory_space<vmem>>, vector<32x128xbf16>
    tpu.vector_store %arg5[%c96, %c0_126], %370 {strides = array<i32>} : memref<288x128xbf16, #tpu.memory_space<vmem>>, vector<32x128xbf16>,
    %372 = arith.truncf %321 : vector<32x128xf32> to vector<32x128xbf16>
    %c128 = arith.constant 128 : index
    %c0_127 = arith.constant 0 : index
    %373 = vector.load %arg5[%c128, %c0_127] : memref<288x128xbf16, #tpu.memory_space<vmem>>, vector<32x128xbf16>
    tpu.vector_store %arg5[%c128, %c0_127], %372 {strides = array<i32>} : memref<288x128xbf16, #tpu.memory_space<vmem>>, vector<32x128xbf16>,
    %374 = arith.truncf %332 : vector<32x128xf32> to vector<32x128xbf16>
    %c160 = arith.constant 160 : index
    %c0_128 = arith.constant 0 : index
    %375 = vector.load %arg5[%c160, %c0_128] : memref<288x128xbf16, #tpu.memory_space<vmem>>, vector<32x128xbf16>
    tpu.vector_store %arg5[%c160, %c0_128], %374 {strides = array<i32>} : memref<288x128xbf16, #tpu.memory_space<vmem>>, vector<32x128xbf16>,
    %376 = arith.truncf %343 : vector<32x128xf32> to vector<32x128xbf16>
    %c192 = arith.constant 192 : index
    %c0_129 = arith.constant 0 : index
    %377 = vector.load %arg5[%c192, %c0_129] : memref<288x128xbf16, #tpu.memory_space<vmem>>, vector<32x128xbf16>
    tpu.vector_store %arg5[%c192, %c0_129], %376 {strides = array<i32>} : memref<288x128xbf16, #tpu.memory_space<vmem>>, vector<32x128xbf16>,
    %378 = arith.truncf %354 : vector<32x128xf32> to vector<32x128xbf16>
    %c224 = arith.constant 224 : index
    %c0_130 = arith.constant 0 : index
    %379 = vector.load %arg5[%c224, %c0_130] : memref<288x128xbf16, #tpu.memory_space<vmem>>, vector<32x128xbf16>
    tpu.vector_store %arg5[%c224, %c0_130], %378 {strides = array<i32>} : memref<288x128xbf16, #tpu.memory_space<vmem>>, vector<32x128xbf16>,
    %380 = arith.truncf %365 : vector<32x128xf32> to vector<32x128xbf16>
    %c256 = arith.constant 256 : index
    %c0_131 = arith.constant 0 : index
    %381 = vector.load %arg5[%c256, %c0_131] : memref<288x128xbf16, #tpu.memory_space<vmem>>, vector<32x128xbf16>
    tpu.vector_store %arg5[%c256, %c0_131], %380 {strides = array<i32>} : memref<288x128xbf16, #tpu.memory_space<vmem>>, vector<32x128xbf16>,
    %c0_132 = arith.constant 0 : index
    %c0_133 = arith.constant 0 : index
    %382 = vector.load %arg2[%c0_132, %c0_133] : memref<64x288xbf16, #tpu.memory_space<vmem>>, vector<64x288xbf16>
    %c0_134 = arith.constant 0 : index
    %c0_135 = arith.constant 0 : index
    %383 = vector.load %arg5[%c0_134, %c0_135] : memref<288x128xbf16, #tpu.memory_space<vmem>>, vector<288x128xbf16>
    %cst_136 = arith.constant dense<0.000000e+00> : vector<64x128xf32>
    %384 = tpu.matmul %382, %383, %cst_136 {dimension_numbers = #tpu.dot_dimension_numbers<[1], [0], [0], [1], [0, 0, 1, 1], [], []>} : vector<64x288xbf16>, vector<288x128xbf16>, vector<64x128xf32> -> vector<64x128xf32>
    %cst_137 = arith.constant 0.000000e+00 : f32
    %385 = vector.broadcast %cst_137 : f32 to vector<64x128xf32>
    %386 = arith.subf %385, %384 : vector<64x128xf32>
    %387 = math.exp %386 : vector<64x128xf32>
    %cst_138 = arith.constant 1.000000e+00 : f32
    %388 = vector.broadcast %cst_138 : f32 to vector<64x128xf32>
    %389 = arith.addf %388, %387 : vector<64x128xf32>
    %390 = tpu.reciprocal %389 {approx = true} : vector<64x128xf32> -> vector<64x128xf32>
    %391 = arith.mulf %384, %390 : vector<64x128xf32>
    %392 = arith.truncf %391 : vector<64x128xf32> to vector<64x128xbf16>
    %c0_139 = arith.constant 0 : index
    %c0_140 = arith.constant 0 : index
    %393 = vector.load %arg6[%c0_139, %c0_140] : memref<576x128xbf16, #tpu.memory_space<vmem>>, vector<64x128xbf16>
    tpu.vector_store %arg6[%c0_139, %c0_140], %392 {strides = array<i32>} : memref<576x128xbf16, #tpu.memory_space<vmem>>, vector<64x128xbf16>,
    %cst_141 = arith.constant -2.200000e+00 : f32
    %394 = vector.broadcast %cst_141 : f32 to vector<64x128xf32>
    %395 = arith.cmpf oge, %384, %394 : vector<64x128xf32>
    %396 = arith.extui %395 : vector<64x128xi1> to vector<64x128xi32>
    %397 = arith.sitofp %396 : vector<64x128xi32> to vector<64x128xf32>
    %cst_142 = arith.constant -1.800000e+00 : f32
    %398 = vector.broadcast %cst_142 : f32 to vector<64x128xf32>
    %399 = arith.cmpf oge, %384, %398 : vector<64x128xf32>
    %400 = arith.extui %399 : vector<64x128xi1> to vector<64x128xi32>
    %401 = arith.sitofp %400 : vector<64x128xi32> to vector<64x128xf32>
    %cst_143 = arith.constant -1.400000e+00 : f32
    %402 = vector.broadcast %cst_143 : f32 to vector<64x128xf32>
    %403 = arith.cmpf oge, %384, %402 : vector<64x128xf32>
    %404 = arith.extui %403 : vector<64x128xi1> to vector<64x128xi32>
    %405 = arith.sitofp %404 : vector<64x128xi32> to vector<64x128xf32>
    %cst_144 = arith.constant -1.000000e+00 : f32
    %406 = vector.broadcast %cst_144 : f32 to vector<64x128xf32>
    %407 = arith.cmpf oge, %384, %406 : vector<64x128xf32>
    %408 = arith.extui %407 : vector<64x128xi1> to vector<64x128xi32>
    %409 = arith.sitofp %408 : vector<64x128xi32> to vector<64x128xf32>
    %cst_145 = arith.constant -6.000000e-01 : f32
    %410 = vector.broadcast %cst_145 : f32 to vector<64x128xf32>
    %411 = arith.cmpf oge, %384, %410 : vector<64x128xf32>
    %412 = arith.extui %411 : vector<64x128xi1> to vector<64x128xi32>
    %413 = arith.sitofp %412 : vector<64x128xi32> to vector<64x128xf32>
    %cst_146 = arith.constant -2.000000e-01 : f32
    %414 = vector.broadcast %cst_146 : f32 to vector<64x128xf32>
    %415 = arith.cmpf oge, %384, %414 : vector<64x128xf32>
    %416 = arith.extui %415 : vector<64x128xi1> to vector<64x128xi32>
    %417 = arith.sitofp %416 : vector<64x128xi32> to vector<64x128xf32>
    %cst_147 = arith.constant 2.000000e-01 : f32
    %418 = vector.broadcast %cst_147 : f32 to vector<64x128xf32>
    %419 = arith.cmpf oge, %384, %418 : vector<64x128xf32>
    %420 = arith.extui %419 : vector<64x128xi1> to vector<64x128xi32>
    %421 = arith.sitofp %420 : vector<64x128xi32> to vector<64x128xf32>
    %cst_148 = arith.constant 6.000000e-01 : f32
    %422 = vector.broadcast %cst_148 : f32 to vector<64x128xf32>
    %423 = arith.cmpf oge, %384, %422 : vector<64x128xf32>
    %424 = arith.extui %423 : vector<64x128xi1> to vector<64x128xi32>
    %425 = arith.sitofp %424 : vector<64x128xi32> to vector<64x128xf32>
    %cst_149 = arith.constant 1.000000e+00 : f32
    %426 = vector.broadcast %cst_149 : f32 to vector<64x128xf32>
    %427 = arith.cmpf oge, %384, %426 : vector<64x128xf32>
    %428 = arith.extui %427 : vector<64x128xi1> to vector<64x128xi32>
    %429 = arith.sitofp %428 : vector<64x128xi32> to vector<64x128xf32>
    %cst_150 = arith.constant 1.400000e+00 : f32
    %430 = vector.broadcast %cst_150 : f32 to vector<64x128xf32>
    %431 = arith.cmpf oge, %384, %430 : vector<64x128xf32>
    %432 = arith.extui %431 : vector<64x128xi1> to vector<64x128xi32>
    %433 = arith.sitofp %432 : vector<64x128xi32> to vector<64x128xf32>
    %cst_151 = arith.constant 1.800000e+00 : f32
    %434 = vector.broadcast %cst_151 : f32 to vector<64x128xf32>
    %435 = arith.cmpf oge, %384, %434 : vector<64x128xf32>
    %436 = arith.extui %435 : vector<64x128xi1> to vector<64x128xi32>
    %437 = arith.sitofp %436 : vector<64x128xi32> to vector<64x128xf32>
    %cst_152 = arith.constant 2.200000e+00 : f32
    %438 = vector.broadcast %cst_152 : f32 to vector<64x128xf32>
    %439 = arith.cmpf oge, %384, %438 : vector<64x128xf32>
    %440 = arith.extui %439 : vector<64x128xi1> to vector<64x128xi32>
    %441 = arith.sitofp %440 : vector<64x128xi32> to vector<64x128xf32>
    %442 = arith.subf %397, %401 : vector<64x128xf32>
    %443 = arith.subf %401, %405 : vector<64x128xf32>
    %444 = arith.subf %405, %409 : vector<64x128xf32>
    %445 = arith.subf %409, %413 : vector<64x128xf32>
    %446 = arith.subf %413, %417 : vector<64x128xf32>
    %447 = arith.subf %417, %421 : vector<64x128xf32>
    %448 = arith.subf %421, %425 : vector<64x128xf32>
    %449 = arith.subf %425, %429 : vector<64x128xf32>
    %450 = arith.subf %429, %433 : vector<64x128xf32>
    %451 = arith.subf %433, %437 : vector<64x128xf32>
    %452 = arith.subf %437, %441 : vector<64x128xf32>
    %cst_153 = arith.constant -2.200000e+00 : f32
    %453 = vector.broadcast %cst_153 : f32 to vector<64x128xf32>
    %454 = arith.subf %384, %453 : vector<64x128xf32>
    %cst_154 = arith.constant 2.500000e+00 : f32
    %455 = vector.broadcast %cst_154 : f32 to vector<64x128xf32>
    %456 = arith.mulf %454, %455 : vector<64x128xf32>
    %457 = arith.mulf %456, %442 : vector<64x128xf32>
    %cst_155 = arith.constant -1.400000e+00 : f32
    %458 = vector.broadcast %cst_155 : f32 to vector<64x128xf32>
    %459 = arith.subf %458, %384 : vector<64x128xf32>
    %cst_156 = arith.constant 2.500000e+00 : f32
    %460 = vector.broadcast %cst_156 : f32 to vector<64x128xf32>
    %461 = arith.mulf %459, %460 : vector<64x128xf32>
    %462 = arith.mulf %461, %443 : vector<64x128xf32>
    %463 = arith.addf %457, %462 : vector<64x128xf32>
    %cst_157 = arith.constant -1.800000e+00 : f32
    %464 = vector.broadcast %cst_157 : f32 to vector<64x128xf32>
    %465 = arith.subf %384, %464 : vector<64x128xf32>
    %cst_158 = arith.constant 2.500000e+00 : f32
    %466 = vector.broadcast %cst_158 : f32 to vector<64x128xf32>
    %467 = arith.mulf %465, %466 : vector<64x128xf32>
    %468 = arith.mulf %467, %443 : vector<64x128xf32>
    %cst_159 = arith.constant -1.000000e+00 : f32
    %469 = vector.broadcast %cst_159 : f32 to vector<64x128xf32>
    %470 = arith.subf %469, %384 : vector<64x128xf32>
    %cst_160 = arith.constant 2.500000e+00 : f32
    %471 = vector.broadcast %cst_160 : f32 to vector<64x128xf32>
    %472 = arith.mulf %470, %471 : vector<64x128xf32>
    %473 = arith.mulf %472, %444 : vector<64x128xf32>
    %474 = arith.addf %468, %473 : vector<64x128xf32>
    %cst_161 = arith.constant -1.400000e+00 : f32
    %475 = vector.broadcast %cst_161 : f32 to vector<64x128xf32>
    %476 = arith.subf %384, %475 : vector<64x128xf32>
    %cst_162 = arith.constant 2.500000e+00 : f32
    %477 = vector.broadcast %cst_162 : f32 to vector<64x128xf32>
    %478 = arith.mulf %476, %477 : vector<64x128xf32>
    %479 = arith.mulf %478, %444 : vector<64x128xf32>
    %cst_163 = arith.constant -6.000000e-01 : f32
    %480 = vector.broadcast %cst_163 : f32 to vector<64x128xf32>
    %481 = arith.subf %480, %384 : vector<64x128xf32>
    %cst_164 = arith.constant 2.500000e+00 : f32
    %482 = vector.broadcast %cst_164 : f32 to vector<64x128xf32>
    %483 = arith.mulf %481, %482 : vector<64x128xf32>
    %484 = arith.mulf %483, %445 : vector<64x128xf32>
    %485 = arith.addf %479, %484 : vector<64x128xf32>
    %cst_165 = arith.constant -1.000000e+00 : f32
    %486 = vector.broadcast %cst_165 : f32 to vector<64x128xf32>
    %487 = arith.subf %384, %486 : vector<64x128xf32>
    %cst_166 = arith.constant 2.500000e+00 : f32
    %488 = vector.broadcast %cst_166 : f32 to vector<64x128xf32>
    %489 = arith.mulf %487, %488 : vector<64x128xf32>
    %490 = arith.mulf %489, %445 : vector<64x128xf32>
    %cst_167 = arith.constant -2.000000e-01 : f32
    %491 = vector.broadcast %cst_167 : f32 to vector<64x128xf32>
    %492 = arith.subf %491, %384 : vector<64x128xf32>
    %cst_168 = arith.constant 2.500000e+00 : f32
    %493 = vector.broadcast %cst_168 : f32 to vector<64x128xf32>
    %494 = arith.mulf %492, %493 : vector<64x128xf32>
    %495 = arith.mulf %494, %446 : vector<64x128xf32>
    %496 = arith.addf %490, %495 : vector<64x128xf32>
    %cst_169 = arith.constant -6.000000e-01 : f32
    %497 = vector.broadcast %cst_169 : f32 to vector<64x128xf32>
    %498 = arith.subf %384, %497 : vector<64x128xf32>
    %cst_170 = arith.constant 2.500000e+00 : f32
    %499 = vector.broadcast %cst_170 : f32 to vector<64x128xf32>
    %500 = arith.mulf %498, %499 : vector<64x128xf32>
    %501 = arith.mulf %500, %446 : vector<64x128xf32>
    %cst_171 = arith.constant 2.000000e-01 : f32
    %502 = vector.broadcast %cst_171 : f32 to vector<64x128xf32>
    %503 = arith.subf %502, %384 : vector<64x128xf32>
    %cst_172 = arith.constant 2.500000e+00 : f32
    %504 = vector.broadcast %cst_172 : f32 to vector<64x128xf32>
    %505 = arith.mulf %503, %504 : vector<64x128xf32>
    %506 = arith.mulf %505, %447 : vector<64x128xf32>
    %507 = arith.addf %501, %506 : vector<64x128xf32>
    %cst_173 = arith.constant -2.000000e-01 : f32
    %508 = vector.broadcast %cst_173 : f32 to vector<64x128xf32>
    %509 = arith.subf %384, %508 : vector<64x128xf32>
    %cst_174 = arith.constant 2.500000e+00 : f32
    %510 = vector.broadcast %cst_174 : f32 to vector<64x128xf32>
    %511 = arith.mulf %509, %510 : vector<64x128xf32>
    %512 = arith.mulf %511, %447 : vector<64x128xf32>
    %cst_175 = arith.constant 6.000000e-01 : f32
    %513 = vector.broadcast %cst_175 : f32 to vector<64x128xf32>
    %514 = arith.subf %513, %384 : vector<64x128xf32>
    %cst_176 = arith.constant 2.500000e+00 : f32
    %515 = vector.broadcast %cst_176 : f32 to vector<64x128xf32>
    %516 = arith.mulf %514, %515 : vector<64x128xf32>
    %517 = arith.mulf %516, %448 : vector<64x128xf32>
    %518 = arith.addf %512, %517 : vector<64x128xf32>
    %cst_177 = arith.constant 2.000000e-01 : f32
    %519 = vector.broadcast %cst_177 : f32 to vector<64x128xf32>
    %520 = arith.subf %384, %519 : vector<64x128xf32>
    %cst_178 = arith.constant 2.500000e+00 : f32
    %521 = vector.broadcast %cst_178 : f32 to vector<64x128xf32>
    %522 = arith.mulf %520, %521 : vector<64x128xf32>
    %523 = arith.mulf %522, %448 : vector<64x128xf32>
    %cst_179 = arith.constant 1.000000e+00 : f32
    %524 = vector.broadcast %cst_179 : f32 to vector<64x128xf32>
    %525 = arith.subf %524, %384 : vector<64x128xf32>
    %cst_180 = arith.constant 2.500000e+00 : f32
    %526 = vector.broadcast %cst_180 : f32 to vector<64x128xf32>
    %527 = arith.mulf %525, %526 : vector<64x128xf32>
    %528 = arith.mulf %527, %449 : vector<64x128xf32>
    %529 = arith.addf %523, %528 : vector<64x128xf32>
    %cst_181 = arith.constant 6.000000e-01 : f32
    %530 = vector.broadcast %cst_181 : f32 to vector<64x128xf32>
    %531 = arith.subf %384, %530 : vector<64x128xf32>
    %cst_182 = arith.constant 2.500000e+00 : f32
    %532 = vector.broadcast %cst_182 : f32 to vector<64x128xf32>
    %533 = arith.mulf %531, %532 : vector<64x128xf32>
    %534 = arith.mulf %533, %449 : vector<64x128xf32>
    %cst_183 = arith.constant 1.400000e+00 : f32
    %535 = vector.broadcast %cst_183 : f32 to vector<64x128xf32>
    %536 = arith.subf %535, %384 : vector<64x128xf32>
    %cst_184 = arith.constant 2.500000e+00 : f32
    %537 = vector.broadcast %cst_184 : f32 to vector<64x128xf32>
    %538 = arith.mulf %536, %537 : vector<64x128xf32>
    %539 = arith.mulf %538, %450 : vector<64x128xf32>
    %540 = arith.addf %534, %539 : vector<64x128xf32>
    %cst_185 = arith.constant 1.000000e+00 : f32
    %541 = vector.broadcast %cst_185 : f32 to vector<64x128xf32>
    %542 = arith.subf %384, %541 : vector<64x128xf32>
    %cst_186 = arith.constant 2.500000e+00 : f32
    %543 = vector.broadcast %cst_186 : f32 to vector<64x128xf32>
    %544 = arith.mulf %542, %543 : vector<64x128xf32>
    %545 = arith.mulf %544, %450 : vector<64x128xf32>
    %cst_187 = arith.constant 1.800000e+00 : f32
    %546 = vector.broadcast %cst_187 : f32 to vector<64x128xf32>
    %547 = arith.subf %546, %384 : vector<64x128xf32>
    %cst_188 = arith.constant 2.500000e+00 : f32
    %548 = vector.broadcast %cst_188 : f32 to vector<64x128xf32>
    %549 = arith.mulf %547, %548 : vector<64x128xf32>
    %550 = arith.mulf %549, %451 : vector<64x128xf32>
    %551 = arith.addf %545, %550 : vector<64x128xf32>
    %cst_189 = arith.constant 1.400000e+00 : f32
    %552 = vector.broadcast %cst_189 : f32 to vector<64x128xf32>
    %553 = arith.subf %384, %552 : vector<64x128xf32>
    %cst_190 = arith.constant 2.500000e+00 : f32
    %554 = vector.broadcast %cst_190 : f32 to vector<64x128xf32>
    %555 = arith.mulf %553, %554 : vector<64x128xf32>
    %556 = arith.mulf %555, %451 : vector<64x128xf32>
    %cst_191 = arith.constant 2.200000e+00 : f32
    %557 = vector.broadcast %cst_191 : f32 to vector<64x128xf32>
    %558 = arith.subf %557, %384 : vector<64x128xf32>
    %cst_192 = arith.constant 2.500000e+00 : f32
    %559 = vector.broadcast %cst_192 : f32 to vector<64x128xf32>
    %560 = arith.mulf %558, %559 : vector<64x128xf32>
    %561 = arith.mulf %560, %452 : vector<64x128xf32>
    %562 = arith.addf %556, %561 : vector<64x128xf32>
    %cst_193 = arith.constant -2.200000e+00 : f32
    %563 = vector.broadcast %cst_193 : f32 to vector<64x128xf32>
    %564 = arith.subf %384, %563 : vector<64x128xf32>
    %cst_194 = arith.constant 1.250000e+00 : f32
    %565 = vector.broadcast %cst_194 : f32 to vector<64x128xf32>
    %566 = arith.mulf %564, %565 : vector<64x128xf32>
    %567 = arith.mulf %566, %463 : vector<64x128xf32>
    %cst_195 = arith.constant -1.000000e+00 : f32
    %568 = vector.broadcast %cst_195 : f32 to vector<64x128xf32>
    %569 = arith.subf %568, %384 : vector<64x128xf32>
    %cst_196 = arith.constant 1.250000e+00 : f32
    %570 = vector.broadcast %cst_196 : f32 to vector<64x128xf32>
    %571 = arith.mulf %569, %570 : vector<64x128xf32>
    %572 = arith.mulf %571, %474 : vector<64x128xf32>
    %573 = arith.addf %567, %572 : vector<64x128xf32>
    %cst_197 = arith.constant -1.800000e+00 : f32
    %574 = vector.broadcast %cst_197 : f32 to vector<64x128xf32>
    %575 = arith.subf %384, %574 : vector<64x128xf32>
    %cst_198 = arith.constant 1.250000e+00 : f32
    %576 = vector.broadcast %cst_198 : f32 to vector<64x128xf32>
    %577 = arith.mulf %575, %576 : vector<64x128xf32>
    %578 = arith.mulf %577, %474 : vector<64x128xf32>
    %cst_199 = arith.constant -6.000000e-01 : f32
    %579 = vector.broadcast %cst_199 : f32 to vector<64x128xf32>
    %580 = arith.subf %579, %384 : vector<64x128xf32>
    %cst_200 = arith.constant 1.250000e+00 : f32
    %581 = vector.broadcast %cst_200 : f32 to vector<64x128xf32>
    %582 = arith.mulf %580, %581 : vector<64x128xf32>
    %583 = arith.mulf %582, %485 : vector<64x128xf32>
    %584 = arith.addf %578, %583 : vector<64x128xf32>
    %cst_201 = arith.constant -1.400000e+00 : f32
    %585 = vector.broadcast %cst_201 : f32 to vector<64x128xf32>
    %586 = arith.subf %384, %585 : vector<64x128xf32>
    %cst_202 = arith.constant 1.250000e+00 : f32
    %587 = vector.broadcast %cst_202 : f32 to vector<64x128xf32>
    %588 = arith.mulf %586, %587 : vector<64x128xf32>
    %589 = arith.mulf %588, %485 : vector<64x128xf32>
    %cst_203 = arith.constant -2.000000e-01 : f32
    %590 = vector.broadcast %cst_203 : f32 to vector<64x128xf32>
    %591 = arith.subf %590, %384 : vector<64x128xf32>
    %cst_204 = arith.constant 1.250000e+00 : f32
    %592 = vector.broadcast %cst_204 : f32 to vector<64x128xf32>
    %593 = arith.mulf %591, %592 : vector<64x128xf32>
    %594 = arith.mulf %593, %496 : vector<64x128xf32>
    %595 = arith.addf %589, %594 : vector<64x128xf32>
    %cst_205 = arith.constant -1.000000e+00 : f32
    %596 = vector.broadcast %cst_205 : f32 to vector<64x128xf32>
    %597 = arith.subf %384, %596 : vector<64x128xf32>
    %cst_206 = arith.constant 1.250000e+00 : f32
    %598 = vector.broadcast %cst_206 : f32 to vector<64x128xf32>
    %599 = arith.mulf %597, %598 : vector<64x128xf32>
    %600 = arith.mulf %599, %496 : vector<64x128xf32>
    %cst_207 = arith.constant 2.000000e-01 : f32
    %601 = vector.broadcast %cst_207 : f32 to vector<64x128xf32>
    %602 = arith.subf %601, %384 : vector<64x128xf32>
    %cst_208 = arith.constant 1.250000e+00 : f32
    %603 = vector.broadcast %cst_208 : f32 to vector<64x128xf32>
    %604 = arith.mulf %602, %603 : vector<64x128xf32>
    %605 = arith.mulf %604, %507 : vector<64x128xf32>
    %606 = arith.addf %600, %605 : vector<64x128xf32>
    %cst_209 = arith.constant -6.000000e-01 : f32
    %607 = vector.broadcast %cst_209 : f32 to vector<64x128xf32>
    %608 = arith.subf %384, %607 : vector<64x128xf32>
    %cst_210 = arith.constant 1.250000e+00 : f32
    %609 = vector.broadcast %cst_210 : f32 to vector<64x128xf32>
    %610 = arith.mulf %608, %609 : vector<64x128xf32>
    %611 = arith.mulf %610, %507 : vector<64x128xf32>
    %cst_211 = arith.constant 6.000000e-01 : f32
    %612 = vector.broadcast %cst_211 : f32 to vector<64x128xf32>
    %613 = arith.subf %612, %384 : vector<64x128xf32>
    %cst_212 = arith.constant 1.250000e+00 : f32
    %614 = vector.broadcast %cst_212 : f32 to vector<64x128xf32>
    %615 = arith.mulf %613, %614 : vector<64x128xf32>
    %616 = arith.mulf %615, %518 : vector<64x128xf32>
    %617 = arith.addf %611, %616 : vector<64x128xf32>
    %cst_213 = arith.constant -2.000000e-01 : f32
    %618 = vector.broadcast %cst_213 : f32 to vector<64x128xf32>
    %619 = arith.subf %384, %618 : vector<64x128xf32>
    %cst_214 = arith.constant 1.250000e+00 : f32
    %620 = vector.broadcast %cst_214 : f32 to vector<64x128xf32>
    %621 = arith.mulf %619, %620 : vector<64x128xf32>
    %622 = arith.mulf %621, %518 : vector<64x128xf32>
    %cst_215 = arith.constant 1.000000e+00 : f32
    %623 = vector.broadcast %cst_215 : f32 to vector<64x128xf32>
    %624 = arith.subf %623, %384 : vector<64x128xf32>
    %cst_216 = arith.constant 1.250000e+00 : f32
    %625 = vector.broadcast %cst_216 : f32 to vector<64x128xf32>
    %626 = arith.mulf %624, %625 : vector<64x128xf32>
    %627 = arith.mulf %626, %529 : vector<64x128xf32>
    %628 = arith.addf %622, %627 : vector<64x128xf32>
    %cst_217 = arith.constant 2.000000e-01 : f32
    %629 = vector.broadcast %cst_217 : f32 to vector<64x128xf32>
    %630 = arith.subf %384, %629 : vector<64x128xf32>
    %cst_218 = arith.constant 1.250000e+00 : f32
    %631 = vector.broadcast %cst_218 : f32 to vector<64x128xf32>
    %632 = arith.mulf %630, %631 : vector<64x128xf32>
    %633 = arith.mulf %632, %529 : vector<64x128xf32>
    %cst_219 = arith.constant 1.400000e+00 : f32
    %634 = vector.broadcast %cst_219 : f32 to vector<64x128xf32>
    %635 = arith.subf %634, %384 : vector<64x128xf32>
    %cst_220 = arith.constant 1.250000e+00 : f32
    %636 = vector.broadcast %cst_220 : f32 to vector<64x128xf32>
    %637 = arith.mulf %635, %636 : vector<64x128xf32>
    %638 = arith.mulf %637, %540 : vector<64x128xf32>
    %639 = arith.addf %633, %638 : vector<64x128xf32>
    %cst_221 = arith.constant 6.000000e-01 : f32
    %640 = vector.broadcast %cst_221 : f32 to vector<64x128xf32>
    %641 = arith.subf %384, %640 : vector<64x128xf32>
    %cst_222 = arith.constant 1.250000e+00 : f32
    %642 = vector.broadcast %cst_222 : f32 to vector<64x128xf32>
    %643 = arith.mulf %641, %642 : vector<64x128xf32>
    %644 = arith.mulf %643, %540 : vector<64x128xf32>
    %cst_223 = arith.constant 1.800000e+00 : f32
    %645 = vector.broadcast %cst_223 : f32 to vector<64x128xf32>
    %646 = arith.subf %645, %384 : vector<64x128xf32>
    %cst_224 = arith.constant 1.250000e+00 : f32
    %647 = vector.broadcast %cst_224 : f32 to vector<64x128xf32>
    %648 = arith.mulf %646, %647 : vector<64x128xf32>
    %649 = arith.mulf %648, %551 : vector<64x128xf32>
    %650 = arith.addf %644, %649 : vector<64x128xf32>
    %cst_225 = arith.constant 1.000000e+00 : f32
    %651 = vector.broadcast %cst_225 : f32 to vector<64x128xf32>
    %652 = arith.subf %384, %651 : vector<64x128xf32>
    %cst_226 = arith.constant 1.250000e+00 : f32
    %653 = vector.broadcast %cst_226 : f32 to vector<64x128xf32>
    %654 = arith.mulf %652, %653 : vector<64x128xf32>
    %655 = arith.mulf %654, %551 : vector<64x128xf32>
    %cst_227 = arith.constant 2.200000e+00 : f32
    %656 = vector.broadcast %cst_227 : f32 to vector<64x128xf32>
    %657 = arith.subf %656, %384 : vector<64x128xf32>
    %cst_228 = arith.constant 1.250000e+00 : f32
    %658 = vector.broadcast %cst_228 : f32 to vector<64x128xf32>
    %659 = arith.mulf %657, %658 : vector<64x128xf32>
    %660 = arith.mulf %659, %562 : vector<64x128xf32>
    %661 = arith.addf %655, %660 : vector<64x128xf32>
    %cst_229 = arith.constant -2.200000e+00 : f32
    %662 = vector.broadcast %cst_229 : f32 to vector<64x128xf32>
    %663 = arith.subf %384, %662 : vector<64x128xf32>
    %cst_230 = arith.constant 0.833333313 : f32
    %664 = vector.broadcast %cst_230 : f32 to vector<64x128xf32>
    %665 = arith.mulf %663, %664 : vector<64x128xf32>
    %666 = arith.mulf %665, %573 : vector<64x128xf32>
    %cst_231 = arith.constant -6.000000e-01 : f32
    %667 = vector.broadcast %cst_231 : f32 to vector<64x128xf32>
    %668 = arith.subf %667, %384 : vector<64x128xf32>
    %cst_232 = arith.constant 0.833333313 : f32
    %669 = vector.broadcast %cst_232 : f32 to vector<64x128xf32>
    %670 = arith.mulf %668, %669 : vector<64x128xf32>
    %671 = arith.mulf %670, %584 : vector<64x128xf32>
    %672 = arith.addf %666, %671 : vector<64x128xf32>
    %cst_233 = arith.constant -1.800000e+00 : f32
    %673 = vector.broadcast %cst_233 : f32 to vector<64x128xf32>
    %674 = arith.subf %384, %673 : vector<64x128xf32>
    %cst_234 = arith.constant 0.833333313 : f32
    %675 = vector.broadcast %cst_234 : f32 to vector<64x128xf32>
    %676 = arith.mulf %674, %675 : vector<64x128xf32>
    %677 = arith.mulf %676, %584 : vector<64x128xf32>
    %cst_235 = arith.constant -2.000000e-01 : f32
    %678 = vector.broadcast %cst_235 : f32 to vector<64x128xf32>
    %679 = arith.subf %678, %384 : vector<64x128xf32>
    %cst_236 = arith.constant 0.833333313 : f32
    %680 = vector.broadcast %cst_236 : f32 to vector<64x128xf32>
    %681 = arith.mulf %679, %680 : vector<64x128xf32>
    %682 = arith.mulf %681, %595 : vector<64x128xf32>
    %683 = arith.addf %677, %682 : vector<64x128xf32>
    %cst_237 = arith.constant -1.400000e+00 : f32
    %684 = vector.broadcast %cst_237 : f32 to vector<64x128xf32>
    %685 = arith.subf %384, %684 : vector<64x128xf32>
    %cst_238 = arith.constant 0.833333313 : f32
    %686 = vector.broadcast %cst_238 : f32 to vector<64x128xf32>
    %687 = arith.mulf %685, %686 : vector<64x128xf32>
    %688 = arith.mulf %687, %595 : vector<64x128xf32>
    %cst_239 = arith.constant 2.000000e-01 : f32
    %689 = vector.broadcast %cst_239 : f32 to vector<64x128xf32>
    %690 = arith.subf %689, %384 : vector<64x128xf32>
    %cst_240 = arith.constant 0.833333313 : f32
    %691 = vector.broadcast %cst_240 : f32 to vector<64x128xf32>
    %692 = arith.mulf %690, %691 : vector<64x128xf32>
    %693 = arith.mulf %692, %606 : vector<64x128xf32>
    %694 = arith.addf %688, %693 : vector<64x128xf32>
    %cst_241 = arith.constant -1.000000e+00 : f32
    %695 = vector.broadcast %cst_241 : f32 to vector<64x128xf32>
    %696 = arith.subf %384, %695 : vector<64x128xf32>
    %cst_242 = arith.constant 0.833333313 : f32
    %697 = vector.broadcast %cst_242 : f32 to vector<64x128xf32>
    %698 = arith.mulf %696, %697 : vector<64x128xf32>
    %699 = arith.mulf %698, %606 : vector<64x128xf32>
    %cst_243 = arith.constant 6.000000e-01 : f32
    %700 = vector.broadcast %cst_243 : f32 to vector<64x128xf32>
    %701 = arith.subf %700, %384 : vector<64x128xf32>
    %cst_244 = arith.constant 0.833333313 : f32
    %702 = vector.broadcast %cst_244 : f32 to vector<64x128xf32>
    %703 = arith.mulf %701, %702 : vector<64x128xf32>
    %704 = arith.mulf %703, %617 : vector<64x128xf32>
    %705 = arith.addf %699, %704 : vector<64x128xf32>
    %cst_245 = arith.constant -6.000000e-01 : f32
    %706 = vector.broadcast %cst_245 : f32 to vector<64x128xf32>
    %707 = arith.subf %384, %706 : vector<64x128xf32>
    %cst_246 = arith.constant 0.833333313 : f32
    %708 = vector.broadcast %cst_246 : f32 to vector<64x128xf32>
    %709 = arith.mulf %707, %708 : vector<64x128xf32>
    %710 = arith.mulf %709, %617 : vector<64x128xf32>
    %cst_247 = arith.constant 1.000000e+00 : f32
    %711 = vector.broadcast %cst_247 : f32 to vector<64x128xf32>
    %712 = arith.subf %711, %384 : vector<64x128xf32>
    %cst_248 = arith.constant 0.833333313 : f32
    %713 = vector.broadcast %cst_248 : f32 to vector<64x128xf32>
    %714 = arith.mulf %712, %713 : vector<64x128xf32>
    %715 = arith.mulf %714, %628 : vector<64x128xf32>
    %716 = arith.addf %710, %715 : vector<64x128xf32>
    %cst_249 = arith.constant -2.000000e-01 : f32
    %717 = vector.broadcast %cst_249 : f32 to vector<64x128xf32>
    %718 = arith.subf %384, %717 : vector<64x128xf32>
    %cst_250 = arith.constant 0.833333313 : f32
    %719 = vector.broadcast %cst_250 : f32 to vector<64x128xf32>
    %720 = arith.mulf %718, %719 : vector<64x128xf32>
    %721 = arith.mulf %720, %628 : vector<64x128xf32>
    %cst_251 = arith.constant 1.400000e+00 : f32
    %722 = vector.broadcast %cst_251 : f32 to vector<64x128xf32>
    %723 = arith.subf %722, %384 : vector<64x128xf32>
    %cst_252 = arith.constant 0.833333313 : f32
    %724 = vector.broadcast %cst_252 : f32 to vector<64x128xf32>
    %725 = arith.mulf %723, %724 : vector<64x128xf32>
    %726 = arith.mulf %725, %639 : vector<64x128xf32>
    %727 = arith.addf %721, %726 : vector<64x128xf32>
    %cst_253 = arith.constant 2.000000e-01 : f32
    %728 = vector.broadcast %cst_253 : f32 to vector<64x128xf32>
    %729 = arith.subf %384, %728 : vector<64x128xf32>
    %cst_254 = arith.constant 0.833333313 : f32
    %730 = vector.broadcast %cst_254 : f32 to vector<64x128xf32>
    %731 = arith.mulf %729, %730 : vector<64x128xf32>
    %732 = arith.mulf %731, %639 : vector<64x128xf32>
    %cst_255 = arith.constant 1.800000e+00 : f32
    %733 = vector.broadcast %cst_255 : f32 to vector<64x128xf32>
    %734 = arith.subf %733, %384 : vector<64x128xf32>
    %cst_256 = arith.constant 0.833333313 : f32
    %735 = vector.broadcast %cst_256 : f32 to vector<64x128xf32>
    %736 = arith.mulf %734, %735 : vector<64x128xf32>
    %737 = arith.mulf %736, %650 : vector<64x128xf32>
    %738 = arith.addf %732, %737 : vector<64x128xf32>
    %cst_257 = arith.constant 6.000000e-01 : f32
    %739 = vector.broadcast %cst_257 : f32 to vector<64x128xf32>
    %740 = arith.subf %384, %739 : vector<64x128xf32>
    %cst_258 = arith.constant 0.833333313 : f32
    %741 = vector.broadcast %cst_258 : f32 to vector<64x128xf32>
    %742 = arith.mulf %740, %741 : vector<64x128xf32>
    %743 = arith.mulf %742, %650 : vector<64x128xf32>
    %cst_259 = arith.constant 2.200000e+00 : f32
    %744 = vector.broadcast %cst_259 : f32 to vector<64x128xf32>
    %745 = arith.subf %744, %384 : vector<64x128xf32>
    %cst_260 = arith.constant 0.833333313 : f32
    %746 = vector.broadcast %cst_260 : f32 to vector<64x128xf32>
    %747 = arith.mulf %745, %746 : vector<64x128xf32>
    %748 = arith.mulf %747, %661 : vector<64x128xf32>
    %749 = arith.addf %743, %748 : vector<64x128xf32>
    %750 = arith.truncf %672 : vector<64x128xf32> to vector<64x128xbf16>
    %c64_261 = arith.constant 64 : index
    %c0_262 = arith.constant 0 : index
    %751 = vector.load %arg6[%c64_261, %c0_262] : memref<576x128xbf16, #tpu.memory_space<vmem>>, vector<64x128xbf16>
    tpu.vector_store %arg6[%c64_261, %c0_262], %750 {strides = array<i32>} : memref<576x128xbf16, #tpu.memory_space<vmem>>, vector<64x128xbf16>,
    %752 = arith.truncf %683 : vector<64x128xf32> to vector<64x128xbf16>
    %c128_263 = arith.constant 128 : index
    %c0_264 = arith.constant 0 : index
    %753 = vector.load %arg6[%c128_263, %c0_264] : memref<576x128xbf16, #tpu.memory_space<vmem>>, vector<64x128xbf16>
    tpu.vector_store %arg6[%c128_263, %c0_264], %752 {strides = array<i32>} : memref<576x128xbf16, #tpu.memory_space<vmem>>, vector<64x128xbf16>,
    %754 = arith.truncf %694 : vector<64x128xf32> to vector<64x128xbf16>
    %c192_265 = arith.constant 192 : index
    %c0_266 = arith.constant 0 : index
    %755 = vector.load %arg6[%c192_265, %c0_266] : memref<576x128xbf16, #tpu.memory_space<vmem>>, vector<64x128xbf16>
    tpu.vector_store %arg6[%c192_265, %c0_266], %754 {strides = array<i32>} : memref<576x128xbf16, #tpu.memory_space<vmem>>, vector<64x128xbf16>,
    %756 = arith.truncf %705 : vector<64x128xf32> to vector<64x128xbf16>
    %c256_267 = arith.constant 256 : index
    %c0_268 = arith.constant 0 : index
    %757 = vector.load %arg6[%c256_267, %c0_268] : memref<576x128xbf16, #tpu.memory_space<vmem>>, vector<64x128xbf16>
    tpu.vector_store %arg6[%c256_267, %c0_268], %756 {strides = array<i32>} : memref<576x128xbf16, #tpu.memory_space<vmem>>, vector<64x128xbf16>,
    %758 = arith.truncf %716 : vector<64x128xf32> to vector<64x128xbf16>
    %c320 = arith.constant 320 : index
    %c0_269 = arith.constant 0 : index
    %759 = vector.load %arg6[%c320, %c0_269] : memref<576x128xbf16, #tpu.memory_space<vmem>>, vector<64x128xbf16>
    tpu.vector_store %arg6[%c320, %c0_269], %758 {strides = array<i32>} : memref<576x128xbf16, #tpu.memory_space<vmem>>, vector<64x128xbf16>,
    %760 = arith.truncf %727 : vector<64x128xf32> to vector<64x128xbf16>
    %c384 = arith.constant 384 : index
    %c0_270 = arith.constant 0 : index
    %761 = vector.load %arg6[%c384, %c0_270] : memref<576x128xbf16, #tpu.memory_space<vmem>>, vector<64x128xbf16>
    tpu.vector_store %arg6[%c384, %c0_270], %760 {strides = array<i32>} : memref<576x128xbf16, #tpu.memory_space<vmem>>, vector<64x128xbf16>,
    %762 = arith.truncf %738 : vector<64x128xf32> to vector<64x128xbf16>
    %c448 = arith.constant 448 : index
    %c0_271 = arith.constant 0 : index
    %763 = vector.load %arg6[%c448, %c0_271] : memref<576x128xbf16, #tpu.memory_space<vmem>>, vector<64x128xbf16>
    tpu.vector_store %arg6[%c448, %c0_271], %762 {strides = array<i32>} : memref<576x128xbf16, #tpu.memory_space<vmem>>, vector<64x128xbf16>,
    %764 = arith.truncf %749 : vector<64x128xf32> to vector<64x128xbf16>
    %c512 = arith.constant 512 : index
    %c0_272 = arith.constant 0 : index
    %765 = vector.load %arg6[%c512, %c0_272] : memref<576x128xbf16, #tpu.memory_space<vmem>>, vector<64x128xbf16>
    tpu.vector_store %arg6[%c512, %c0_272], %764 {strides = array<i32>} : memref<576x128xbf16, #tpu.memory_space<vmem>>, vector<64x128xbf16>,
    %c0_273 = arith.constant 0 : index
    %c0_274 = arith.constant 0 : index
    %766 = vector.load %arg3[%c0_273, %c0_274] : memref<32x576xbf16, #tpu.memory_space<vmem>>, vector<32x576xbf16>
    %c0_275 = arith.constant 0 : index
    %c0_276 = arith.constant 0 : index
    %767 = vector.load %arg6[%c0_275, %c0_276] : memref<576x128xbf16, #tpu.memory_space<vmem>>, vector<576x128xbf16>
    %cst_277 = arith.constant dense<0.000000e+00> : vector<32x128xf32>
    %768 = tpu.matmul %766, %767, %cst_277 {dimension_numbers = #tpu.dot_dimension_numbers<[1], [0], [0], [1], [0, 0, 1, 1], [], []>} : vector<32x576xbf16>, vector<576x128xbf16>, vector<32x128xf32> -> vector<32x128xf32>
    %c0_278 = arith.constant 0 : index
    %c0_279 = arith.constant 0 : index
    %769 = vector.load %arg4[%c0_278, %c0_279] : memref<32x128xf32, #tpu.memory_space<vmem>>, vector<32x128xf32>
    tpu.vector_store %arg4[%c0_278, %c0_279], %768 {strides = array<i32>} : memref<32x128xf32, #tpu.memory_space<vmem>>, vector<32x128xf32>,
    return
  }
  func.func @transform_0(%arg0: i32) -> (i32, i32) {
    %c0_i32 = arith.constant 0 : i32
    %c0_i32_0 = arith.constant 0 : i32
    return %c0_i32, %arg0 : i32, i32
  }
  func.func @transform_1(%arg0: i32) -> (i32, i32) {
    %c0_i32 = arith.constant 0 : i32
    %c0_i32_0 = arith.constant 0 : i32
    %c0_i32_1 = arith.constant 0 : i32
    return %c0_i32, %c0_i32_0 : i32, i32
  }
  func.func @transform_2(%arg0: i32) -> (i32, i32) {
    %c0_i32 = arith.constant 0 : i32
    %c0_i32_0 = arith.constant 0 : i32
    %c0_i32_1 = arith.constant 0 : i32
    return %c0_i32, %c0_i32_0 : i32, i32
  }
  func.func @transform_3(%arg0: i32) -> (i32, i32) {
    %c0_i32 = arith.constant 0 : i32
    %c0_i32_0 = arith.constant 0 : i32
    return %c0_i32, %arg0 : i32, i32
  }
}

</mosaic_0001>

<bundles_post_ra>
// kernel: kan_forward.1
= control target key start
LH: loop header
LB: loop body
LE: loop exit
PB: predicated region body
PF: predicated region fallthrough
CT: control target
= control target key end

     0   :  { %8 = vsyncpa [#allocation6], 0  ;;  %s6606_s0 = inlined_call_operand.vmem [shape: f32[32,256], index: 0, kind: input, shape index: {}]   ;;  %s6607_s1 = inlined_call_operand.vmem [shape: bf16[64,288], index: 1, kind: input, shape index: {}]   ;;  %s6608_s2 = inlined_call_operand.vmem [shape: bf16[32,576], index: 2, kind: input, shape index: {}]   ;;  %s6609_s3 = inlined_call_operand.hbm [shape: f32[32,256], index: 3, kind: output, shape index: {}]  }
   0x1   :  { %10 = vsyncpa [#allocation6 + $0x1], 0  ;;  %s4048_s12 = smov 0   ;;  %s4050_s13 = smov 0  }
   0x2   :  { %s4052_s14 = smov 0   ;;  %s4054_s15 = smov 0  }
   0x3 LB: > { %s3397_s16 = sadd.s32 4294967295, %s4021_s15   ;;  %s3398_s17 = sadd.s32 4294967294, %s4021_s15   ;;  %s4021_s15 = sphi %s4054_s15, %s7248_s15   ;;  %s4017_s14 = sphi %s4052_s14, %s7247_s14   ;;  %s4013_s13 = sphi %s4050_s13, %s7246_s13   ;;  %s4009_s12 = sphi %s4048_s12, %s7245_s12  }
   0x4   : > { %s4071_s18 = sadd.s32 1, %s4021_s15   ;;  %s23_s19 = sadd.s32 1, %s4017_s14 }
   0x5   : > { %s20_s20 = ssub.s32 %s4021_s15, %s4071_s18  ;;  %p30_p0 = scmp.ne.s32.totalorder %s4017_s14, %s4013_s13 }
   0x6   : > { %p21_p1 = scmp.eq.s32.totalorder %s20_s20, 0  ;;  %p31_p2 = scmp.eq.s32.totalorder %s4021_s15, 0 }
   0x7   : > { %p102_p3 = scmp.eq.s32.totalorder %s3397_s16, 1  ;;  %p107_p4 = scmp.ne.s32.totalorder %s4013_s13, %s4009_s12 }
   0x8   : > { %s4084_s21 = scalar_select %p21_p1, %s4017_s14, %s23_s19  }
   0x9   : > { %p32_p5 = por %p31_p2, %p30_p0  ;;  %p4086_p6 = por %p102_p3, %p30_p0 }
   0xa   : > { %p108_p7 = scmp.eq.s32.totalorder %s3398_s17, 1  ;;  %p3400_p9 = scmp.ge.s32.totalorder %s4021_s15, 2 }
   0xc   : > { %p4090_p8 = por %p108_p7, %p107_p4  ;;  %130 = sbr.rel (%p3400_p9) target bundleno = 26 (0x1a), region = 24 }
  0x13   : > { %133 = sbr.rel (!%p32_p5) target bundleno = 26 (0x1a), region = 28  ;;  %s135_s24 = sand.u32 (%p32_p5), 1, %s4017_s14  }
  0x14   : > { %s3402_s25 = sshll.u32 (%p32_p5), %s4021_s15, 3  ;;  %s3401_s26 = sshll.u32 (%p32_p5), %s135_s24, 5 }
  0x15   : > { %s139_s29 = scalar_lea.vmem (%p32_p5), %s6606_s0, %s3402_s25  ;;  %s137_s30 = scalar_lea.vmem (%p32_p5), [#allocation4], %s3401_s26 }
  0x16   : > { %v173_v0 = vld [vmem:[%s139_s29] sm:$0xff] (%p32_p5)  ;;  %v175_v1 = vld [vmem:[%s139_s29 + $0x10] sm:$0xff] (%p32_p5) }
  0x17   : > { %v177_v2 = vld [vmem:[%s139_s29 + $0x20] sm:$0xff] (%p32_p5)  ;;  %174 = vst [vmem:[%s137_s30] sm:$0xff] (%p32_p5), %v173_v0  ;;  %176 = vst [vmem:[%s137_s30 + $0x8] sm:$0xff] (%p32_p5), %v175_v1  ;;  %v179_v3 = vld [vmem:[%s139_s29 + $0x30] sm:$0xff] (%p32_p5) }
  0x18   : > { %178 = vst [vmem:[%s137_s30 + $0x10] sm:$0xff] (%p32_p5), %v177_v2  ;;  %180 = vst [vmem:[%s137_s30 + $0x18] sm:$0xff] (%p32_p5), %v179_v3 }
  0x1a PF: > { %p3403_p10 = scmp.ge.s32.totalorder %s4021_s15, 1  ;;  %p185_p11 = scmp.lt.s32.totalorder %s4021_s15, 3 }
  0x1c   : > { %p186_p12 = pnand %p3403_p10, %p185_p11 }
  0x1e   : > { %189 = sbr.rel (%p186_p12) target bundleno = 1124 (0x464), region = 66 }
  0x25   : > { %s192_s4 = sand.u32 1, %s4013_s13   ;;  %v6610_v6 = vmov 0.0   ;;  %s3699_s30 = sshll.u32 %s3397_s16, 7 }
  0x26   : > { %s4107_s5 = sshll.u32 %s192_s4, 5  ;;  %s6560_s7 = scalar_lea.hbm %s6609_s3, %s3699_s30 }
  0x27   : > { %s4110_s6 = scalar_lea.vmem [#allocation4], %s4107_s5  ;;  %s214_s28 = scalar_lea.vmem [#allocation5], %s4107_s5 }
  0x28   : > { %v4113_v4 = vld [vmem:[%s4110_s6] sm:$0xff]  ;;  %v4116_v5 = vld [vmem:[%s4110_s6 + $0x8] sm:$0xff]  ;;  %s3330_s29 = sshll.u32 %s214_s28, 4  ;;  %s6564_s16 = scalar_lea.sflag [#allocation6], %s192_s4  ;;  %s6555_s29 = int_to_ptr.vmem [resolvable:$true] %s3330_s29 }
  0x29   : > { %vm272_vm0 = vcmp.ge.f32.partialorder %v4113_v4, -1.4  ;;  %vm273_vm1 = vcmp.ge.f32.partialorder %v4116_v5, -1.4  ;;  %vm284_vm2 = vcmp.ge.f32.partialorder %v4113_v4, -1.0  ;;  %vm285_vm3 = vcmp.ge.f32.partialorder %v4116_v5, -1.0 }
  0x2a   : > { %v4123_v7 = vsel %vm272_vm0, 1.0, %v6610_v6  ;;  %v4126_v8 = vsel %vm273_vm1, 1.0, %v6610_v6  ;;  %v3418_v9 = vsel %vm284_vm2, 1.0, %v6610_v6  ;;  %v3419_v10 = vsel %vm285_vm3, 1.0, %v6610_v6  ;;  %s3959_s8 = scalar_lea.vmem %s6555_s29, 512  ;;  %s4024_s9 = smov [#allocation5]  }
  0x2b   : > { %vm296_vm4 = vcmp.ge.f32.partialorder %v4113_v4, -0.6  ;;  %vm297_vm5 = vcmp.ge.f32.partialorder %v4116_v5, -0.6  ;;  %vm308_vm6 = vcmp.ge.f32.partialorder %v4113_v4, -0.2  ;;  %v4157_v21 = vsub.f32 %v4123_v7, %v3418_v9  ;;  %p3960_p13 = scmp.ne.s32.totalorder %s6555_s29, %s3959_s8 }
  0x2c   : > { %v3422_v11 = vsel %vm296_vm4, 1.0, %v6610_v6  ;;  %v3423_v12 = vsel %vm297_vm5, 1.0, %v6610_v6  ;;  %vm309_vm7 = vcmp.ge.f32.partialorder %v4116_v5, -0.2  ;;  %v3426_v13 = vsel %vm308_vm6, 1.0, %v6610_v6  ;;  %s3963_s10 = sshll.u32 %s4024_s9, 4  ;;  %s3964_s10 = int_to_ptr.vmem [resolvable:$false] %s3963_s10 }
  0x2d   : > { %v3427_v14 = vsel %vm309_vm7, 1.0, %v6610_v6  ;;  %vm320_vm8 = vcmp.ge.f32.partialorder %v4113_v4, 0.2  ;;  %vm321_vm9 = vcmp.ge.f32.partialorder %v4116_v5, 0.2  ;;  %vm344_vm10 = vcmp.ge.f32.partialorder %v4113_v4, 1.0  ;;  %p3961_p0 = pnand %p3960_p13, %p4086_p6  ;;  %p3966_p2 = scmp.lt.s32.totalorder %s6555_s29, %s3964_s10 }
  0x2e   : > { %v3430_v15 = vsel %vm320_vm8, 1.0, %v6610_v6  ;;  %v3431_v16 = vsel %vm321_vm9, 1.0, %v6610_v6  ;;  %vm332_vm11 = vcmp.ge.f32.partialorder %v4113_v4, 0.6  ;;  %vm333_vm12 = vcmp.ge.f32.partialorder %v4116_v5, 0.6 }
  0x2f   : > { %v3434_v17 = vsel %vm332_vm11, 1.0, %v6610_v6  ;;  %v4147_v18 = vsel %vm333_vm12, 1.0, %v6610_v6  ;;  %vm345_vm13 = vcmp.ge.f32.partialorder %v4116_v5, 1.0  ;;  %v4151_v19 = vsel %vm344_vm10, 1.0, %v6610_v6  ;;  %p3962_p1 = pneg %p3961_p0  ;;  %s3965_s11 = scalar_lea.vmem %s3964_s10, 1024 }
  0x30   : > { %6830 = vst [vmem:[#allocation8_spill] sm:$0xff] %v4151_v19  ;;  %v4154_v20 = vsel %vm345_vm13, 1.0, %v6610_v6  ;;  %v4160_v22 = vsub.f32 %v4126_v8, %v3419_v10  ;;  %v4162_v23 = vsub.f32 %v3418_v9, %v3422_v11  ;;  %v4164_v24 = vsub.f32 %v3419_v10, %v3423_v12  ;;  %p3967_p3 = scmp.lt.s32.totalorder %s3965_s11, %s3959_s8 }
  0x31   : > { %6831 = vst [vmem:[#allocation9_spill] sm:$0xff] %v4154_v20  ;;  %v408_v25 = vsub.f32 %v3422_v11, %v3426_v13  ;;  %v409_v26 = vsub.f32 %v3423_v12, %v3427_v14  ;;  %v412_v27 = vsub.f32 %v3426_v13, %v3430_v15  ;;  %v413_v28 = vsub.f32 %v3427_v14, %v3431_v16 }
  0x32   : > { %v4166_v29 = vsub.f32 %v3430_v15, %v3434_v17  ;;  %v4169_v30 = vsub.f32 %v3431_v16, %v4147_v18  ;;  %v3466_v31 = vadd.f32 1.0, %v4113_v4  ;;  %v3467_v32 = vadd.f32 1.0, %v4116_v5  ;;  %p3968_p4 = por %p3967_p3, %p3966_p2 }
  0x33   : > { %v4174_v33 = vsub.f32 -0.2, %v4113_v4  ;;  %v4177_v34 = vsub.f32 -0.2, %v4116_v5  ;;  %v4180_v35 = vsub.f32 %v3434_v17, %v4151_v19  ;;  %v4183_v36 = vadd.f32 0.6, %v4113_v4 }
  0x34   : > { %v4186_v37 = vadd.f32 0.6, %v4116_v5  ;;  %v4189_v38 = vsub.f32 0.2, %v4113_v4  ;;  %v524_v39 = vmul.f32 2.5, %v3466_v31  ;;  %v525_v40 = vmul.f32 2.5, %v3467_v32  ;;  %p3969_p5 = pnand %p3968_p4, %p3962_p1 }
  0x35   : > { %6832 = vst [vmem:[#allocation10_spill] sm:$0xff] %v4174_v33  ;;  %6833 = vst [vmem:[#allocation11_spill] sm:$0xff] %v4177_v34  ;;  %v536_v41 = vmul.f32 2.5, %v4174_v33  ;;  %v537_v42 = vmul.f32 2.5, %v4177_v34  ;;  %v552_v43 = vmul.f32 2.5, %v4183_v36  ;;  %v776_v1 = vmul.f32 1.25, %v3466_v31 }
  0x36   : > { %6834 = vst [vmem:[#allocation12_spill] sm:$0xff] %v4189_v38  ;;  %v553_v44 = vmul.f32 2.5, %v4186_v37  ;;  %v4196_v45 = vsub.f32 0.2, %v4116_v5  ;;  %v564_v46 = vmul.f32 2.5, %v4189_v38  ;;  %v528_v47 = vmul.f32 %v524_v39, %v4162_v23 }
  0x37   : > { %v529_v48 = vmul.f32 %v525_v40, %v4164_v24  ;;  %v540_v49 = vmul.f32 %v536_v41, %v408_v25  ;;  %v541_v50 = vmul.f32 %v537_v42, %v409_v26  ;;  %v556_v51 = vmul.f32 %v552_v43, %v408_v25 }
  0x38   : > { %6835 = vst [vmem:[#allocation13_spill] sm:$0xff] %v4196_v45  ;;  %v557_v52 = vmul.f32 %v553_v44, %v409_v26  ;;  %v565_v53 = vmul.f32 2.5, %v4196_v45  ;;  %v568_v54 = vmul.f32 %v564_v46, %v412_v27  ;;  %v4207_v57 = vadd.f32 0.2, %v4113_v4 }
  0x39   : > { %v4202_v55 = vadd.f32 %v540_v49, %v528_v47  ;;  %v4204_v56 = vadd.f32 %v541_v50, %v529_v48  ;;  %v4210_v58 = vadd.f32 0.2, %v4116_v5  ;;  %v588_v61 = vsub.f32 0.6, %v4113_v4 }
  0x3a   : > { %v569_v59 = vmul.f32 %v565_v53, %v413_v28  ;;  %v572_v60 = vadd.f32 %v568_v54, %v556_v51  ;;  %v589_v62 = vsub.f32 0.6, %v4116_v5  ;;  %v580_v63 = vmul.f32 2.5, %v4207_v57 }
  0x3b   : > { %6836 = vst [vmem:[#allocation14_spill] sm:$0xff] %v4202_v55  ;;  %6837 = vst [vmem:[#allocation15_spill] sm:$0xff] %v4204_v56  ;;  %v581_v0 = vmul.f32 2.5, %v4210_v58  ;;  %v777_v2 = vmul.f32 1.25, %v3467_v32  ;;  %v592_v9 = vmul.f32 2.5, %v588_v61  ;;  %v784_v11 = vmul.f32 1.25, %v4189_v38 }
  0x3c   : > { %v573_v3 = vadd.f32 %v569_v59, %v557_v52  ;;  %v593_v10 = vmul.f32 2.5, %v589_v62  ;;  %v584_v12 = vmul.f32 %v580_v63, %v412_v27  ;;  %v780_v14 = vmul.f32 %v776_v1, %v4202_v55  ;;  %v4238_v1 = vld [vmem:[%s4110_s6 + $0x10] sm:$0xff] }
  0x3d   : > { %v585_v13 = vmul.f32 %v581_v0, %v413_v28  ;;  %v781_v15 = vmul.f32 %v777_v2, %v4204_v56  ;;  %v596_v16 = vmul.f32 %v592_v9, %v4166_v29  ;;  %v785_v25 = vmul.f32 1.25, %v4196_v45  ;;  %v4246_v2 = vld [vmem:[%s4110_s6 + $0x18] sm:$0xff] }
  0x3e   : > { %v597_v17 = vmul.f32 %v593_v10, %v4169_v30  ;;  %v788_v26 = vmul.f32 %v784_v11, %v572_v60  ;;  %v796_v39 = vmul.f32 1.25, %v4183_v36  ;;  %v797_v40 = vmul.f32 1.25, %v4186_v37 }
  0x3f   : > { %v804_v41 = vmul.f32 1.25, %v588_v61  ;;  %v805_v42 = vmul.f32 1.25, %v589_v62  ;;  %v4224_v43 = vadd.f32 %v596_v16, %v584_v12  ;;  %v789_v28 = vmul.f32 %v785_v25, %v573_v3 }
  0x40   : > { %v4226_v27 = vadd.f32 %v597_v17, %v585_v13  ;;  %v4228_v44 = vadd.f32 %v788_v26, %v780_v14  ;;  %v800_v46 = vmul.f32 %v796_v39, %v572_v60  ;;  %v801_v47 = vmul.f32 %v797_v40, %v573_v3 }
  0x41   : > { %v956_v48 = vmul.f32 0.8333333, %v3466_v31  ;;  %v957_v49 = vmul.f32 0.8333333, %v3467_v32  ;;  %v4230_v50 = vadd.f32 %v789_v28, %v781_v15  ;;  %v808_v51 = vmul.f32 %v804_v41, %v4224_v43 }
  0x42   : > { %6838 = vst [vmem:[#allocation16_spill] sm:$0xff] %v4228_v44  ;;  %v809_v52 = vmul.f32 %v805_v42, %v4226_v27  ;;  %v964_v53 = vmul.f32 0.8333333, %v588_v61  ;;  %v965_v59 = vmul.f32 0.8333333, %v589_v62  ;;  %v220_v63 = vsub.f32 0.0, %v4113_v4 }
  0x43   : > { %6839 = vst [vmem:[#allocation17_spill] sm:$0xff] %v4230_v50  ;;  %v960_v54 = vmul.f32 %v956_v48, %v4228_v44  ;;  %v221_v0 = vsub.f32 0.0, %v4116_v5  ;;  %v4240_v60 = vadd.f32 %v808_v51, %v800_v46  ;;  %v961_v32 = vmul.f32 %v957_v49, %v4230_v50 }
  0x44   : > { %v4242_v31 = vadd.f32 %v809_v52, %v801_v47  ;;  %vm286_vm14 = vcmp.ge.f32.partialorder %v4238_v1, -1.0  ;;  %v4251_v61 = vsub.f32 %v4147_v18, %v4154_v20  ;;  %v224_v62 = vmul.f32 1.442695, %v220_v63 }
  0x45   : > { %v226_v3 = vmul.f32 1.442695, %v221_v0  ;;  %vm287_vm15 = vcmp.ge.f32.partialorder %v4246_v2, -1.0  ;;  %v968_v9 = vmul.f32 %v964_v53, %v4240_v60  ;;  %v4257_v11 = vsel %vm286_vm14, 1.0, %v6610_v6 }
  0x46   : > { %v969_v10 = vmul.f32 %v965_v59, %v4242_v31  ;;  %vm298_vm0 = vcmp.ge.f32.partialorder %v4238_v1, -0.6  ;;  %3907 = vpow2.f32 %v224_v62  ;;  %v4261_v12 = vsel %vm287_vm15, 1.0, %v6610_v6 }
  0x47   : > { %vm299_vm1 = vcmp.ge.f32.partialorder %v4246_v2, -0.6  ;;  %vm310_vm2 = vcmp.ge.f32.partialorder %v4238_v1, -0.2  ;;  %v972_v18 = vadd.f32 %v968_v9, %v960_v54  ;;  %3909 = vpow2.f32 %v226_v3 }
  0x48   : > { %v973_v13 = vadd.f32 %v969_v10, %v961_v32  ;;  %v3424_v14 = vsel %vm298_vm0, 1.0, %v6610_v6  ;;  %v3425_v15 = vsel %vm299_vm1, 1.0, %v6610_v6  ;;  %vm311_vm3 = vcmp.ge.f32.partialorder %v4246_v2, -0.2 }
  0x49   : > { %v3428_v16 = vsel %vm310_vm2, 1.0, %v6610_v6  ;;  %vm322_vm4 = vcmp.ge.f32.partialorder %v4238_v1, 0.2  ;;  %v3429_v25 = vsel %vm311_vm3, 1.0, %v6610_v6  ;;  %vm323_vm5 = vcmp.ge.f32.partialorder %v4246_v2, 0.2 }
  0x4a   : > { %v1068_v17 = vpack.c.bf16 %v973_v13, %v972_v18  ;;  %v3432_v26 = vsel %vm322_vm4, 1.0, %v6610_v6  ;;  %v3433_v39 = vsel %vm323_vm5, 1.0, %v6610_v6  ;;  %vm334_vm6 = vcmp.ge.f32.partialorder %v4238_v1, 0.6 }
  0x4b   : > { %vm335_vm7 = vcmp.ge.f32.partialorder %v4246_v2, 0.6  ;;  %v4277_v40 = vsub.f32 %v4257_v11, %v3424_v14  ;;  %v4280_v41 = vsel %vm334_vm6, 1.0, %v6610_v6  ;;  %v4286_v28 = vsub.f32 %v4261_v12, %v3425_v15 }
  0x4c   : > { %3702 = vmatprep.subr.bf16.mxu0 %v1068_v17  ;;  %v4283_v42 = vsel %vm335_vm7, 1.0, %v6610_v6  ;;  %v410_v46 = vsub.f32 %v3424_v14, %v3428_v16  ;;  %v411_v47 = vsub.f32 %v3425_v15, %v3429_v25  ;;  %v414_v48 = vsub.f32 %v3428_v16, %v3432_v26 }
  0x4d   : > { %6840 = vst [vmem:[#allocation18_spill] sm:$0xff] %v4286_v28  ;;  %v415_v49 = vsub.f32 %v3429_v25, %v3433_v39  ;;  %v4289_v51 = vsub.f32 %v3432_v26, %v4280_v41  ;;  %v4292_v52 = vadd.f32 1.0, %v4238_v1  ;;  %v4295_v53 = vadd.f32 1.0, %v4246_v2 }
  0x4e   : > { %v4298_v54 = vsub.f32 -0.2, %v4238_v1  ;;  %v4301_v59 = vsub.f32 -0.2, %v4246_v2  ;;  %v4304_v63 = vsub.f32 %v3433_v39, %v4283_v42  ;;  %v4307_v0 = vadd.f32 0.6, %v4238_v1 }
  0x4f   : > { %v4310_v32 = vadd.f32 0.6, %v4246_v2  ;;  %v4313_v62 = vsub.f32 0.2, %v4238_v1  ;;  %v526_v3 = vmul.f32 2.5, %v4292_v52  ;;  %v527_v9 = vmul.f32 2.5, %v4295_v53 }
  0x50   : > { %6841 = vst [vmem:[#allocation19_spill] sm:$0xff] %v4298_v54  ;;  %6842 = vst [vmem:[#allocation20_spill] sm:$0xff] %v4301_v59  ;;  %v538_v10 = vmul.f32 2.5, %v4298_v54  ;;  %v539_v18 = vmul.f32 2.5, %v4301_v59  ;;  %v3908_v13 = vpop.eup %3907  ;;  %v554_v14 = vmul.f32 2.5, %v4307_v0  ;;  %v798_v19 = vmul.f32 1.25, %v4307_v0 }
  0x51   : > { %6843 = vst [vmem:[#allocation21_spill] sm:$0xff] %v4313_v62  ;;  %v555_v15 = vmul.f32 2.5, %v4310_v32  ;;  %v4322_v16 = vsub.f32 0.2, %v4246_v2  ;;  %v566_v17 = vmul.f32 2.5, %v4313_v62  ;;  %v3910_v25 = vpop.eup %3909  ;;  %v232_v26 = vadd.f32 1.0, %v3908_v13 }
  0x52   : > { %v530_v39 = vmul.f32 %v526_v3, %v4277_v40  ;;  %v531_v6 = vmul.f32 %v527_v9, %v4286_v28  ;;  %v542_v50 = vmul.f32 %v538_v10, %v410_v46  ;;  %v233_v44 = vadd.f32 1.0, %v3910_v25 }
  0x53   : > { %6844 = vst [vmem:[#allocation22_spill] sm:$0xff] %v4322_v16  ;;  %v543_v45 = vmul.f32 %v539_v18, %v411_v47  ;;  %v558_v38 = vmul.f32 %v554_v14, %v410_v46  ;;  %v559_v59 = vmul.f32 %v555_v15, %v411_v47  ;;  %3911 = vrcp.f32 %v232_v26 }
  0x54   : > { %v4327_v54 = vadd.f32 %v542_v50, %v530_v39  ;;  %v567_v56 = vmul.f32 2.5, %v4322_v16  ;;  %v570_v55 = vmul.f32 %v566_v17, %v414_v48  ;;  %3913 = vrcp.f32 %v233_v44 }
  0x55   : > { %v4330_v34 = vadd.f32 %v543_v45, %v531_v6  ;;  %v4333_v13 = vadd.f32 0.2, %v4238_v1  ;;  %v4336_v3 = vadd.f32 0.2, %v4246_v2  ;;  %v590_v46 = vsub.f32 0.6, %v4238_v1 }
  0x56   : > { %6845 = vst [vmem:[#allocation23_spill] sm:$0xff] %v4327_v54  ;;  %v571_v9 = vmul.f32 %v567_v56, %v415_v49  ;;  %v574_v10 = vadd.f32 %v570_v55, %v558_v38  ;;  %v591_v47 = vsub.f32 0.6, %v4246_v2  ;;  %v778_v44 = vmul.f32 1.25, %v4292_v52 }
  0x57   : > { %6846 = vst [vmem:[#allocation24_spill] sm:$0xff] %v4330_v34  ;;  %6847 = vst [vmem:[#allocation25_spill] sm:$0xff] %v4333_v13  ;;  %v582_v50 = vmul.f32 2.5, %v4333_v13  ;;  %v583_v18 = vmul.f32 2.5, %v4336_v3  ;;  %v779_v6 = vmul.f32 1.25, %v4295_v53  ;;  %v594_v14 = vmul.f32 2.5, %v590_v46 }
  0x58   : > { %6848 = vst [vmem:[#allocation26_spill] sm:$0xff] %v4336_v3  ;;  %v575_v45 = vadd.f32 %v571_v9, %v559_v59  ;;  %v595_v15 = vmul.f32 2.5, %v591_v47  ;;  %v786_v17 = vmul.f32 1.25, %v4313_v62  ;;  %v782_v38 = vmul.f32 %v778_v44, %v4327_v54 }
  0x59   : > { %v586_v25 = vmul.f32 %v582_v50, %v414_v48  ;;  %v587_v56 = vmul.f32 %v583_v18, %v415_v49  ;;  %v783_v55 = vmul.f32 %v779_v6, %v4330_v34  ;;  %v598_v26 = vmul.f32 %v594_v14, %v4289_v51 }
  0x5a   : > { %v599_v39 = vmul.f32 %v595_v15, %v4304_v63  ;;  %v787_v33 = vmul.f32 1.25, %v4322_v16  ;;  %v790_v20 = vmul.f32 %v786_v17, %v574_v10  ;;  %v799_v59 = vmul.f32 1.25, %v4310_v32 }
  0x5b   : > { %v806_v9 = vmul.f32 1.25, %v590_v46  ;;  %v807_v28 = vmul.f32 1.25, %v591_v47  ;;  %v4352_v62 = vadd.f32 %v598_v26, %v586_v25  ;;  %v802_v18 = vmul.f32 %v798_v19, %v574_v10 }
  0x5c   : > { %v4354_v48 = vadd.f32 %v599_v39, %v587_v56  ;;  %v791_v49 = vmul.f32 %v787_v33, %v575_v45  ;;  %v4356_v50 = vadd.f32 %v790_v20, %v782_v38  ;;  %v803_v44 = vmul.f32 %v799_v59, %v575_v45 }
  0x5d   : > { %v958_v6 = vmul.f32 0.8333333, %v4292_v52  ;;  %v959_v14 = vmul.f32 0.8333333, %v4295_v53  ;;  %v3912_v15 = vpop.eup %3911  ;;  %v810_v16 = vmul.f32 %v806_v9, %v4352_v62  ;;  %v966_v25 = vmul.f32 0.8333333, %v590_v46 }
  0x5e   : > { %6849 = vst [vmem:[#allocation27_spill] sm:$0xff] %v4356_v50  ;;  %v4360_v17 = vadd.f32 %v791_v49, %v783_v55  ;;  %v811_v34 = vmul.f32 %v807_v28, %v4354_v48  ;;  %v3914_v26 = vpop.eup %3913  ;;  %v240_v56 = vmul.f32 %v3912_v15, %v4113_v4  ;;  %v967_v33 = vmul.f32 0.8333333, %v591_v47 }
  0x5f   : > { %v962_v20 = vmul.f32 %v958_v6, %v4356_v50  ;;  %v222_v19 = vsub.f32 0.0, %v4238_v1  ;;  %v241_v52 = vmul.f32 %v3914_v26, %v4116_v5  ;;  %v4368_v10 = vadd.f32 %v810_v16, %v802_v18 }
  0x60   : > { %6850 = vst [vmem:[#allocation28_spill] sm:$0xff] %v4360_v17  ;;  %v4370_v53 = vadd.f32 %v811_v34, %v803_v44  ;;  %v963_v45 = vmul.f32 %v959_v14, %v4360_v17  ;;  %v223_v38 = vsub.f32 0.0, %v4246_v2  ;;  %v4375_v46 = vadd.f32 -0.2, %v4113_v4 }
  0x61   : > { %v228_v28 = vmul.f32 1.442695, %v222_v19  ;;  %v616_v55 = vsub.f32 1.0, %v4113_v4  ;;  %v244_v39 = vpack.c.bf16 %v241_v52, %v240_v56  ;;  %v970_v47 = vmul.f32 %v966_v25, %v4368_v10 }
  0x62   : > { %v971_v59 = vmul.f32 %v967_v33, %v4370_v53  ;;  %v4381_v16 = vadd.f32 -0.2, %v4116_v5  ;;  %v230_v34 = vmul.f32 1.442695, %v223_v38  ;;  %v608_v9 = vmul.f32 2.5, %v4375_v46 }
  0x63   : > { %3915 = vpow2.f32 %v228_v28  ;;  %v617_v49 = vsub.f32 1.0, %v4116_v5  ;;  %3703 = vmatpush3.bf16.msra.mxu0 %v244_v39  ;;  %v974_v18 = vadd.f32 %v970_v47, %v962_v20  ;;  %v620_v14 = vmul.f32 2.5, %v616_v55 }
  0x64   : > { %v975_v44 = vadd.f32 %v971_v59, %v963_v45  ;;  %v609_v6 = vmul.f32 2.5, %v4381_v16  ;;  %3917 = vpow2.f32 %v230_v34  ;;  %v612_v15 = vmul.f32 %v608_v9, %v4166_v29 }
  0x65   : > { %v621_v25 = vmul.f32 2.5, %v617_v49  ;;  %v816_v26 = vmul.f32 1.25, %v4207_v57  ;;  %v624_v19 = vmul.f32 %v620_v14, %v4180_v35  ;;  %v817_v52 = vmul.f32 1.25, %v4210_v58 }
  0x66   : > { %v1069_v56 = vpack.c.bf16 %v975_v44, %v974_v18  ;;  %v613_v33 = vmul.f32 %v609_v6, %v4169_v30  ;;  %v824_v45 = vmul.f32 1.25, %v616_v55  ;;  %v825_v28 = vmul.f32 1.25, %v617_v49 }
  0x67   : > { %v625_v38 = vmul.f32 %v621_v25, %v4251_v61  ;;  %v820_v20 = vmul.f32 %v816_v26, %v4224_v43  ;;  %v4393_v39 = vadd.f32 %v624_v19, %v612_v15  ;;  %v821_v29 = vmul.f32 %v817_v52, %v4226_v27 }
  0x68   : > { %3704 = vmatprep.subr.bf16.mxu0 %v1069_v56  ;;  %v976_v47 = vmul.f32 0.8333333, %v4183_v36  ;;  %v977_v59 = vmul.f32 0.8333333, %v4186_v37  ;;  %v984_v34 = vmul.f32 0.8333333, %v616_v55 }
  0x69   : > { %v4398_v30 = vadd.f32 %v625_v38, %v613_v33  ;;  %v985_v9 = vmul.f32 0.8333333, %v617_v49  ;;  %vm248_vm8 = vcmp.ge.f32.partialorder %v4113_v4, -2.2  ;;  %v828_v18 = vmul.f32 %v824_v45, %v4393_v39 }
  0x6a   : > { %v980_v43 = vmul.f32 %v976_v47, %v4240_v60  ;;  %v981_v44 = vmul.f32 %v977_v59, %v4242_v31  ;;  %vm249_vm9 = vcmp.ge.f32.partialorder %v4116_v5, -2.2  ;;  %v6851_v6 = vmov 0.0  }
  0x6b   : > { %v829_v27 = vmul.f32 %v825_v28, %v4398_v30  ;;  %v3406_v36 = vsel %vm248_vm8, 1.0, %v6851_v6  ;;  %v3407_v37 = vsel %vm249_vm9, 1.0, %v6851_v6  ;;  %vm260_vm10 = vcmp.ge.f32.partialorder %v4113_v4, -1.8 }
  0x6c   : > { %v4409_v55 = vadd.f32 %v828_v18, %v820_v20  ;;  %vm261_vm11 = vcmp.ge.f32.partialorder %v4116_v5, -1.8  ;;  %v3410_v49 = vsel %vm260_vm10, 1.0, %v6851_v6  ;;  %v4414_v60 = vadd.f32 2.2, %v4113_v4 }
  0x6d   : > { %v3916_v31 = vpop.eup %3915  ;;  %v4416_v14 = vadd.f32 %v829_v27, %v821_v29  ;;  %v3411_v15 = vsel %vm261_vm11, 1.0, %v6851_v6  ;;  %v392_v25 = vsub.f32 %v3406_v36, %v3410_v49  ;;  %v396_v26 = vsub.f32 %v3410_v49, %v4123_v7 }
  0x6e   : > { %6852 = vst [vmem:[#allocation29_spill] sm:$0xff] %v4409_v55  ;;  %v234_v56 = vadd.f32 1.0, %v3916_v31  ;;  %v988_v33 = vmul.f32 %v984_v34, %v4409_v55  ;;  %v393_v19 = vsub.f32 %v3407_v37, %v3411_v15  ;;  %v397_v52 = vsub.f32 %v3411_v15, %v4126_v8  ;;  %v3918_v38 = vpop.eup %3917 }
  0x6f   : > { %6853 = vst [vmem:[#allocation30_spill] sm:$0xff] %v4416_v14  ;;  %v989_v20 = vmul.f32 %v985_v9, %v4416_v14  ;;  %v4424_v45 = vadd.f32 2.2, %v4116_v5  ;;  %v440_v28 = vmul.f32 2.5, %v4414_v60  ;;  %v448_v29 = vsub.f32 -1.4, %v4113_v4 }
  0x70   : > { %v235_v47 = vadd.f32 1.0, %v3918_v38  ;;  %3919 = vrcp.f32 %v234_v56  ;;  %v4428_v59 = vadd.f32 %v988_v33, %v980_v43  ;;  %v449_v7 = vsub.f32 -1.4, %v4116_v5 }
  0x71   : > { %v4431_v34 = vadd.f32 %v989_v20, %v981_v44  ;;  %v441_v8 = vmul.f32 2.5, %v4424_v45  ;;  %v444_v18 = vmul.f32 %v440_v28, %v392_v25  ;;  %v452_v27 = vmul.f32 2.5, %v448_v29 }
  0x72   : > { %3921 = vrcp.f32 %v235_v47  ;;  %v453_v9 = vmul.f32 2.5, %v449_v7  ;;  %v4435_v36 = vadd.f32 1.8, %v4113_v4  ;;  %v4438_v37 = vadd.f32 1.8, %v4116_v5 }
  0x73   : > { %v445_v49 = vmul.f32 %v441_v8, %v393_v19  ;;  %v456_v31 = vmul.f32 %v452_v27, %v396_v26  ;;  %v476_v44 = vsub.f32 -1.0, %v4113_v4  ;;  %v477_v33 = vsub.f32 -1.0, %v4116_v5 }
  0x74   : > { %v457_v15 = vmul.f32 %v453_v9, %v397_v52  ;;  %v468_v56 = vmul.f32 2.5, %v4435_v36  ;;  %v469_v25 = vmul.f32 2.5, %v4438_v37  ;;  %v4447_v28 = vadd.f32 1.4, %v4113_v4 }
  0x75   : > { %v460_v38 = vadd.f32 %v456_v31, %v444_v18  ;;  %v480_v20 = vmul.f32 2.5, %v476_v44  ;;  %v4450_v29 = vadd.f32 1.4, %v4116_v5  ;;  %v481_v8 = vmul.f32 2.5, %v477_v33 }
  0x76   : > { %v461_v47 = vadd.f32 %v457_v15, %v445_v49  ;;  %v472_v19 = vmul.f32 %v468_v56, %v396_v26  ;;  %v473_v7 = vmul.f32 %v469_v25, %v397_v52  ;;  %v496_v9 = vmul.f32 2.5, %v4447_v28 }
  0x77   : > { %6854 = vst [vmem:[#allocation31_spill] sm:$0xff] %v4450_v29  ;;  %v484_v27 = vmul.f32 %v480_v20, %v4157_v21  ;;  %v497_v43 = vmul.f32 2.5, %v4450_v29  ;;  %v504_v17 = vsub.f32 -0.6, %v4113_v4  ;;  %v485_v18 = vmul.f32 %v481_v8, %v4160_v22  ;;  %v3879_v4 = vld [vmem:[%s6607_s1 + $0x4] ss:$12 sps:$4 sm:$0xff]  }
  0x78   : > { %v505_v31 = vsub.f32 -0.6, %v4116_v5  ;;  %v716_v50 = vmul.f32 1.25, %v4414_v60  ;;  %v717_v54 = vmul.f32 1.25, %v4424_v45  ;;  %v500_v26 = vmul.f32 %v496_v9, %v4157_v21  ;;  %1227 = vmatprep.mubr.bf16.mxu0 %v3879_v4 }
  0x79   : > { %v488_v49 = vadd.f32 %v484_v27, %v472_v19  ;;  %v501_v52 = vmul.f32 %v497_v43, %v4160_v22  ;;  %v508_v15 = vmul.f32 2.5, %v504_v17  ;;  %v489_v25 = vadd.f32 %v485_v18, %v473_v7 }
  0x7a   : > { %v3920_v56 = vpop.eup %3919  ;;  %v509_v20 = vmul.f32 2.5, %v505_v31  ;;  %v720_v29 = vmul.f32 %v716_v50, %v460_v38  ;;  %v721_v14 = vmul.f32 %v717_v54, %v461_v47  ;;  %v724_v55 = vmul.f32 1.25, %v476_v44 }
  0x7b   : > { %v242_v5 = vmul.f32 %v3920_v56, %v4238_v1  ;;  %v512_v8 = vmul.f32 %v508_v15, %v4162_v23  ;;  %v725_v19 = vmul.f32 1.25, %v477_v33  ;;  %v736_v22 = vmul.f32 1.25, %v4435_v36 }
  0x7c   : > { %v3922_v27 = vpop.eup %3921  ;;  %v513_v21 = vmul.f32 %v509_v20, %v4164_v24  ;;  %v737_v43 = vmul.f32 1.25, %v4438_v37  ;;  %v744_v7 = vmul.f32 1.25, %v504_v17  ;;  %v728_v38 = vmul.f32 %v724_v55, %v488_v49 }
  0x7d   : > { %v243_v54 = vmul.f32 %v3922_v27, %v4246_v2  ;;  %v4471_v50 = vadd.f32 %v512_v8, %v500_v26  ;;  %v729_v47 = vmul.f32 %v725_v19, %v489_v25  ;;  %v740_v23 = vmul.f32 %v736_v22, %v488_v49 }
  0x7e   : > { %v4473_v9 = vadd.f32 %v513_v21, %v501_v52  ;;  %v741_v44 = vmul.f32 %v737_v43, %v489_v25  ;;  %v745_v33 = vmul.f32 1.25, %v505_v31  ;;  %v732_v15 = vadd.f32 %v728_v38, %v720_v29 }
  0x7f   : > { %v245_v18 = vpack.c.bf16 %v243_v54, %v242_v5  ;;  %v733_v24 = vadd.f32 %v729_v47, %v721_v14  ;;  %v748_v56 = vmul.f32 %v744_v7, %v4471_v50  ;;  %v896_v4 = vmul.f32 0.8333333, %v4414_v60 }
  0x80   : > { %v749_v20 = vmul.f32 %v745_v33, %v4473_v9  ;;  %v897_v27 = vmul.f32 0.8333333, %v4424_v45  ;;  %v904_v26 = vmul.f32 0.8333333, %v504_v17  ;;  %v905_v52 = vmul.f32 0.8333333, %v505_v31 }
  0x81   : > { %3705 = vmatpush3.bf16.msra.mxu0 %v245_v18  ;;  %v4479_v55 = vadd.f32 %v748_v56, %v740_v23  ;;  %vm346_vm12 = vcmp.ge.f32.partialorder %v4238_v1, 1.0  ;;  %vm347_vm13 = vcmp.ge.f32.partialorder %v4246_v2, 1.0  ;;  %v6855_v14 = vpack.c.bf16 %v4431_v34, %v4428_v59 }
  0x82   : > { %v4486_v29 = vadd.f32 %v749_v20, %v741_v44  ;;  %v900_v49 = vmul.f32 %v896_v4, %v732_v15  ;;  %v901_v25 = vmul.f32 %v897_v27, %v733_v24  ;;  %v4489_v60 = vsel %vm346_vm12, 1.0, %v6851_v6 }
  0x83   : > { %3706 = vmatprep.subr.bf16.mxu0 %v6855_v14  ;;  %v908_v17 = vmul.f32 %v904_v26, %v4479_v55  ;;  %v4493_v45 = vsel %vm347_vm13, 1.0, %v6851_v6  ;;  %v4497_v31 = vsub.f32 %v4280_v41, %v4489_v60  ;;  %v4500_v5 = vadd.f32 -0.2, %v4238_v1 }
  0x84   : > { %v909_v59 = vmul.f32 %v905_v52, %v4486_v29  ;;  %v4505_v34 = vsub.f32 %v4283_v42, %v4493_v45  ;;  %v4508_v8 = vadd.f32 -0.2, %v4246_v2  ;;  %v618_v19 = vsub.f32 1.0, %v4238_v1 }
  0x85   : > { %v912_v21 = vadd.f32 %v908_v17, %v900_v49  ;;  %v610_v22 = vmul.f32 2.5, %v4500_v5  ;;  %v619_v41 = vsub.f32 1.0, %v4246_v2  ;;  %v818_v43 = vmul.f32 1.25, %v4333_v13 }
  0x86   : > { %v913_v7 = vadd.f32 %v909_v59, %v901_v25  ;;  %v611_v54 = vmul.f32 2.5, %v4508_v8  ;;  %v622_v38 = vmul.f32 2.5, %v618_v19  ;;  %v819_v47 = vmul.f32 1.25, %v4336_v3 }
  0x87   : > { %v614_v42 = vmul.f32 %v610_v22, %v4289_v51  ;;  %v623_v23 = vmul.f32 2.5, %v619_v41  ;;  %v822_v44 = vmul.f32 %v818_v43, %v4352_v62  ;;  %v826_v33 = vmul.f32 1.25, %v618_v19 }
  0x88   : > { %v1056_v18 = vpack.c.bf16 %v913_v7, %v912_v21  ;;  %v615_v15 = vmul.f32 %v611_v54, %v4304_v63  ;;  %v626_v24 = vmul.f32 %v622_v38, %v4497_v31  ;;  %v823_v56 = vmul.f32 %v819_v47, %v4354_v48 }
  0x89   : > { %v627_v20 = vmul.f32 %v623_v23, %v4505_v34  ;;  %v827_v4 = vmul.f32 1.25, %v619_v41  ;;  %v978_v27 = vmul.f32 0.8333333, %v4307_v0  ;;  %v979_v26 = vmul.f32 0.8333333, %v4310_v32 }
  0x8a   : > { %3707 = vmatpush3.bf16.msra.mxu0 %v1056_v18  ;;  %v4524_v51 = vadd.f32 %v626_v24, %v614_v42  ;;  %v986_v52 = vmul.f32 0.8333333, %v618_v19  ;;  %v987_v62 = vmul.f32 0.8333333, %v619_v41  ;;  %vm250_vm14 = vcmp.ge.f32.partialorder %v4238_v1, -2.2 }
  0x8b   : > { %v4527_v14 = vadd.f32 %v627_v20, %v615_v15  ;;  %v982_v63 = vmul.f32 %v978_v27, %v4368_v10  ;;  %v983_v48 = vmul.f32 %v979_v26, %v4370_v53  ;;  %vm251_vm15 = vcmp.ge.f32.partialorder %v4246_v2, -2.2 }
  0x8c   : > { %v830_v49 = vmul.f32 %v826_v33, %v4524_v51  ;;  %v3408_v0 = vsel %vm250_vm14, 1.0, %v6851_v6  ;;  %v3409_v32 = vsel %vm251_vm15, 1.0, %v6851_v6  ;;  %vm262_vm0 = vcmp.ge.f32.partialorder %v4238_v1, -1.8 }
  0x8d   : > { %v831_v25 = vmul.f32 %v827_v4, %v4527_v14  ;;  %vm263_vm1 = vcmp.ge.f32.partialorder %v4246_v2, -1.8  ;;  %v3412_v17 = vsel %vm262_vm0, 1.0, %v6851_v6  ;;  %vm274_vm2 = vcmp.ge.f32.partialorder %v4238_v1, -1.4 }
  0x8e   : > { %v4540_v10 = vadd.f32 %v830_v49, %v822_v44  ;;  %v3413_v53 = vsel %vm263_vm1, 1.0, %v6851_v6  ;;  %vm275_vm3 = vcmp.ge.f32.partialorder %v4246_v2, -1.4  ;;  %v3416_v59 = vsel %vm274_vm2, 1.0, %v6851_v6 }
  0x8f   : > { %v4545_v19 = vadd.f32 %v831_v25, %v823_v56  ;;  %v3417_v21 = vsel %vm275_vm3, 1.0, %v6851_v6  ;;  %v394_v22 = vsub.f32 %v3408_v0, %v3412_v17  ;;  %v395_v41 = vsub.f32 %v3409_v32, %v3413_v53 }
  0x90   : > { %6856 = vst [vmem:[#allocation32_spill] sm:$0xff] %v4540_v10  ;;  %v990_v43 = vmul.f32 %v986_v52, %v4540_v10  ;;  %v398_v7 = vsub.f32 %v3412_v17, %v3416_v59  ;;  %v399_v54 = vsub.f32 %v3413_v53, %v3417_v21  ;;  %v402_v38 = vsub.f32 %v3416_v59, %v4257_v11 }
  0x91   : > { %6857 = vst [vmem:[#allocation33_spill] sm:$0xff] %v4545_v19  ;;  %v991_v47 = vmul.f32 %v987_v62, %v4545_v19  ;;  %v403_v42 = vsub.f32 %v3417_v21, %v4261_v12  ;;  %v3456_v23 = vadd.f32 2.2, %v4238_v1  ;;  %v3457_v44 = vadd.f32 2.2, %v4246_v2 }
  0x92   : > { %v994_v33 = vadd.f32 %v990_v43, %v982_v63  ;;  %v450_v18 = vsub.f32 -1.4, %v4238_v1  ;;  %v451_v15 = vsub.f32 -1.4, %v4246_v2  ;;  %v4557_v24 = vadd.f32 1.8, %v4238_v1 }
  0x93   : > { %v995_v56 = vadd.f32 %v991_v47, %v983_v48  ;;  %v442_v20 = vmul.f32 2.5, %v3456_v23  ;;  %v443_v4 = vmul.f32 2.5, %v3457_v44  ;;  %v4560_v11 = vadd.f32 1.8, %v4246_v2 }
  0x94   : > { %v454_v27 = vmul.f32 2.5, %v450_v18  ;;  %v455_v12 = vmul.f32 2.5, %v451_v15  ;;  %v470_v26 = vmul.f32 2.5, %v4557_v24  ;;  %v478_v52 = vsub.f32 -1.0, %v4238_v1 }
  0x95   : > { %v1073_v62 = vpack.c.bf16 %v995_v56, %v994_v33  ;;  %v446_v63 = vmul.f32 %v442_v20, %v394_v22  ;;  %v447_v49 = vmul.f32 %v443_v4, %v395_v41  ;;  %v471_v0 = vmul.f32 2.5, %v4560_v11 }
  0x96   : > { %v458_v32 = vmul.f32 %v454_v27, %v398_v7  ;;  %v459_v25 = vmul.f32 %v455_v12, %v399_v54  ;;  %v474_v17 = vmul.f32 %v470_v26, %v398_v7  ;;  %v479_v48 = vsub.f32 -1.0, %v4246_v2 }
  0x97   : > { %3708 = vmatprep.subr.bf16.mxu0 %v1073_v62  ;;  %v475_v53 = vmul.f32 %v471_v0, %v399_v54  ;;  %v482_v59 = vmul.f32 2.5, %v478_v52  ;;  %v4567_v21 = vadd.f32 1.4, %v4238_v1  ;;  %v4570_v43 = vadd.f32 1.4, %v4246_v2 }
  0x98   : > { %v462_v47 = vadd.f32 %v458_v32, %v446_v63  ;;  %v463_v33 = vadd.f32 %v459_v25, %v447_v49  ;;  %v483_v22 = vmul.f32 2.5, %v479_v48  ;;  %v506_v41 = vsub.f32 -0.6, %v4238_v1 }
  0x99   : > { %6858 = vst [vmem:[#allocation34_spill] sm:$0xff] %v4567_v21  ;;  %6859 = vst [vmem:[#allocation35_spill] sm:$0xff] %v4570_v43  ;;  %v486_v18 = vmul.f32 %v482_v59, %v402_v38  ;;  %v498_v15 = vmul.f32 2.5, %v4567_v21  ;;  %v499_v7 = vmul.f32 2.5, %v4570_v43  ;;  %v507_v56 = vsub.f32 -0.6, %v4246_v2 }
  0x9a   : > { %v487_v54 = vmul.f32 %v483_v22, %v403_v42  ;;  %v510_v20 = vmul.f32 2.5, %v506_v41  ;;  %v718_v4 = vmul.f32 1.25, %v3456_v23  ;;  %v719_v27 = vmul.f32 1.25, %v3457_v44  ;;  %v6860_v59 = vld [vmem:[#allocation18_spill] sm:$0xff] }
  0x9b   : > { %v490_v12 = vadd.f32 %v486_v18, %v474_v17  ;;  %v502_v26 = vmul.f32 %v498_v15, %v402_v38  ;;  %v503_v62 = vmul.f32 %v499_v7, %v403_v42  ;;  %v511_v0 = vmul.f32 2.5, %v507_v56 }
  0x9c   : > { %v491_v63 = vadd.f32 %v487_v54, %v475_v53  ;;  %v514_v49 = vmul.f32 %v510_v20, %v4277_v40  ;;  %v722_v32 = vmul.f32 %v718_v4, %v462_v47  ;;  %v723_v25 = vmul.f32 %v719_v27, %v463_v33  ;;  %v4589_v27 = vld [vmem:[%s4110_s6] sm:$0xff] }
  0x9d   : > { %v515_v19 = vmul.f32 %v511_v0, %v6860_v59  ;;  %v726_v21 = vmul.f32 1.25, %v478_v52  ;;  %v727_v10 = vmul.f32 1.25, %v479_v48  ;;  %v738_v43 = vmul.f32 1.25, %v4557_v24 }
  0x9e   : > { %v4579_v3 = vadd.f32 %v514_v49, %v502_v26  ;;  %v739_v22 = vmul.f32 1.25, %v4560_v11  ;;  %v746_v13 = vmul.f32 1.25, %v506_v41  ;;  %v747_v38 = vmul.f32 1.25, %v507_v56 }
  0x9f   : > { %v4582_v42 = vadd.f32 %v515_v19, %v503_v62  ;;  %v730_v17 = vmul.f32 %v726_v21, %v490_v12  ;;  %v731_v40 = vmul.f32 %v727_v10, %v491_v63  ;;  %v742_v53 = vmul.f32 %v738_v43, %v490_v12  ;;  %v4593_v19 = vld [vmem:[%s4110_s6 + $0x8] sm:$0xff] }
  0xa0   : > { %v743_v47 = vmul.f32 %v739_v22, %v491_v63  ;;  %v750_v33 = vmul.f32 %v746_v13, %v4579_v3  ;;  %v898_v52 = vmul.f32 0.8333333, %v3456_v23  ;;  %v899_v48 = vmul.f32 0.8333333, %v3457_v44  ;;  %v6862_v62 = vld [vmem:[#allocation9_spill] sm:$0xff] }
  0xa1   : > { %v734_v18 = vadd.f32 %v730_v17, %v722_v32  ;;  %v735_v15 = vadd.f32 %v731_v40, %v723_v25  ;;  %v751_v7 = vmul.f32 %v747_v38, %v4582_v42  ;;  %v906_v54 = vmul.f32 0.8333333, %v506_v41  ;;  %v6861_v41 = vld [vmem:[#allocation8_spill] sm:$0xff] }
  0xa2   : > { %v4586_v20 = vadd.f32 %v750_v33, %v742_v53  ;;  %v907_v4 = vmul.f32 0.8333333, %v507_v56  ;;  %vm356_vm4 = vcmp.ge.f32.partialorder %v4589_v27, 1.4  ;;  %vm357_vm5 = vcmp.ge.f32.partialorder %v4593_v19, 1.4 }
  0xa3   : > { %v4596_v10 = vadd.f32 %v751_v7, %v743_v47  ;;  %v902_v13 = vmul.f32 %v898_v52, %v734_v18  ;;  %v903_v23 = vmul.f32 %v899_v48, %v735_v15  ;;  %v4599_v44 = vsel %vm356_vm4, 1.0, %v6851_v6 }
  0xa4   : > { %v910_v21 = vmul.f32 %v906_v54, %v4586_v20  ;;  %v4603_v43 = vsel %vm357_vm5, 1.0, %v6851_v6  ;;  %v4607_v56 = vsub.f32 %v6861_v41, %v4599_v44  ;;  %v4610_v12 = vadd.f32 -0.6, %v4589_v27 }
  0xa5   : > { %v911_v26 = vmul.f32 %v907_v4, %v4596_v10  ;;  %v4615_v0 = vsub.f32 %v6862_v62, %v4603_v43  ;;  %v4618_v63 = vadd.f32 -0.6, %v4593_v19  ;;  %v644_v49 = vsub.f32 1.4, %v4589_v27 }
  0xa6   : > { %v914_v32 = vadd.f32 %v910_v21, %v902_v13  ;;  %v636_v25 = vmul.f32 2.5, %v4610_v12  ;;  %v645_v59 = vsub.f32 1.4, %v4593_v19  ;;  %v836_v22 = vmul.f32 1.25, %v4375_v46 }
  0xa7   : > { %v915_v38 = vadd.f32 %v911_v26, %v903_v23  ;;  %v637_v17 = vmul.f32 2.5, %v4618_v63  ;;  %v648_v40 = vmul.f32 2.5, %v644_v49  ;;  %v837_v53 = vmul.f32 1.25, %v4381_v16 }
  0xa8   : > { %v640_v47 = vmul.f32 %v636_v25, %v4180_v35  ;;  %v649_v33 = vmul.f32 2.5, %v645_v59  ;;  %v840_v52 = vmul.f32 %v836_v22, %v4393_v39  ;;  %v844_v48 = vmul.f32 1.25, %v644_v49  ;;  %v6864_v25 = vld [vmem:[#allocation30_spill] sm:$0xff]  ;;  %v6865_v22 = vld [vmem:[#allocation31_spill] sm:$0xff] }
  0xa9   : > { %v1057_v18 = vpack.c.bf16 %v915_v38, %v914_v32  ;;  %v641_v15 = vmul.f32 %v637_v17, %v4251_v61  ;;  %v652_v7 = vmul.f32 %v648_v40, %v4607_v56  ;;  %v841_v54 = vmul.f32 %v837_v53, %v4398_v30  ;;  %v6863_v61 = vld [vmem:[#allocation29_spill] sm:$0xff]  ;;  %v6867_v53 = vld [vmem:[#allocation11_spill] sm:$0xff] }
  0xaa   : > { %v653_v4 = vmul.f32 %v649_v33, %v4615_v0  ;;  %v845_v13 = vmul.f32 1.25, %v645_v59  ;;  %v996_v23 = vmul.f32 0.8333333, %v4207_v57  ;;  %v997_v21 = vmul.f32 0.8333333, %v4210_v58  ;;  %v6866_v58 = vld [vmem:[#allocation10_spill] sm:$0xff] }
  0xab   : > { %3709 = vmatpush3.bf16.msra.mxu0 %v1057_v18  ;;  %v4634_v35 = vadd.f32 %v652_v7, %v640_v47  ;;  %v1004_v41 = vmul.f32 0.8333333, %v644_v49  ;;  %v1005_v39 = vmul.f32 0.8333333, %v645_v59  ;;  %v756_v26 = vmul.f32 1.25, %v4447_v28  ;;  %v6868_v7 = vld [vmem:[#allocation14_spill] sm:$0xff] }
  0xac   : > { %v4637_v62 = vadd.f32 %v653_v4, %v641_v15  ;;  %v1000_v32 = vmul.f32 %v996_v23, %v6863_v61  ;;  %v1001_v30 = vmul.f32 %v997_v21, %v6864_v25  ;;  %v757_v38 = vmul.f32 1.25, %v6865_v22  ;;  %v6869_v23 = vld [vmem:[#allocation15_spill] sm:$0xff] }
  0xad   : > { %v848_v17 = vmul.f32 %v844_v48, %v4634_v35  ;;  %v760_v57 = vmul.f32 %v756_v26, %v4471_v50  ;;  %v764_v40 = vmul.f32 1.25, %v6866_v58  ;;  %v765_v47 = vmul.f32 1.25, %v6867_v53 }
  0xae   : > { %v849_v49 = vmul.f32 %v845_v13, %v4637_v62  ;;  %v761_v59 = vmul.f32 %v757_v38, %v4473_v9  ;;  %v916_v33 = vmul.f32 0.8333333, %v4435_v36  ;;  %v917_v18 = vmul.f32 0.8333333, %v4438_v37 }
  0xaf   : > { %v4650_v15 = vadd.f32 %v848_v17, %v840_v52  ;;  %v768_v4 = vmul.f32 %v764_v40, %v6868_v7  ;;  %v769_v48 = vmul.f32 %v765_v47, %v6869_v23  ;;  %v924_v50 = vmul.f32 0.8333333, %v6866_v58 }
  0xb0   : > { %v4655_v21 = vadd.f32 %v849_v49, %v841_v54  ;;  %v920_v26 = vmul.f32 %v916_v33, %v4479_v55  ;;  %v921_v13 = vmul.f32 %v917_v18, %v4486_v29  ;;  %v925_v9 = vmul.f32 0.8333333, %v6867_v53 }
  0xb1   : > { %v1008_v36 = vmul.f32 %v1004_v41, %v4650_v15  ;;  %v4661_v61 = vadd.f32 %v768_v4, %v760_v57  ;;  %v4663_v37 = vadd.f32 %v769_v48, %v761_v59  ;;  %vm358_vm6 = vcmp.ge.f32.partialorder %v4238_v1, 1.4 }
  0xb2   : > { %v1009_v52 = vmul.f32 %v1005_v39, %v4655_v21  ;;  %vm359_vm7 = vcmp.ge.f32.partialorder %v4246_v2, 1.4  ;;  %v4669_v54 = vsel %vm358_vm6, 1.0, %v6851_v6  ;;  %v4672_v55 = vadd.f32 -0.6, %v4238_v1 }
  0xb3   : > { %v1012_v29 = vadd.f32 %v1008_v36, %v1000_v32  ;;  %v928_v25 = vmul.f32 %v924_v50, %v4661_v61  ;;  %v929_v41 = vmul.f32 %v925_v9, %v4663_v37  ;;  %v4677_v38 = vsel %vm359_vm7, 1.0, %v6851_v6  ;;  %v6871_v36 = vld [vmem:[#allocation26_spill] sm:$0xff] }
  0xb4   : > { %v1013_v17 = vadd.f32 %v1009_v52, %v1001_v30  ;;  %v4681_v39 = vsub.f32 %v4489_v60, %v4669_v54  ;;  %v4685_v57 = vsub.f32 %v4493_v45, %v4677_v38  ;;  %v4688_v58 = vadd.f32 -0.6, %v4246_v2 }
  0xb5   : > { %v932_v32 = vadd.f32 %v928_v25, %v920_v26  ;;  %v933_v40 = vadd.f32 %v929_v41, %v921_v13  ;;  %v638_v53 = vmul.f32 2.5, %v4672_v55  ;;  %v646_v47 = vsub.f32 1.4, %v4238_v1  ;;  %v6870_v13 = vld [vmem:[#allocation25_spill] sm:$0xff] }
  0xb6   : > { %v1076_v49 = vpack.c.bf16 %v1013_v17, %v1012_v29  ;;  %v639_v30 = vmul.f32 2.5, %v4688_v58  ;;  %v647_v59 = vsub.f32 1.4, %v4246_v2  ;;  %v838_v60 = vmul.f32 1.25, %v4500_v5 }
  0xb7   : > { %v1060_v33 = vpack.c.bf16 %v933_v40, %v932_v32  ;;  %v642_v45 = vmul.f32 %v638_v53, %v4497_v31  ;;  %v650_v18 = vmul.f32 2.5, %v646_v47  ;;  %v839_v7 = vmul.f32 1.25, %v4508_v8  ;;  %v6874_v40 = vld [vmem:[#allocation35_spill] sm:$0xff] }
  0xb8   : > { %3710 = vmatprep.subr.bf16.mxu0 %v1076_v49  ;;  %v643_v4 = vmul.f32 %v639_v30, %v4505_v34  ;;  %v651_v23 = vmul.f32 2.5, %v647_v59  ;;  %v842_v48 = vmul.f32 %v838_v60, %v4524_v51  ;;  %v846_v1 = vmul.f32 1.25, %v646_v47  ;;  %v6872_v34 = vld [vmem:[#allocation32_spill] sm:$0xff]  ;;  %v6873_v51 = vld [vmem:[#allocation34_spill] sm:$0xff]  ;;  %v6876_v60 = vld [vmem:[#allocation19_spill] sm:$0xff] }
  0xb9   : > { %3711 = vmatpush3.bf16.msra.mxu0 %v1060_v33  ;;  %v654_v50 = vmul.f32 %v650_v18, %v4681_v39  ;;  %v843_v2 = vmul.f32 %v839_v7, %v4527_v14  ;;  %v847_v26 = vmul.f32 1.25, %v647_v59  ;;  %v998_v9 = vmul.f32 0.8333333, %v6870_v13  ;;  %v6875_v14 = vld [vmem:[#allocation33_spill] sm:$0xff]  ;;  %v6877_v18 = vld [vmem:[#allocation20_spill] sm:$0xff]  ;;  %v6878_v13 = vld [vmem:[#allocation23_spill] sm:$0xff] }
  0xba   : > { %v655_v31 = vmul.f32 %v651_v23, %v4685_v57  ;;  %v999_v52 = vmul.f32 0.8333333, %v6871_v36  ;;  %v1006_v29 = vmul.f32 0.8333333, %v646_v47  ;;  %v1007_v25 = vmul.f32 0.8333333, %v647_v59 }
  0xbb   : > { %v4704_v41 = vadd.f32 %v654_v50, %v642_v45  ;;  %v1002_v17 = vmul.f32 %v998_v9, %v6872_v34  ;;  %v758_v32 = vmul.f32 1.25, %v6873_v51  ;;  %v759_v53 = vmul.f32 1.25, %v6874_v40 }
  0xbc   : > { %v4709_v49 = vadd.f32 %v655_v31, %v643_v4  ;;  %v1003_v30 = vmul.f32 %v999_v52, %v6875_v14  ;;  %v766_v33 = vmul.f32 1.25, %v6876_v60  ;;  %v767_v7 = vmul.f32 1.25, %v6877_v18  ;;  %v6879_v4 = vld [vmem:[#allocation24_spill] sm:$0xff] }
  0xbd   : > { %v850_v23 = vmul.f32 %v846_v1, %v4704_v41  ;;  %v762_v47 = vmul.f32 %v758_v32, %v4579_v3  ;;  %v763_v59 = vmul.f32 %v759_v53, %v4582_v42  ;;  %v918_v45 = vmul.f32 0.8333333, %v4557_v24 }
  0xbe   : > { %v851_v50 = vmul.f32 %v847_v26, %v4709_v49  ;;  %v770_v9 = vmul.f32 %v766_v33, %v6878_v13  ;;  %v771_v31 = vmul.f32 %v767_v7, %v6879_v4  ;;  %v919_v36 = vmul.f32 0.8333333, %v4560_v11 }
  0xbf   : > { %v4722_v52 = vadd.f32 %v850_v23, %v842_v48  ;;  %v922_v34 = vmul.f32 %v918_v45, %v4586_v20  ;;  %v926_v1 = vmul.f32 0.8333333, %v6876_v60  ;;  %v927_v3 = vmul.f32 0.8333333, %v6877_v18 }
  0xc0   : > { %v4727_v32 = vadd.f32 %v851_v50, %v843_v2  ;;  %v4729_v42 = vadd.f32 %v770_v9, %v762_v47  ;;  %v4731_v24 = vadd.f32 %v771_v31, %v763_v59  ;;  %v923_v26 = vmul.f32 %v919_v36, %v4596_v10 }
  0xc1   : > { %v1010_v53 = vmul.f32 %v1006_v29, %v4722_v52  ;;  %vm368_vm8 = vcmp.ge.f32.partialorder %v4589_v27, 1.8  ;;  %vm369_vm9 = vcmp.ge.f32.partialorder %v4593_v19, 1.8  ;;  %v4738_v11 = vadd.f32 -1.0, %v4589_v27 }
  0xc2   : > { %v1011_v20 = vmul.f32 %v1007_v25, %v4727_v32  ;;  %v930_v48 = vmul.f32 %v926_v1, %v4729_v42  ;;  %v931_v2 = vmul.f32 %v927_v3, %v4731_v24  ;;  %v4744_v14 = vsel %vm368_vm8, 1.0, %v6851_v6 }
  0xc3   : > { %v1014_v60 = vadd.f32 %v1010_v53, %v1002_v17  ;;  %v4747_v10 = vsel %vm369_vm9, 1.0, %v6851_v6  ;;  %v4751_v29 = vsub.f32 %v4599_v44, %v4744_v14  ;;  %v4754_v33 = vadd.f32 -1.0, %v4593_v19 }
  0xc4   : > { %v1015_v18 = vadd.f32 %v1011_v20, %v1003_v30  ;;  %v934_v25 = vadd.f32 %v930_v48, %v922_v34  ;;  %v935_v7 = vadd.f32 %v931_v2, %v923_v26  ;;  %v4758_v23 = vsub.f32 %v4603_v43, %v4747_v10 }
  0xc5   : > { %v664_v47 = vmul.f32 2.5, %v4738_v11  ;;  %v665_v17 = vmul.f32 2.5, %v4754_v33  ;;  %v672_v59 = vsub.f32 1.8, %v4589_v27  ;;  %v673_v45 = vsub.f32 1.8, %v4593_v19 }
  0xc6   : > { %v1077_v44 = vpack.c.bf16 %v1015_v18, %v1014_v60  ;;  %v1061_v50 = vpack.c.bf16 %v935_v7, %v934_v25  ;;  %v856_v13 = vmul.f32 1.25, %v4610_v12  ;;  %v857_v30 = vmul.f32 1.25, %v4618_v63 }
  0xc7   : > { %v668_v9 = vmul.f32 %v664_v47, %v4607_v56  ;;  %v669_v4 = vmul.f32 %v665_v17, %v4615_v0  ;;  %v676_v43 = vmul.f32 2.5, %v672_v59  ;;  %v677_v31 = vmul.f32 2.5, %v673_v45  ;;  %v6880_v17 = vld [vmem:[#allocation12_spill] sm:$0xff] }
  0xc8   : > { %3712 = vmatprep.subr.bf16.mxu0 %v1077_v44  ;;  %v860_v36 = vmul.f32 %v856_v13, %v4634_v35  ;;  %v864_v34 = vmul.f32 1.25, %v672_v59  ;;  %v865_v1 = vmul.f32 1.25, %v673_v45  ;;  %v1016_v53 = vmul.f32 0.8333333, %v4375_v46  ;;  %v6881_v44 = vld [vmem:[#allocation13_spill] sm:$0xff] }
  0xc9   : > { %3713 = vmatpush3.bf16.msra.mxu0 %v1061_v50  ;;  %v680_v3 = vmul.f32 %v676_v43, %v4751_v29  ;;  %v681_v26 = vmul.f32 %v677_v31, %v4758_v23  ;;  %v1017_v20 = vmul.f32 0.8333333, %v4381_v16  ;;  %v861_v56 = vmul.f32 %v857_v30, %v4637_v62 }
  0xca   : > { %v1024_v48 = vmul.f32 0.8333333, %v672_v59  ;;  %v1025_v0 = vmul.f32 0.8333333, %v673_v45  ;;  %v936_v2 = vmul.f32 0.8333333, %v4447_v28  ;;  %v1020_v35 = vmul.f32 %v1016_v53, %v4650_v15 }
  0xcb   : > { %v684_v60 = vadd.f32 %v680_v3, %v668_v9  ;;  %v685_v18 = vadd.f32 %v681_v26, %v669_v4  ;;  %v1021_v25 = vmul.f32 %v1017_v20, %v4655_v21  ;;  %v937_v7 = vmul.f32 0.8333333, %v6865_v22  ;;  %v6882_v59 = vld [vmem:[#allocation16_spill] sm:$0xff]  ;;  %v6883_v45 = vld [vmem:[#allocation17_spill] sm:$0xff] }
  0xcc   : > { %v940_v47 = vmul.f32 %v936_v2, %v4661_v61  ;;  %v944_v46 = vmul.f32 0.8333333, %v6880_v17  ;;  %v945_v16 = vmul.f32 0.8333333, %v6881_v44  ;;  %vm380_vm10 = vcmp.ge.f32.partialorder %v4589_v27, 2.2 }
  0xcd   : > { %v868_v50 = vmul.f32 %v864_v34, %v684_v60  ;;  %v869_v62 = vmul.f32 %v865_v1, %v685_v18  ;;  %vm381_vm11 = vcmp.ge.f32.partialorder %v4593_v19, 2.2  ;;  %v941_v28 = vmul.f32 %v937_v7, %v4663_v37 }
  0xce   : > { %v948_v15 = vmul.f32 %v944_v46, %v6882_v59  ;;  %v949_v21 = vmul.f32 %v945_v16, %v6883_v45  ;;  %v3450_v22 = vsel %vm380_vm10, 1.0, %v6851_v6  ;;  %v3451_v30 = vsel %vm381_vm11, 1.0, %v6851_v6  ;;  %v4801_v59 = vld [vmem:[%s4110_s6 + $0x10] sm:$0xff] }
  0xcf   : > { %v872_v13 = vadd.f32 %v868_v50, %v860_v36  ;;  %v873_v61 = vadd.f32 %v869_v62, %v861_v56  ;;  %v432_v9 = vsub.f32 %v4744_v14, %v3450_v22  ;;  %v433_v31 = vsub.f32 %v4747_v10, %v3451_v30 }
  0xd0   : > { %v952_v4 = vadd.f32 %v948_v15, %v940_v47  ;;  %v953_v43 = vadd.f32 %v949_v21, %v941_v28  ;;  %v3490_v34 = vadd.f32 -1.4, %v4589_v27  ;;  %v3491_v3 = vadd.f32 -1.4, %v4593_v19 }
  0xd1   : > { %v1028_v1 = vmul.f32 %v1024_v48, %v872_v13  ;;  %v1029_v37 = vmul.f32 %v1025_v0, %v873_v61  ;;  %v700_v26 = vsub.f32 2.2, %v4589_v27  ;;  %v701_v36 = vsub.f32 2.2, %v4593_v19 }
  0xd2   : > { %v1064_v53 = vpack.c.bf16 %v953_v43, %v952_v4  ;;  %v692_v20 = vmul.f32 2.5, %v3490_v34  ;;  %v876_v56 = vmul.f32 1.25, %v4738_v11  ;;  %v693_v7 = vmul.f32 2.5, %v3491_v3 }
  0xd3   : > { %v1032_v2 = vadd.f32 %v1028_v1, %v1020_v35  ;;  %v1033_v14 = vadd.f32 %v1029_v37, %v1021_v25  ;;  %v704_v47 = vmul.f32 2.5, %v700_v26  ;;  %v705_v17 = vmul.f32 2.5, %v701_v36 }
  0xd4   : > { %v696_v10 = vmul.f32 %v692_v20, %v4751_v29  ;;  %v877_v48 = vmul.f32 1.25, %v4754_v33  ;;  %v880_v0 = vmul.f32 %v876_v56, %v684_v60  ;;  %v697_v27 = vmul.f32 %v693_v7, %v4758_v23  ;;  %v4805_v23 = vld [vmem:[%s4110_s6 + $0x18] sm:$0xff] }
  0xd5   : > { %v1080_v46 = vpack.c.bf16 %v1033_v14, %v1032_v2  ;;  %v708_v44 = vmul.f32 %v704_v47, %v432_v9  ;;  %v884_v16 = vmul.f32 1.25, %v700_v26  ;;  %v709_v19 = vmul.f32 %v705_v17, %v433_v31 }
  0xd6   : > { %v881_v50 = vmul.f32 %v877_v48, %v685_v18  ;;  %v885_v11 = vmul.f32 1.25, %v701_v36  ;;  %v1036_v35 = vmul.f32 0.8333333, %v4610_v12  ;;  %v1037_v29 = vmul.f32 0.8333333, %v4618_v63 }
  0xd7   : > { %3714 = vmatprep.subr.bf16.mxu0 %v1080_v46  ;;  %v712_v25 = vadd.f32 %v708_v44, %v696_v10  ;;  %v1044_v62 = vmul.f32 0.8333333, %v700_v26  ;;  %v1045_v28 = vmul.f32 0.8333333, %v701_v36  ;;  %v713_v33 = vadd.f32 %v709_v19, %v697_v27 }
  0xd8   : > { %3715 = vmatpush3.bf16.msra.mxu0 %v1064_v53  ;;  %v1040_v60 = vmul.f32 %v1036_v35, %v872_v13  ;;  %vm370_vm12 = vcmp.ge.f32.partialorder %v4801_v59, 1.8  ;;  %vm371_vm13 = vcmp.ge.f32.partialorder %v4805_v23, 1.8  ;;  %v1041_v15 = vmul.f32 %v1037_v29, %v873_v61  ;;  %v6884_v35 = vld [vmem:[#allocation21_spill] sm:$0xff]  ;;  %v6885_v29 = vld [vmem:[#allocation22_spill] sm:$0xff] }
  0xd9   : > { %v888_v18 = vmul.f32 %v884_v16, %v712_v25  ;;  %v4809_v12 = vsel %vm370_vm12, 1.0, %v6851_v6  ;;  %v4812_v63 = vsel %vm371_vm13, 1.0, %v6851_v6  ;;  %v889_v45 = vmul.f32 %v885_v11, %v713_v33  ;;  %v6887_v33 = vld [vmem:[#allocation28_spill] sm:$0xff] }
  0xda   : > { %v4816_v21 = vsub.f32 %v4669_v54, %v4809_v12  ;;  %v4820_v22 = vsub.f32 %v4677_v38, %v4812_v63  ;;  %v4823_v13 = vadd.f32 -1.0, %v4801_v59  ;;  %v4826_v61 = vadd.f32 -1.0, %v4805_v23 }
  0xdb   : > { %v892_v30 = vadd.f32 %v888_v18, %v880_v0  ;;  %v674_v9 = vsub.f32 1.8, %v4801_v59  ;;  %v675_v4 = vsub.f32 1.8, %v4805_v23  ;;  %v893_v43 = vadd.f32 %v889_v45, %v881_v50 }
  0xdc   : > { %v666_v31 = vmul.f32 2.5, %v4823_v13  ;;  %v858_v54 = vmul.f32 1.25, %v4672_v55  ;;  %v859_v34 = vmul.f32 1.25, %v4688_v58  ;;  %v667_v1 = vmul.f32 2.5, %v4826_v61 }
  0xdd   : > { %v1048_v38 = vmul.f32 %v1044_v62, %v892_v30  ;;  %v678_v37 = vmul.f32 2.5, %v674_v9  ;;  %v679_v3 = vmul.f32 2.5, %v675_v4  ;;  %v1049_v26 = vmul.f32 %v1045_v28, %v893_v43  ;;  %v6886_v28 = vld [vmem:[#allocation27_spill] sm:$0xff] }
  0xde   : > { %v670_v53 = vmul.f32 %v666_v31, %v4681_v39  ;;  %v862_v20 = vmul.f32 %v858_v54, %v4704_v41  ;;  %v863_v36 = vmul.f32 %v859_v34, %v4709_v49  ;;  %v671_v2 = vmul.f32 %v667_v1, %v4685_v57 }
  0xdf   : > { %v1052_v56 = vadd.f32 %v1048_v38, %v1040_v60  ;;  %v682_v14 = vmul.f32 %v678_v37, %v4816_v21  ;;  %v683_v7 = vmul.f32 %v679_v3, %v4820_v22  ;;  %v1053_v47 = vadd.f32 %v1049_v26, %v1041_v15 }
  0xe0   : > { %v866_v10 = vmul.f32 1.25, %v674_v9  ;;  %v867_v17 = vmul.f32 1.25, %v675_v4  ;;  %v1018_v48 = vmul.f32 0.8333333, %v4500_v5  ;;  %v1019_v39 = vmul.f32 0.8333333, %v4508_v8 }
  0xe1   : > { %v686_v0 = vadd.f32 %v682_v14, %v670_v53  ;;  %v687_v46 = vadd.f32 %v683_v7, %v671_v2  ;;  %v1026_v27 = vmul.f32 0.8333333, %v674_v9  ;;  %v1084_v41 = vpack.c.bf16 %v1053_v47, %v1052_v56 }
  0xe2   : > { %v1022_v49 = vmul.f32 %v1018_v48, %v4722_v52  ;;  %v1027_v44 = vmul.f32 0.8333333, %v675_v4  ;;  %v938_v57 = vmul.f32 0.8333333, %v6873_v51  ;;  %v1023_v50 = vmul.f32 %v1019_v39, %v4727_v32 }
  0xe3   : > { %v870_v16 = vmul.f32 %v866_v10, %v686_v0  ;;  %v871_v19 = vmul.f32 %v867_v17, %v687_v46  ;;  %v939_v11 = vmul.f32 0.8333333, %v6874_v40  ;;  %3810 = vmatprep.subr.bf16.mxu1 %v1084_v41  ;;  %v946_v25 = vmul.f32 0.8333333, %v6884_v35  ;;  %v3881_v35 = vld [vmem:[%s6607_s1 + $0x20] ss:$12 sps:$4 sm:$0xff]  }
  0xe4   : > { %v942_v5 = vmul.f32 %v938_v57, %v4729_v42  ;;  %v947_v8 = vmul.f32 0.8333333, %v6885_v29  ;;  %vm382_vm14 = vcmp.ge.f32.partialorder %v4801_v59, 2.2  ;;  %3811 = vmatpush3.bf16.msra.mxu1 %v1084_v41  ;;  %vm383_vm15 = vcmp.ge.f32.partialorder %v4805_v23, 2.2 }
  0xe5   : > { %v874_v52 = vadd.f32 %v870_v16, %v862_v20  ;;  %v875_v62 = vadd.f32 %v871_v19, %v863_v36  ;;  %v943_v51 = vmul.f32 %v939_v11, %v4731_v24  ;;  %v950_v32 = vmul.f32 %v946_v25, %v6886_v28  ;;  %v3884_v19 = vld [vmem:[%s6607_s1 + $0x18] ss:$12 sps:$4 sm:$0xff]   ;;  %v3887_v29 = vld [vmem:[%s6607_s1 + $0x30] ss:$12 sps:$4 sm:$0xff]  }
  0xe6   : > { %v951_v40 = vmul.f32 %v947_v8, %v6887_v33  ;;  %v3452_v60 = vsel %vm382_vm14, 1.0, %v6851_v6  ;;  %v3453_v42 = vsel %vm383_vm15, 1.0, %v6851_v6  ;;  %v3492_v24 = vadd.f32 -1.4, %v4801_v59  ;;  %v3888_v25 = vld [vmem:[%s6607_s1 + $0x38] ss:$12 sps:$4 sm:$0xff]  }
  0xe7   : > { %v1030_v18 = vmul.f32 %v1026_v27, %v874_v52  ;;  %v1031_v15 = vmul.f32 %v1027_v44, %v875_v62  ;;  %v434_v45 = vsub.f32 %v4809_v12, %v3452_v60  ;;  %v435_v30 = vsub.f32 %v4812_v63, %v3453_v42  ;;  %v3890_v8 = vld [vmem:[%s6607_s1 + $0x4c] ss:$12 sps:$4 sm:$0xff]  }
  0xe8   : > { %v954_v9 = vadd.f32 %v950_v32, %v942_v5  ;;  %v955_v4 = vadd.f32 %v951_v40, %v943_v51  ;;  %v3493_v43 = vadd.f32 -1.4, %v4805_v23  ;;  %v702_v34 = vsub.f32 2.2, %v4801_v59  ;;  %v3880_v59 = vld [vmem:[%s6607_s1 + $0x8] ss:$12 sps:$4 sm:$0xff]  }
  0xe9   : > { %v1034_v31 = vadd.f32 %v1030_v18, %v1022_v49  ;;  %v1035_v54 = vadd.f32 %v1031_v15, %v1023_v50  ;;  %v703_v38 = vsub.f32 2.2, %v4805_v23  ;;  %v694_v37 = vmul.f32 2.5, %v3492_v24 }
  0xea   : > { %v1065_v1 = vpack.c.bf16 %v955_v4, %v954_v9  ;;  %v695_v3 = vmul.f32 2.5, %v3493_v43  ;;  %v878_v26 = vmul.f32 1.25, %v4823_v13  ;;  %v706_v53 = vmul.f32 2.5, %v702_v34  ;;  %v3877_v13 = vld [vmem:[%s6607_s1] ss:$12 sps:$4 sm:$0xff]  }
  0xeb   : > { %v1081_v12 = vpack.c.bf16 %v1035_v54, %v1034_v31  ;;  %v707_v63 = vmul.f32 2.5, %v703_v38  ;;  %v879_v20 = vmul.f32 1.25, %v4826_v61  ;;  %v698_v36 = vmul.f32 %v694_v37, %v4816_v21 }
  0xec   : > { %v699_v56 = vmul.f32 %v695_v3, %v4820_v22  ;;  %v710_v23 = vmul.f32 %v706_v53, %v434_v45  ;;  %v886_v14 = vmul.f32 1.25, %v702_v34  ;;  %v887_v7 = vmul.f32 1.25, %v703_v38  ;;  %v3882_v22 = vld [vmem:[%s6607_s1 + $0x1c] ss:$12 sps:$4 sm:$0xff]  }
  0xed   : > { %3716 = vmatprep.subr.bf16.mxu0 %v1081_v12  ;;  %v711_v2 = vmul.f32 %v707_v63, %v435_v30  ;;  %v882_v47 = vmul.f32 %v878_v26, %v686_v0  ;;  %v883_v61 = vmul.f32 %v879_v20, %v687_v46  ;;  %v1038_v21 = vmul.f32 0.8333333, %v4672_v55 }
  0xee   : > { %3717 = vmatpush3.bf16.msra.mxu0 %v1065_v1  ;;  %v714_v10 = vadd.f32 %v710_v23, %v698_v36  ;;  %v1039_v48 = vmul.f32 0.8333333, %v4688_v58  ;;  %vm1182_vm0 = vcmask 261120   ;;  %v1046_v41 = vmul.f32 0.8333333, %v702_v34 }
  0xef   : > { %v715_v17 = vadd.f32 %v711_v2, %v699_v56  ;;  %3814 = vmatprep.mubr.msk.bf16.mxu1 %vm1182_vm0, %v3880_v59  ;;  %v1047_v49 = vmul.f32 0.8333333, %v703_v38  ;;  %v1042_v55 = vmul.f32 %v1038_v21, %v874_v52  ;;  %v3885_v58 = vld [vmem:[%s6607_s1 + $0x34] ss:$12 sps:$4 sm:$0xff]   ;;  %v3889_v52 = vld [vmem:[%s6607_s1 + $0x50] ss:$12 sps:$4 sm:$0xff]  }
  0xf0   : > { %v890_v39 = vmul.f32 %v886_v14, %v714_v10  ;;  %v1043_v44 = vmul.f32 %v1039_v48, %v875_v62  ;;  %v3892_v62 = vld [vmem:[%s6607_s1 + $0x48] ss:$12 sps:$4 sm:$0xff]  }
  0xf1   : > { %v891_v27 = vmul.f32 %v887_v7, %v715_v17  ;;  %1228 = vmatmul.mubr.bf16.vlgmr.msra.gmra.mrb[0].mxu0 %v3877_v13 }
  0xf2   : > { %1235 = vmatprep.mubr.bf16.mxu0 %v3882_v22  ;;  %v894_v0 = vadd.f32 %v890_v39, %v882_v47 }
  0xf3   : > { %v895_v46 = vadd.f32 %v891_v27, %v883_v61 }
  0xf4   : > { %v1050_v57 = vmul.f32 %v1046_v41, %v894_v0 }
  0xf5   : > { %v1051_v16 = vmul.f32 %v1047_v49, %v895_v46 }
  0xf6   : > { %v1054_v50 = vadd.f32 %v1050_v57, %v1042_v55 }
  0xf7   : > { %v1055_v11 = vadd.f32 %v1051_v16, %v1043_v44 }
  0xf9   : > { %v1085_v5 = vpack.c.bf16 %v1055_v11, %v1054_v50  ;;  %1236 = vmatmul.mubr.bf16.gmra.mrb[4].mxu0 %v3884_v19 }
  0xfa   : > { %1243 = vmatprep.mubr.bf16.mxu0 %v3885_v58 }
  0xfb   : > { %3812 = vmatprep.subr.bf16.mxu1 %v1085_v5 }
  0xfc   : > { %3813 = vmatpush3.bf16.msra.mxu1 %v1085_v5 }
  0xff   : > { %3815 = vmatmul.mubr.msk.bf16.vlgmr.msra.gmra.mrb[0].mxu1 %vm1182_vm0, %v3881_v35 }
 0x100   : > { %3818 = vmatprep.mubr.msk.bf16.mxu1 %vm1182_vm0, %v3888_v25 }
 0x101   : > { %1244 = vmatmul.mubr.bf16.gmra.mrb[8].mxu0 %v3887_v29 }
 0x102   : > { %1251 = vmatprep.mubr.bf16.mxu0 %v3890_v8 }
 0x107   : > { %3819 = vmatmul.mubr.msk.bf16.gmra.mrb[4].mxu1 %vm1182_vm0, %v3889_v52 }
 0x109   : > { %1252 = vmatmul.mubr.bf16.gmra.mrb[12].mxu0 %v3892_v62 }
 0x1c4   : > { %v3718_v51 = vpop.f32.mrb[0].mxu0 }
 0x1c5   : > { %v3719_v28 = vpop.f32.mrb[1].mxu0 }
 0x1c6   : > { %v3720_v32 = vadd.f32 %v3719_v28, %v3718_v51  ;;  %v3721_v33 = vpop.f32.mrb[2].mxu0 }
 0x1c7   : > { %v3722_v40 = vpop.f32.mrb[3].mxu0 }
 0x1c8   : > { %v3723_v60 = vadd.f32 %v3722_v40, %v3721_v33 }
 0x1cc   : > { %v3724_v42 = vpop.f32.mrb[4].mxu0 }
 0x1cd   : > { %v3725_v18 = vpop.f32.mrb[5].mxu0 }
 0x1ce   : > { %v3726_v15 = vadd.f32 %v3725_v18, %v3724_v42  ;;  %v3727_v45 = vpop.f32.mrb[6].mxu0 }
 0x1cf   : > { %v3728_v30 = vpop.f32.mrb[7].mxu0 }
 0x1d0   : > { %v3729_v9 = vadd.f32 %v3728_v30, %v3727_v45 }
 0x1d2   : > { %v3816_v4 = vpop.f32.mrb[0].mxu1 }
 0x1d3   : > { %v1294_v24 = vpop.f32.mrb[1].mxu1  ;;  %v4905_v43 = vadd.f32 %v3816_v4, %v3726_v15 }
 0x1d4   : > { %v4907_v31 = vadd.f32 %v3720_v32, %v1294_v24  ;;  %v3817_v54 = vpop.f32.mrb[2].mxu1  ;;  %v3730_v34 = vpop.f32.mrb[8].mxu0 }
 0x1d5   : > { %v1297_v38 = vpop.f32.mrb[3].mxu1  ;;  %v4909_v1 = vadd.f32 %v3817_v54, %v3729_v9  ;;  %v3731_v37 = vpop.f32.mrb[9].mxu0 }
 0x1d6   : > { %v4911_v3 = vadd.f32 %v3723_v60, %v1297_v38  ;;  %v3732_v26 = vadd.f32 %v3731_v37, %v3730_v34  ;;  %v3733_v12 = vpop.f32.mrb[10].mxu0  ;;  %vm1405_vm1 = vcmp.ge.f32.partialorder %v4907_v31, -1.8  ;;  %vm1429_vm2 = vcmp.ge.f32.partialorder %v4907_v31, -1.4 }
 0x1d7   : > { %v3734_v53 = vpop.f32.mrb[11].mxu0  ;;  %vm1453_vm3 = vcmp.ge.f32.partialorder %v4907_v31, -1.0  ;;  %v4919_v20 = vsel %vm1405_vm1, 1.0, %v6851_v6  ;;  %v3526_v56 = vsel %vm1429_vm2, 1.0, %v6851_v6  ;;  %vm1477_vm7 = vcmp.ge.f32.partialorder %v4907_v31, -0.6 }
 0x1d8   : > { %v3735_v63 = vadd.f32 %v3734_v53, %v3733_v12  ;;  %vm1406_vm4 = vcmp.ge.f32.partialorder %v4911_v3, -1.8  ;;  %vm1430_vm5 = vcmp.ge.f32.partialorder %v4911_v3, -1.4  ;;  %6888 = vst [vmem:[#allocation18_spill] sm:$0xff] %v4919_v20  ;;  %vm1454_vm6 = vcmp.ge.f32.partialorder %v4911_v3, -1.0 }
 0x1d9   : > { %v4922_v36 = vsel %vm1406_vm4, 1.0, %v6851_v6  ;;  %v3527_v23 = vsel %vm1430_vm5, 1.0, %v6851_v6  ;;  %v3534_v2 = vsel %vm1453_vm3, 1.0, %v6851_v6  ;;  %v3535_v7 = vsel %vm1454_vm6, 1.0, %v6851_v6 }
 0x1da   : > { %6889 = vst [vmem:[#allocation8_spill] sm:$0xff] %v4922_v36  ;;  %v3820_v59 = vpop.f32.mrb[4].mxu1  ;;  %vm1478_vm8 = vcmp.ge.f32.partialorder %v4911_v3, -0.6  ;;  %v3542_v13 = vsel %vm1477_vm7, 1.0, %v6851_v6  ;;  %v4939_v10 = vsub.f32 %v4919_v20, %v3526_v56  ;;  %v4946_v27 = vsub.f32 %v4922_v36, %v3527_v23 }
 0x1db   : > { %v1310_v14 = vpop.f32.mrb[5].mxu1  ;;  %v3543_v22 = vsel %vm1478_vm8, 1.0, %v6851_v6  ;;  %vm1501_vm9 = vcmp.ge.f32.partialorder %v4907_v31, -0.2  ;;  %vm1502_vm10 = vcmp.ge.f32.partialorder %v4911_v3, -0.2  ;;  %v1685_v41 = vsub.f32 %v3526_v56, %v3534_v2 }
 0x1dc   : > { %v4932_v47 = vadd.f32 %v3732_v26, %v1310_v14  ;;  %v4934_v61 = vpop.f32.mrb[6].mxu1  ;;  %v3736_v21 = vpop.f32.mrb[12].mxu0  ;;  %6890 = vst [vmem:[#allocation9_spill] sm:$0xff] %v4939_v10  ;;  %v4943_v39 = vsel %vm1501_vm9, 1.0, %v6851_v6  ;;  %6891 = vst [vmem:[#allocation29_spill] sm:$0xff] %v4946_v27  ;;  %v4953_v55 = vsel %vm1502_vm10, 1.0, %v6851_v6  ;;  %v1686_v44 = vsub.f32 %v3527_v23, %v3535_v7 }
 0x1dd   : > { %v1313_v17 = vpop.f32.mrb[7].mxu1  ;;  %v3737_v48 = vpop.f32.mrb[13].mxu0  ;;  %v1693_v57 = vsub.f32 %v3534_v2, %v3542_v13  ;;  %v1694_v16 = vsub.f32 %v3535_v7, %v3543_v22  ;;  %v4956_v19 = vsub.f32 %v3542_v13, %v4943_v39  ;;  %v4959_v58 = vsub.f32 %v3543_v22, %v4953_v55 }
 0x1de   : > { %v4948_v49 = vadd.f32 %v3735_v63, %v1313_v17  ;;  %v3738_v0 = vadd.f32 %v3737_v48, %v3736_v21  ;;  %v4950_v46 = vpop.f32.mrb[14].mxu0  ;;  %v3614_v5 = vadd.f32 1.8, %v4907_v31  ;;  %v3615_v35 = vadd.f32 1.8, %v4911_v3 }
 0x1df   : > { %v4961_v50 = vpop.f32.mrb[15].mxu0  ;;  %v6648_v25 = vsub.f32 -1.0, %v4907_v31  ;;  %v6647_v29 = vsub.f32 -1.0, %v4911_v3  ;;  %v4970_v8 = vadd.f32 1.4, %v4907_v31  ;;  %v4976_v62 = vadd.f32 1.0, %v4907_v31 }
 0x1e0   : > { %v4963_v11 = vadd.f32 %v3820_v59, %v3738_v0  ;;  %v4973_v52 = vadd.f32 1.4, %v4911_v3  ;;  %v1821_v51 = vmul.f32 2.5, %v3614_v5  ;;  %v1822_v28 = vmul.f32 2.5, %v3615_v35 }
 0x1e1   : > { %6892 = vst [vmem:[#allocation30_spill] sm:$0xff] %v4970_v8  ;;  %v1845_v32 = vmul.f32 2.5, %v6648_v25  ;;  %v4981_v33 = vsub.f32 -0.6, %v4907_v31  ;;  %v1846_v40 = vmul.f32 2.5, %v6647_v29  ;;  %v1877_v60 = vmul.f32 2.5, %v4970_v8 }
 0x1e2   : > { %6893 = vst [vmem:[#allocation31_spill] sm:$0xff] %v4973_v52  ;;  %v1878_v42 = vmul.f32 2.5, %v4973_v52  ;;  %v4988_v18 = vsub.f32 -0.6, %v4911_v3  ;;  %v1829_v15 = vmul.f32 %v1821_v51, %v4939_v10  ;;  %v1830_v45 = vmul.f32 %v1822_v28, %v4946_v27 }
 0x1e3   : > { %6894 = vst [vmem:[#allocation10_spill] sm:$0xff] %v4981_v33  ;;  %v1853_v30 = vmul.f32 %v1845_v32, %v1685_v41  ;;  %v1901_v9 = vmul.f32 2.5, %v4981_v33  ;;  %v1854_v4 = vmul.f32 %v1846_v40, %v1686_v44  ;;  %v1885_v24 = vmul.f32 %v1877_v60, %v1685_v41 }
 0x1e4   : > { %6895 = vst [vmem:[#allocation11_spill] sm:$0xff] %v4988_v18  ;;  %v1886_v54 = vmul.f32 %v1878_v42, %v1686_v44  ;;  %v1902_v34 = vmul.f32 2.5, %v4988_v18  ;;  %v4997_v26 = vadd.f32 1.0, %v4911_v3  ;;  %v1933_v12 = vmul.f32 2.5, %v4976_v62 }
 0x1e5   : > { %v4994_v38 = vadd.f32 %v1853_v30, %v1829_v15  ;;  %v1909_v37 = vmul.f32 %v1901_v9, %v1693_v57  ;;  %v5000_v53 = vadd.f32 %v1854_v4, %v1830_v45  ;;  %v1949_v56 = vsub.f32 -0.2, %v4907_v31 }
 0x1e6   : > { %v1910_v63 = vmul.f32 %v1902_v34, %v1694_v16  ;;  %v1950_v59 = vsub.f32 -0.2, %v4911_v3  ;;  %v1934_v2 = vmul.f32 2.5, %v4997_v26  ;;  %v1941_v14 = vmul.f32 %v1933_v12, %v1693_v57 }
 0x1e7   : > { %6896 = vst [vmem:[#allocation14_spill] sm:$0xff] %v4994_v38  ;;  %6897 = vst [vmem:[#allocation15_spill] sm:$0xff] %v5000_v53  ;;  %v1917_v23 = vadd.f32 %v1909_v37, %v1885_v24  ;;  %v2357_v7 = vmul.f32 1.25, %v3614_v5  ;;  %v1957_v21 = vmul.f32 2.5, %v1949_v56  ;;  %v2358_v17 = vmul.f32 1.25, %v3615_v35 }
 0x1e8   : > { %v1918_v13 = vadd.f32 %v1910_v63, %v1886_v54  ;;  %v1958_v22 = vmul.f32 2.5, %v1950_v59  ;;  %v1942_v48 = vmul.f32 %v1934_v2, %v1694_v16  ;;  %v2373_v0 = vmul.f32 1.25, %v4981_v33 }
 0x1e9   : > { %v2365_v41 = vmul.f32 %v2357_v7, %v4994_v38  ;;  %v2374_v44 = vmul.f32 1.25, %v4988_v18  ;;  %v1965_v51 = vmul.f32 %v1957_v21, %v4956_v19  ;;  %v2366_v32 = vmul.f32 %v2358_v17, %v5000_v53 }
 0x1ea   : > { %v1966_v28 = vmul.f32 %v1958_v22, %v4959_v58  ;;  %v2397_v57 = vmul.f32 1.25, %v4970_v8  ;;  %v2381_v40 = vmul.f32 %v2373_v0, %v1917_v23  ;;  %v2398_v42 = vmul.f32 1.25, %v4973_v52 }
 0x1eb   : > { %v2382_v60 = vmul.f32 %v2374_v44, %v1918_v13  ;;  %v2413_v15 = vmul.f32 1.25, %v1949_v56  ;;  %v5013_v16 = vadd.f32 %v1965_v51, %v1941_v14  ;;  %v2414_v9 = vmul.f32 1.25, %v1950_v59 }
 0x1ec   : > { %v5015_v45 = vadd.f32 %v1966_v28, %v1942_v48  ;;  %v2405_v30 = vmul.f32 %v2397_v57, %v1917_v23  ;;  %v5017_v4 = vadd.f32 %v2381_v40, %v2365_v41  ;;  %v2406_v54 = vmul.f32 %v2398_v42, %v1918_v13 }
 0x1ed   : > { %v5019_v24 = vadd.f32 %v2382_v60, %v2366_v32  ;;  %v2717_v34 = vmul.f32 0.8333333, %v3614_v5  ;;  %v2421_v37 = vmul.f32 %v2413_v15, %v5013_v16  ;;  %v2718_v63 = vmul.f32 0.8333333, %v3615_v35 }
 0x1ee   : > { %6898 = vst [vmem:[#allocation25_spill] sm:$0xff] %v5017_v4  ;;  %v2422_v12 = vmul.f32 %v2414_v9, %v5015_v45  ;;  %v2733_v2 = vmul.f32 0.8333333, %v1949_v56  ;;  %v2734_v14 = vmul.f32 0.8333333, %v1950_v59  ;;  %vm1573_vm15 = vcmp.ge.f32.partialorder %v4907_v31, 1.0 }
 0x1ef   : > { %6899 = vst [vmem:[#allocation26_spill] sm:$0xff] %v5019_v24  ;;  %v2725_v7 = vmul.f32 %v2717_v34, %v5017_v4  ;;  %vm1525_vm11 = vcmp.ge.f32.partialorder %v4907_v31, 0.2  ;;  %vm1526_vm12 = vcmp.ge.f32.partialorder %v4911_v3, 0.2  ;;  %v5026_v23 = vadd.f32 %v2421_v37, %v2405_v30 }
 0x1f0   : > { %v5028_v21 = vadd.f32 %v2422_v12, %v2406_v54  ;;  %v2726_v13 = vmul.f32 %v2718_v63, %v5019_v24  ;;  %v3558_v5 = vsel %vm1525_vm11, 1.0, %v6851_v6  ;;  %v3559_v22 = vsel %vm1526_vm12, 1.0, %v6851_v6 }
 0x1f1   : > { %6900 = vst [vmem:[#allocation32_spill] sm:$0xff] %v5026_v23  ;;  %vm1549_vm13 = vcmp.ge.f32.partialorder %v4907_v31, 0.6  ;;  %vm1550_vm14 = vcmp.ge.f32.partialorder %v4911_v3, 0.6  ;;  %v2741_v35 = vmul.f32 %v2733_v2, %v5026_v23  ;;  %vm1574_vm0 = vcmp.ge.f32.partialorder %v4911_v3, 1.0 }
 0x1f2   : > { %6901 = vst [vmem:[#allocation34_spill] sm:$0xff] %v5028_v21  ;;  %v2742_v56 = vmul.f32 %v2734_v14, %v5028_v21  ;;  %v3566_v59 = vsel %vm1549_vm13, 1.0, %v6851_v6  ;;  %v3567_v17 = vsel %vm1550_vm14, 1.0, %v6851_v6  ;;  %v3574_v48 = vsel %vm1573_vm15, 1.0, %v6851_v6 }
 0x1f3   : > { %vm1597_vm1 = vcmp.ge.f32.partialorder %v4907_v31, 1.4  ;;  %vm1598_vm2 = vcmp.ge.f32.partialorder %v4911_v3, 1.4  ;;  %v2749_v41 = vadd.f32 %v2741_v35, %v2725_v7  ;;  %v3575_v44 = vsel %vm1574_vm0, 1.0, %v6851_v6 }
 0x1f4   : > { %v2750_v0 = vadd.f32 %v2742_v56, %v2726_v13  ;;  %v5046_v51 = vsel %vm1597_vm1, 1.0, %v6851_v6  ;;  %v5049_v28 = vsel %vm1598_vm2, 1.0, %v6851_v6  ;;  %v5052_v32 = vsub.f32 %v4943_v39, %v3558_v5 }
 0x1f5   : > { %v5055_v57 = vsub.f32 %v4953_v55, %v3559_v22  ;;  %v1717_v40 = vsub.f32 %v3558_v5, %v3566_v59  ;;  %v1718_v42 = vsub.f32 %v3559_v22, %v3567_v17  ;;  %v1725_v15 = vsub.f32 %v3566_v59, %v3574_v48 }
 0x1f6   : > { %v3005_v60 = vpack.c.bf16 %v2750_v0, %v2749_v41  ;;  %v1726_v30 = vsub.f32 %v3567_v17, %v3575_v44  ;;  %v5058_v9 = vsub.f32 %v3574_v48, %v5046_v51  ;;  %v5061_v54 = vsub.f32 %v3575_v44, %v5049_v28 }
 0x1f7   : > { %v3646_v34 = vadd.f32 0.2, %v4907_v31  ;;  %v3647_v37 = vadd.f32 0.2, %v4911_v3  ;;  %v5066_v39 = vsub.f32 0.6, %v4907_v31  ;;  %v3741_v63 = vadd.f32 %v4961_v50, %v4950_v46 }
 0x1f8   : > { %3748 = vmatprep.subr.bf16.mxu1 %v3005_v60  ;;  %v5069_v55 = vsub.f32 0.6, %v4911_v3  ;;  %v5072_v12 = vadd.f32 -0.2, %v4907_v31  ;;  %v5077_v14 = vadd.f32 -0.2, %v4911_v3 }
 0x1f9   : > { %v2045_v2 = vmul.f32 2.5, %v3646_v34  ;;  %v2046_v7 = vmul.f32 2.5, %v3647_v37  ;;  %v5080_v13 = vsub.f32 1.0, %v4907_v31  ;;  %v2069_v5 = vmul.f32 2.5, %v5066_v39 }
 0x1fa   : > { %6902 = vst [vmem:[#allocation35_spill] sm:$0xff] %v5077_v14  ;;  %v2070_v22 = vmul.f32 2.5, %v5069_v55  ;;  %v2101_v35 = vmul.f32 2.5, %v5072_v12  ;;  %v5086_v56 = vsub.f32 1.0, %v4911_v3  ;;  %v2102_v50 = vmul.f32 2.5, %v5077_v14 }
 0x1fb   : > { %6903 = vst [vmem:[#allocation33_spill] sm:$0xff] %v5080_v13  ;;  %v2053_v59 = vmul.f32 %v2045_v2, %v5052_v32  ;;  %v2054_v46 = vmul.f32 %v2046_v7, %v5055_v57  ;;  %v2125_v17 = vmul.f32 2.5, %v5080_v13  ;;  %v2077_v48 = vmul.f32 %v2069_v5, %v1717_v40 }
 0x1fc   : > { %6904 = vst [vmem:[#allocation19_spill] sm:$0xff] %v5086_v56  ;;  %v2078_v41 = vmul.f32 %v2070_v22, %v1718_v42  ;;  %v2109_v0 = vmul.f32 %v2101_v35, %v1717_v40  ;;  %v2126_v44 = vmul.f32 2.5, %v5086_v56  ;;  %v2110_v60 = vmul.f32 %v2102_v50, %v1718_v42 }
 0x1fd   : > { %v2133_v29 = vmul.f32 %v2125_v17, %v1725_v15  ;;  %v5094_v25 = vadd.f32 -0.6, %v4907_v31  ;;  %v5097_v24 = vadd.f32 -0.6, %v4911_v3  ;;  %v5099_v2 = vadd.f32 %v2077_v48, %v2053_v59 }
 0x1fe   : > { %v5101_v7 = vadd.f32 %v2078_v41, %v2054_v46  ;;  %v2134_v4 = vmul.f32 %v2126_v44, %v1726_v30  ;;  %v2173_v18 = vsub.f32 1.4, %v4907_v31  ;;  %v2174_v42 = vsub.f32 1.4, %v4911_v3 }
 0x1ff   : > { %6905 = vst [vmem:[#allocation20_spill] sm:$0xff] %v5094_v25  ;;  %6906 = vst [vmem:[#allocation23_spill] sm:$0xff] %v5097_v24  ;;  %v2141_v5 = vadd.f32 %v2133_v29, %v2109_v0  ;;  %v2157_v40 = vmul.f32 2.5, %v5094_v25  ;;  %v2158_v22 = vmul.f32 2.5, %v5097_v24  ;;  %v2517_v17 = vmul.f32 1.25, %v3646_v34 }
 0x200   : > { %v2142_v35 = vadd.f32 %v2134_v4, %v2110_v60  ;;  %v2181_v50 = vmul.f32 2.5, %v2173_v18  ;;  %v2518_v33 = vmul.f32 1.25, %v3647_v37  ;;  %v2182_v59 = vmul.f32 2.5, %v2174_v42 }
 0x201   : > { %v2165_v53 = vmul.f32 %v2157_v40, %v1725_v15  ;;  %v2166_v38 = vmul.f32 %v2158_v22, %v1726_v30  ;;  %v2533_v46 = vmul.f32 1.25, %v5080_v13  ;;  %v2525_v41 = vmul.f32 %v2517_v17, %v5099_v2 }
 0x202   : > { %v2189_v48 = vmul.f32 %v2181_v50, %v5058_v9  ;;  %v2526_v29 = vmul.f32 %v2518_v33, %v5101_v7  ;;  %v2534_v0 = vmul.f32 1.25, %v5086_v56  ;;  %v2190_v44 = vmul.f32 %v2182_v59, %v5061_v54 }
 0x203   : > { %v2541_v27 = vmul.f32 %v2533_v46, %v2141_v5  ;;  %v2557_v4 = vmul.f32 1.25, %v5072_v12  ;;  %v2558_v60 = vmul.f32 1.25, %v5077_v14  ;;  %v2573_v40 = vmul.f32 1.25, %v2173_v18 }
 0x204   : > { %v5115_v15 = vadd.f32 %v2189_v48, %v2165_v53  ;;  %v2542_v30 = vmul.f32 %v2534_v0, %v2142_v35  ;;  %v2574_v22 = vmul.f32 1.25, %v2174_v42  ;;  %v5117_v10 = vadd.f32 %v2190_v44, %v2166_v38 }
 0x205   : > { %v5119_v50 = vadd.f32 %v2541_v27, %v2525_v41  ;;  %v2565_v17 = vmul.f32 %v2557_v4, %v2141_v5  ;;  %v2566_v33 = vmul.f32 %v2558_v60, %v2142_v35  ;;  %vm1479_vm3 = vcmp.ge.f32.partialorder %v4905_v43, -0.6 }
 0x206   : > { %v5122_v21 = vadd.f32 %v2542_v30, %v2526_v29  ;;  %v2581_v59 = vmul.f32 %v2573_v40, %v5115_v15  ;;  %v2877_v46 = vmul.f32 0.8333333, %v3646_v34  ;;  %v2878_v23 = vmul.f32 0.8333333, %v3647_v37 }
 0x207   : > { %6907 = vst [vmem:[#allocation24_spill] sm:$0xff] %v5119_v50  ;;  %v2582_v53 = vmul.f32 %v2574_v22, %v5117_v10  ;;  %v2893_v48 = vmul.f32 0.8333333, %v2173_v18  ;;  %v2894_v0 = vmul.f32 0.8333333, %v2174_v42  ;;  %v5127_v52 = vadd.f32 %v4934_v61, %v3741_v63 }
 0x208   : > { %6908 = vst [vmem:[#allocation12_spill] sm:$0xff] %v5122_v21  ;;  %v5129_v38 = vadd.f32 %v2581_v59, %v2565_v17  ;;  %v2885_v27 = vmul.f32 %v2877_v46, %v5119_v50  ;;  %v2886_v5 = vmul.f32 %v2878_v23, %v5122_v21  ;;  %v5134_v35 = vadd.f32 0.6, %v4907_v31 }
 0x209   : > { %v5136_v41 = vadd.f32 %v2582_v53, %v2566_v33  ;;  %v5139_v34 = vadd.f32 0.6, %v4911_v3  ;;  %v5142_v18 = vsub.f32 0.2, %v4907_v31  ;;  %v5145_v61 = vsub.f32 0.2, %v4911_v3 }
 0x20a   : > { %6909 = vst [vmem:[#allocation13_spill] sm:$0xff] %v5129_v38  ;;  %6910 = vst [vmem:[#allocation16_spill] sm:$0xff] %v5134_v35  ;;  %vm1503_vm4 = vcmp.ge.f32.partialorder %v4905_v43, -0.2  ;;  %v2901_v37 = vmul.f32 %v2893_v48, %v5129_v38  ;;  %v1989_v23 = vmul.f32 2.5, %v5134_v35  ;;  %v2437_v63 = vmul.f32 1.25, %v4976_v62 }
 0x20b   : > { %6911 = vst [vmem:[#allocation17_spill] sm:$0xff] %v5136_v41  ;;  %6912 = vst [vmem:[#allocation21_spill] sm:$0xff] %v5139_v34  ;;  %v2438_v42 = vmul.f32 1.25, %v4997_v26  ;;  %v2902_v29 = vmul.f32 %v2894_v0, %v5136_v41  ;;  %v1990_v44 = vmul.f32 2.5, %v5139_v34  ;;  %v2013_v4 = vmul.f32 2.5, %v5142_v18 }
 0x20c   : > { %6913 = vst [vmem:[#allocation22_spill] sm:$0xff] %v5142_v18  ;;  %6914 = vst [vmem:[#allocation27_spill] sm:$0xff] %v5145_v61  ;;  %v2014_v60 = vmul.f32 2.5, %v5145_v61  ;;  %v2909_v30 = vadd.f32 %v2901_v37, %v2885_v27  ;;  %v1997_v40 = vmul.f32 %v1989_v23, %v4956_v19  ;;  %v2445_v22 = vmul.f32 %v2437_v63, %v5013_v16 }
 0x20d   : > { %v2446_v17 = vmul.f32 %v2438_v42, %v5015_v45  ;;  %v2910_v33 = vadd.f32 %v2902_v29, %v2886_v5  ;;  %v1998_v59 = vmul.f32 %v1990_v44, %v4959_v58  ;;  %v2021_v46 = vmul.f32 %v2013_v4, %v5052_v32 }
 0x20e   : > { %v2022_v53 = vmul.f32 %v2014_v60, %v5055_v57  ;;  %v2453_v48 = vmul.f32 1.25, %v5142_v18  ;;  %v2454_v0 = vmul.f32 1.25, %v5145_v61  ;;  %v2477_v8 = vmul.f32 1.25, %v5134_v35 }
 0x20f   : > { %v2478_v27 = vmul.f32 1.25, %v5139_v34  ;;  %v3037_v19 = vpack.c.bf16 %v2910_v33, %v2909_v30  ;;  %v2029_v37 = vadd.f32 %v2021_v46, %v1997_v40  ;;  %v2493_v45 = vmul.f32 1.25, %v5066_v39 }
 0x210   : > { %v2030_v16 = vadd.f32 %v2022_v53, %v1998_v59  ;;  %v2494_v5 = vmul.f32 1.25, %v5069_v55  ;;  %v2797_v58 = vmul.f32 0.8333333, %v4976_v62  ;;  %v2798_v32 = vmul.f32 0.8333333, %v4997_v26 }
 0x211   : > { %v5173_v57 = vsel %vm1479_vm3, 1.0, %v6851_v6  ;;  %3776 = vmatprep.subr.bf16.mxu0 %v3037_v19  ;;  %v2461_v23 = vmul.f32 %v2453_v48, %v2029_v37  ;;  %v2485_v42 = vmul.f32 %v2477_v8, %v2029_v37  ;;  %v2501_v44 = vmul.f32 %v2493_v45, %v5099_v2 }
 0x212   : > { %v2462_v63 = vmul.f32 %v2454_v0, %v2030_v16  ;;  %v2486_v29 = vmul.f32 %v2478_v27, %v2030_v16  ;;  %v2502_v4 = vmul.f32 %v2494_v5, %v5101_v7  ;;  %v2813_v60 = vmul.f32 0.8333333, %v5066_v39 }
 0x213   : > { %v2814_v62 = vmul.f32 0.8333333, %v5069_v55  ;;  %v5179_v30 = vadd.f32 %v2461_v23, %v2445_v22  ;;  %vm1480_vm5 = vcmp.ge.f32.partialorder %v4909_v1, -0.6  ;;  %vm1504_vm6 = vcmp.ge.f32.partialorder %v4909_v1, -0.2 }
 0x214   : > { %v5181_v26 = vadd.f32 %v2462_v63, %v2446_v17  ;;  %v5185_v40 = vadd.f32 %v2501_v44, %v2485_v42  ;;  %v5187_v8 = vadd.f32 %v2502_v4, %v2486_v29  ;;  %v5190_v2 = vsel %vm1480_vm5, 1.0, %v6851_v6 }
 0x215   : > { %6915 = vst [vmem:[#allocation28_spill] sm:$0xff] %v5179_v30  ;;  %v3552_v39 = vsel %vm1503_vm4, 1.0, %v6851_v6  ;;  %v2805_v55 = vmul.f32 %v2797_v58, %v5179_v30  ;;  %v3553_v22 = vsel %vm1504_vm6, 1.0, %v6851_v6  ;;  %vm1527_vm7 = vcmp.ge.f32.partialorder %v4905_v43, 0.2 }
 0x216   : > { %6916 = vst [vmem:[#allocation36_spill] sm:$0xff] %v5181_v26  ;;  %6917 = vst [vmem:[#allocation37_spill] sm:$0xff] %v5185_v40  ;;  %v2806_v7 = vmul.f32 %v2798_v32, %v5181_v26  ;;  %v2821_v17 = vmul.f32 %v2813_v60, %v5185_v40  ;;  %v2822_v33 = vmul.f32 %v2814_v62, %v5187_v8  ;;  %vm1528_vm8 = vcmp.ge.f32.partialorder %v4909_v1, 0.2 }
 0x217   : > { %6918 = vst [vmem:[#allocation38_spill] sm:$0xff] %v5187_v8  ;;  %v3560_v59 = vsel %vm1527_vm7, 1.0, %v6851_v6  ;;  %v3561_v46 = vsel %vm1528_vm8, 1.0, %v6851_v6  ;;  %vm1551_vm9 = vcmp.ge.f32.partialorder %v4905_v43, 0.6  ;;  %vm1575_vm11 = vcmp.ge.f32.partialorder %v4905_v43, 1.0 }
 0x218   : > { %vm1552_vm10 = vcmp.ge.f32.partialorder %v4909_v1, 0.6  ;;  %v2829_v53 = vadd.f32 %v2821_v17, %v2805_v55  ;;  %v2830_v48 = vadd.f32 %v2822_v33, %v2806_v7  ;;  %v3568_v0 = vsel %vm1551_vm9, 1.0, %v6851_v6 }
 0x219   : > { %v3569_v27 = vsel %vm1552_vm10, 1.0, %v6851_v6  ;;  %vm1576_vm12 = vcmp.ge.f32.partialorder %v4909_v1, 1.0  ;;  %v3576_v19 = vsel %vm1575_vm11, 1.0, %v6851_v6  ;;  %vm1599_vm13 = vcmp.ge.f32.partialorder %v4905_v43, 1.4 }
 0x21a   : > { %vm1600_vm14 = vcmp.ge.f32.partialorder %v4909_v1, 1.4  ;;  %v3021_v37 = vpack.c.bf16 %v2830_v48, %v2829_v53  ;;  %v3577_v16 = vsel %vm1576_vm12, 1.0, %v6851_v6  ;;  %v5215_v45 = vsel %vm1599_vm13, 1.0, %v6851_v6 }
 0x21b   : > { %6919 = vst [vmem:[#allocation39_spill] sm:$0xff] %v5215_v45  ;;  %v5218_v5 = vsel %vm1600_vm14, 1.0, %v6851_v6  ;;  %v5221_v58 = vsub.f32 %v5173_v57, %v3552_v39  ;;  %v5224_v32 = vsub.f32 %v5190_v2, %v3553_v22  ;;  %v5226_v23 = vsub.f32 %v3552_v39, %v3560_v59 }
 0x21c   : > { %6920 = vst [vmem:[#allocation40_spill] sm:$0xff] %v5218_v5  ;;  %3777 = vmatpush3.bf16.msra.mxu0 %v3021_v37  ;;  %v5228_v63 = vsub.f32 %v3553_v22, %v3561_v46  ;;  %v1719_v42 = vsub.f32 %v3560_v59, %v3568_v0  ;;  %v1720_v29 = vsub.f32 %v3561_v46, %v3569_v27  ;;  %v3648_v62 = vadd.f32 0.2, %v4905_v43 }
 0x21d   : > { %v1727_v44 = vsub.f32 %v3568_v0, %v3576_v19  ;;  %v1728_v4 = vsub.f32 %v3569_v27, %v3577_v16  ;;  %v5231_v60 = vsub.f32 %v3576_v19, %v5215_v45  ;;  %v3649_v55 = vadd.f32 0.2, %v4909_v1 }
 0x21e   : > { %v5236_v7 = vsub.f32 %v3577_v16, %v5218_v5  ;;  %v5239_v39 = vsub.f32 0.6, %v4905_v43  ;;  %v5242_v22 = vsub.f32 0.6, %v4909_v1  ;;  %v5245_v17 = vadd.f32 -0.2, %v4905_v43 }
 0x21f   : > { %6921 = vst [vmem:[#allocation41_spill] sm:$0xff] %v5231_v60  ;;  %v2047_v33 = vmul.f32 2.5, %v3648_v62  ;;  %v2048_v59 = vmul.f32 2.5, %v3649_v55  ;;  %v5248_v46 = vadd.f32 -0.2, %v4909_v1  ;;  %v5251_v53 = vsub.f32 1.0, %v4905_v43 }
 0x220   : > { %6922 = vst [vmem:[#allocation42_spill] sm:$0xff] %v5236_v7  ;;  %6923 = vst [vmem:[#allocation43_spill] sm:$0xff] %v5245_v17  ;;  %v2071_v48 = vmul.f32 2.5, %v5239_v39  ;;  %v2072_v0 = vmul.f32 2.5, %v5242_v22  ;;  %v2103_v27 = vmul.f32 2.5, %v5245_v17  ;;  %v5257_v19 = vsub.f32 1.0, %v4909_v1 }
 0x221   : > { %6924 = vst [vmem:[#allocation44_spill] sm:$0xff] %v5248_v46  ;;  %6925 = vst [vmem:[#allocation45_spill] sm:$0xff] %v5251_v53  ;;  %v2055_v37 = vmul.f32 %v2047_v33, %v5226_v23  ;;  %v2056_v16 = vmul.f32 %v2048_v59, %v5228_v63  ;;  %v2104_v26 = vmul.f32 2.5, %v5248_v46  ;;  %v2127_v30 = vmul.f32 2.5, %v5251_v53 }
 0x222   : > { %6926 = vst [vmem:[#allocation46_spill] sm:$0xff] %v5257_v19  ;;  %v2079_v61 = vmul.f32 %v2071_v48, %v1719_v42  ;;  %v2080_v18 = vmul.f32 %v2072_v0, %v1720_v29  ;;  %v2111_v5 = vmul.f32 %v2103_v27, %v1719_v42  ;;  %v2128_v45 = vmul.f32 2.5, %v5257_v19 }
 0x223   : > { %v2112_v21 = vmul.f32 %v2104_v26, %v1720_v29  ;;  %v2135_v50 = vmul.f32 %v2127_v30, %v1727_v44  ;;  %v5265_v56 = vadd.f32 -0.6, %v4905_v43  ;;  %v5268_v8 = vadd.f32 -0.6, %v4909_v1 }
 0x224   : > { %v5270_v33 = vadd.f32 %v2079_v61, %v2055_v37  ;;  %v5272_v59 = vadd.f32 %v2080_v18, %v2056_v16  ;;  %v2136_v40 = vmul.f32 %v2128_v45, %v1728_v4  ;;  %v2175_v13 = vsub.f32 1.4, %v4905_v43 }
 0x225   : > { %6927 = vst [vmem:[#allocation47_spill] sm:$0xff] %v5265_v56  ;;  %6928 = vst [vmem:[#allocation48_spill] sm:$0xff] %v5268_v8  ;;  %v2143_v48 = vadd.f32 %v2135_v50, %v2111_v5  ;;  %v2159_v42 = vmul.f32 2.5, %v5265_v56  ;;  %v2160_v0 = vmul.f32 2.5, %v5268_v8  ;;  %v2176_v30 = vsub.f32 1.4, %v4909_v1 }
 0x226   : > { %v2144_v26 = vadd.f32 %v2136_v40, %v2112_v21  ;;  %v2183_v29 = vmul.f32 2.5, %v2175_v13  ;;  %v2519_v27 = vmul.f32 1.25, %v3648_v62  ;;  %v2520_v41 = vmul.f32 1.25, %v3649_v55 }
 0x227   : > { %v2167_v38 = vmul.f32 %v2159_v42, %v1727_v44  ;;  %v2168_v34 = vmul.f32 %v2160_v0, %v1728_v4  ;;  %v2184_v61 = vmul.f32 2.5, %v2176_v30  ;;  %v2535_v18 = vmul.f32 1.25, %v5251_v53 }
 0x228   : > { %v2191_v45 = vmul.f32 %v2183_v29, %v5231_v60  ;;  %v2527_v37 = vmul.f32 %v2519_v27, %v5270_v33  ;;  %v2528_v50 = vmul.f32 %v2520_v41, %v5272_v59  ;;  %v2536_v5 = vmul.f32 1.25, %v5257_v19 }
 0x229   : > { %v2192_v16 = vmul.f32 %v2184_v61, %v5236_v7  ;;  %v2543_v8 = vmul.f32 %v2535_v18, %v2143_v48  ;;  %v2559_v21 = vmul.f32 1.25, %v5245_v17  ;;  %v2560_v40 = vmul.f32 1.25, %v5248_v46 }
 0x22a   : > { %v5286_v44 = vadd.f32 %v2191_v45, %v2167_v38  ;;  %v2544_v4 = vmul.f32 %v2536_v5, %v2144_v26  ;;  %v2575_v42 = vmul.f32 1.25, %v2175_v13  ;;  %v2576_v0 = vmul.f32 1.25, %v2176_v30 }
 0x22b   : > { %v5288_v53 = vadd.f32 %v2192_v16, %v2168_v34  ;;  %v5290_v29 = vadd.f32 %v2543_v8, %v2527_v37  ;;  %v2567_v27 = vmul.f32 %v2559_v21, %v2143_v48  ;;  %v2568_v41 = vmul.f32 %v2560_v40, %v2144_v26 }
 0x22c   : > { %6929 = vst [vmem:[#allocation49_spill] sm:$0xff] %v5286_v44  ;;  %v5292_v60 = vadd.f32 %v2544_v4, %v2528_v50  ;;  %v2583_v61 = vmul.f32 %v2575_v42, %v5286_v44  ;;  %v2879_v18 = vmul.f32 0.8333333, %v3648_v62  ;;  %v2880_v19 = vmul.f32 0.8333333, %v3649_v55 }
 0x22d   : > { %6930 = vst [vmem:[#allocation50_spill] sm:$0xff] %v5288_v53  ;;  %6931 = vst [vmem:[#allocation51_spill] sm:$0xff] %v5290_v29  ;;  %v2584_v7 = vmul.f32 %v2576_v0, %v5288_v53  ;;  %v2895_v46 = vmul.f32 0.8333333, %v2175_v13  ;;  %v2896_v38 = vmul.f32 0.8333333, %v2176_v30 }
 0x22e   : > { %6932 = vst [vmem:[#allocation52_spill] sm:$0xff] %v5292_v60  ;;  %vm1455_vm15 = vcmp.ge.f32.partialorder %v4905_v43, -1.0  ;;  %v5297_v45 = vadd.f32 %v2583_v61, %v2567_v27  ;;  %v2887_v34 = vmul.f32 %v2879_v18, %v5290_v29  ;;  %v2888_v8 = vmul.f32 %v2880_v19, %v5292_v60 }
 0x22f   : > { %vm1456_vm0 = vcmp.ge.f32.partialorder %v4909_v1, -1.0  ;;  %v5302_v48 = vadd.f32 %v2584_v7, %v2568_v41  ;;  %v5305_v26 = vsel %vm1455_vm15, 1.0, %v6851_v6  ;;  %v3632_v13 = vadd.f32 1.0, %v4905_v43 }
 0x230   : > { %6933 = vst [vmem:[#allocation53_spill] sm:$0xff] %v5297_v45  ;;  %v5308_v62 = vsel %vm1456_vm0, 1.0, %v6851_v6  ;;  %v2903_v55 = vmul.f32 %v2895_v46, %v5297_v45  ;;  %v5314_v30 = vsub.f32 %v5305_v26, %v5173_v57  ;;  %v3633_v7 = vadd.f32 1.0, %v4909_v1 }
 0x231   : > { %6934 = vst [vmem:[#allocation54_spill] sm:$0xff] %v5302_v48  ;;  %v5318_v19 = vsub.f32 %v5308_v62, %v5190_v2  ;;  %v2904_v37 = vmul.f32 %v2896_v38, %v5302_v48  ;;  %v1935_v50 = vmul.f32 2.5, %v3632_v13  ;;  %v5323_v5 = vsub.f32 -0.2, %v4905_v43 }
 0x232   : > { %v5326_v16 = vsub.f32 -0.2, %v4909_v1  ;;  %v2911_v46 = vadd.f32 %v2903_v55, %v2887_v34  ;;  %v1936_v21 = vmul.f32 2.5, %v3633_v7  ;;  %v5329_v57 = vadd.f32 0.6, %v4905_v43 }
 0x233   : > { %v5332_v40 = vadd.f32 0.6, %v4909_v1  ;;  %v2912_v2 = vadd.f32 %v2904_v37, %v2888_v8  ;;  %v1943_v4 = vmul.f32 %v1935_v50, %v5314_v30  ;;  %v1959_v42 = vmul.f32 2.5, %v5323_v5 }
 0x234   : > { %6935 = vst [vmem:[#allocation55_spill] sm:$0xff] %v5329_v57  ;;  %v1960_v0 = vmul.f32 2.5, %v5326_v16  ;;  %v1944_v27 = vmul.f32 %v1936_v21, %v5318_v19  ;;  %v1991_v41 = vmul.f32 2.5, %v5329_v57  ;;  %v5341_v18 = vsub.f32 0.2, %v4905_v43 }
 0x235   : > { %6936 = vst [vmem:[#allocation56_spill] sm:$0xff] %v5332_v40  ;;  %v1992_v61 = vmul.f32 2.5, %v5332_v40  ;;  %v3038_v38 = vpack.c.bf16 %v2912_v2, %v2911_v46  ;;  %v1967_v34 = vmul.f32 %v1959_v42, %v5221_v58  ;;  %v5346_v55 = vsub.f32 0.2, %v4909_v1 }
 0x236   : > { %6937 = vst [vmem:[#allocation57_spill] sm:$0xff] %v5341_v18  ;;  %v1968_v8 = vmul.f32 %v1960_v0, %v5224_v32  ;;  %v1999_v37 = vmul.f32 %v1991_v41, %v5221_v58  ;;  %v2015_v21 = vmul.f32 2.5, %v5341_v18  ;;  %v2439_v2 = vmul.f32 1.25, %v3632_v13 }
 0x237   : > { %6938 = vst [vmem:[#allocation58_spill] sm:$0xff] %v5346_v55  ;;  %v2000_v50 = vmul.f32 %v1992_v61, %v5224_v32  ;;  %3778 = vmatprep.subr.bf16.mxu0 %v3038_v38  ;;  %v5351_v60 = vadd.f32 %v1967_v34, %v1943_v4  ;;  %v2016_v46 = vmul.f32 2.5, %v5346_v55  ;;  %v2440_v0 = vmul.f32 1.25, %v3633_v7 }
 0x238   : > { %v5353_v29 = vadd.f32 %v1968_v8, %v1944_v27  ;;  %v2023_v42 = vmul.f32 %v2015_v21, %v5226_v23  ;;  %v2455_v48 = vmul.f32 1.25, %v5341_v18  ;;  %v2456_v32 = vmul.f32 1.25, %v5346_v55 }
 0x239   : > { %v2024_v45 = vmul.f32 %v2016_v46, %v5228_v63  ;;  %v2447_v58 = vmul.f32 %v2439_v2, %v5351_v60  ;;  %v2479_v41 = vmul.f32 1.25, %v5329_v57  ;;  %v2495_v61 = vmul.f32 1.25, %v5239_v39 }
 0x23a   : > { %v2031_v4 = vadd.f32 %v2023_v42, %v1999_v37  ;;  %v2448_v27 = vmul.f32 %v2440_v0, %v5353_v29  ;;  %v2496_v38 = vmul.f32 1.25, %v5242_v22  ;;  %v2480_v23 = vmul.f32 1.25, %v5332_v40 }
 0x23b   : > { %v2032_v34 = vadd.f32 %v2024_v45, %v2000_v50  ;;  %v2799_v8 = vmul.f32 0.8333333, %v3632_v13  ;;  %v2800_v21 = vmul.f32 0.8333333, %v3633_v7  ;;  %v2503_v46 = vmul.f32 %v2495_v61, %v5270_v33 }
 0x23c   : > { %v2463_v18 = vmul.f32 %v2455_v48, %v2031_v4  ;;  %v2487_v63 = vmul.f32 %v2479_v41, %v2031_v4  ;;  %v2504_v2 = vmul.f32 %v2496_v38, %v5272_v59  ;;  %v1325_v37 = vsub.f32 0.0, %v4907_v31 }
 0x23d   : > { %v2464_v55 = vmul.f32 %v2456_v32, %v2032_v34  ;;  %v2488_v57 = vmul.f32 %v2480_v23, %v2032_v34  ;;  %v1326_v42 = vsub.f32 0.0, %v4911_v3  ;;  %v2815_v45 = vmul.f32 0.8333333, %v5239_v39 }
 0x23e   : > { %v5370_v0 = vadd.f32 %v2463_v18, %v2447_v58  ;;  %v5372_v17 = vadd.f32 %v2503_v46, %v2487_v63  ;;  %v2816_v13 = vmul.f32 0.8333333, %v5242_v22  ;;  %v1333_v33 = vmul.f32 1.442695, %v1325_v37 }
 0x23f   : > { %v5376_v48 = vadd.f32 %v2464_v55, %v2448_v27  ;;  %v5378_v7 = vadd.f32 %v2504_v2, %v2488_v57  ;;  %v1335_v59 = vmul.f32 1.442695, %v1326_v42  ;;  %vm1381_vm1 = vcmp.ge.f32.partialorder %v4907_v31, -2.2 }
 0x240   : > { %6939 = vst [vmem:[#allocation59_spill] sm:$0xff] %v5370_v0  ;;  %6940 = vst [vmem:[#allocation60_spill] sm:$0xff] %v5372_v17  ;;  %vm1382_vm2 = vcmp.ge.f32.partialorder %v4911_v3, -2.2  ;;  %v2807_v50 = vmul.f32 %v2799_v8, %v5370_v0  ;;  %v2823_v18 = vmul.f32 %v2815_v45, %v5372_v17  ;;  %3923 = vpow2.f32 %v1333_v33 }
 0x241   : > { %6941 = vst [vmem:[#allocation61_spill] sm:$0xff] %v5376_v48  ;;  %6942 = vst [vmem:[#allocation62_spill] sm:$0xff] %v5378_v7  ;;  %v2808_v58 = vmul.f32 %v2800_v21, %v5376_v48  ;;  %v2824_v39 = vmul.f32 %v2816_v13, %v5378_v7  ;;  %vm1407_vm3 = vcmp.ge.f32.partialorder %v4905_v43, -1.8  ;;  %3925 = vpow2.f32 %v1335_v59 }
 0x242   : > { %v2831_v22 = vadd.f32 %v2823_v18, %v2807_v50  ;;  %vm1408_vm4 = vcmp.ge.f32.partialorder %v4909_v1, -1.8  ;;  %v5389_v57 = vsel %vm1407_vm3, 1.0, %v6851_v6  ;;  %vm1431_vm5 = vcmp.ge.f32.partialorder %v4905_v43, -1.4 }
 0x243   : > { %6943 = vst [vmem:[#allocation63_spill] sm:$0xff] %v5389_v57  ;;  %v2832_v55 = vadd.f32 %v2824_v39, %v2808_v58  ;;  %v5392_v32 = vsel %vm1408_vm4, 1.0, %v6851_v6  ;;  %vm1432_vm6 = vcmp.ge.f32.partialorder %v4909_v1, -1.4  ;;  %v5399_v41 = vsel %vm1381_vm1, 1.0, %v6851_v6 }
 0x244   : > { %6944 = vst [vmem:[#allocation64_spill] sm:$0xff] %v5392_v32  ;;  %6945 = vst [vmem:[#allocation65_spill] sm:$0xff] %v5399_v41  ;;  %v5404_v4 = vsel %vm1382_vm2, 1.0, %v6851_v6  ;;  %v3528_v27 = vsel %vm1431_vm5, 1.0, %v6851_v6  ;;  %v3529_v61 = vsel %vm1432_vm6, 1.0, %v6851_v6  ;;  %v6691_v2 = vsub.f32 -1.0, %v4905_v43 }
 0x245   : > { %6946 = vst [vmem:[#allocation66_spill] sm:$0xff] %v5404_v4  ;;  %v3022_v38 = vpack.c.bf16 %v2832_v55, %v2831_v22  ;;  %v5409_v34 = vsub.f32 %v5389_v57, %v3528_v27  ;;  %v5412_v23 = vsub.f32 %v5392_v32, %v3529_v61  ;;  %v1687_v8 = vsub.f32 %v3528_v27, %v5305_v26 }
 0x246   : > { %v1688_v21 = vsub.f32 %v3529_v61, %v5308_v62  ;;  %v3616_v63 = vadd.f32 1.8, %v4905_v43  ;;  %v3617_v46 = vadd.f32 1.8, %v4909_v1  ;;  %v6694_v37 = vsub.f32 -1.0, %v4909_v1 }
 0x247   : > { %6947 = vst [vmem:[#allocation67_spill] sm:$0xff] %v5409_v34  ;;  %6948 = vst [vmem:[#allocation68_spill] sm:$0xff] %v5412_v23  ;;  %3779 = vmatpush3.bf16.msra.mxu0 %v3022_v38  ;;  %v5421_v42 = vadd.f32 1.4, %v4905_v43  ;;  %v5424_v45 = vadd.f32 1.4, %v4909_v1 }
 0x248   : > { %v2415_v13 = vmul.f32 1.25, %v5323_v5  ;;  %v1823_v26 = vmul.f32 2.5, %v3616_v63  ;;  %v1824_v33 = vmul.f32 2.5, %v3617_v46  ;;  %v1847_v62 = vmul.f32 2.5, %v6691_v2 }
 0x249   : > { %6949 = vst [vmem:[#allocation69_spill] sm:$0xff] %v5421_v42  ;;  %6950 = vst [vmem:[#allocation70_spill] sm:$0xff] %v5424_v45  ;;  %v5430_v59 = vsub.f32 -0.6, %v4905_v43  ;;  %v1848_v50 = vmul.f32 2.5, %v6694_v37  ;;  %v1879_v18 = vmul.f32 2.5, %v5421_v42 }
 0x24a   : > { %v1880_v58 = vmul.f32 2.5, %v5424_v45  ;;  %v5437_v39 = vsub.f32 -0.6, %v4909_v1  ;;  %v1831_v22 = vmul.f32 %v1823_v26, %v5409_v34  ;;  %v1832_v55 = vmul.f32 %v1824_v33, %v5412_v23  ;;  %v3924_v38 = vpop.eup %3923 }
 0x24b   : > { %6951 = vst [vmem:[#allocation71_spill] sm:$0xff] %v5430_v59  ;;  %v1855_v27 = vmul.f32 %v1847_v62, %v1687_v8  ;;  %v1903_v61 = vmul.f32 2.5, %v5430_v59  ;;  %v1856_v2 = vmul.f32 %v1848_v50, %v1688_v21  ;;  %v1887_v48 = vmul.f32 %v1879_v18, %v1687_v8  ;;  %v3926_v7 = vpop.eup %3925 }
 0x24c   : > { %6952 = vst [vmem:[#allocation72_spill] sm:$0xff] %v5437_v39  ;;  %v1888_v0 = vmul.f32 %v1880_v58, %v1688_v21  ;;  %v1904_v37 = vmul.f32 2.5, %v5437_v39  ;;  %v1349_v17 = vadd.f32 1.0, %v3924_v38  ;;  %v2359_v44 = vmul.f32 1.25, %v3616_v63 }
 0x24d   : > { %v5443_v40 = vadd.f32 %v1855_v27, %v1831_v22  ;;  %v1911_v53 = vmul.f32 %v1903_v61, %v5314_v30  ;;  %v1350_v56 = vadd.f32 1.0, %v3926_v7  ;;  %v5446_v26 = vadd.f32 %v1856_v2, %v1832_v55 }
 0x24e   : > { %v1912_v33 = vmul.f32 %v1904_v37, %v5318_v19  ;;  %v2360_v62 = vmul.f32 1.25, %v3617_v46  ;;  %3927 = vrcp.f32 %v1349_v17  ;;  %v2375_v21 = vmul.f32 1.25, %v5430_v59 }
 0x24f   : > { %6953 = vst [vmem:[#allocation73_spill] sm:$0xff] %v5443_v40  ;;  %6954 = vst [vmem:[#allocation74_spill] sm:$0xff] %v5446_v26  ;;  %v1919_v23 = vadd.f32 %v1911_v53, %v1887_v48  ;;  %v2367_v8 = vmul.f32 %v2359_v44, %v5443_v40  ;;  %3929 = vrcp.f32 %v1350_v56  ;;  %v2376_v58 = vmul.f32 1.25, %v5437_v39 }
 0x250   : > { %v1920_v50 = vadd.f32 %v1912_v33, %v1888_v0  ;;  %v2368_v18 = vmul.f32 %v2360_v62, %v5446_v26  ;;  %v2399_v7 = vmul.f32 1.25, %v5421_v42  ;;  %v2400_v2 = vmul.f32 1.25, %v5424_v45 }
 0x251   : > { %v2383_v30 = vmul.f32 %v2375_v21, %v1919_v23  ;;  %v2416_v19 = vmul.f32 1.25, %v5326_v16  ;;  %v2423_v17 = vmul.f32 %v2415_v13, %v5351_v60  ;;  %v2719_v53 = vmul.f32 0.8333333, %v3616_v63 }
 0x252   : > { %v2384_v37 = vmul.f32 %v2376_v58, %v1920_v50  ;;  %v2720_v44 = vmul.f32 0.8333333, %v3617_v46  ;;  %v2407_v56 = vmul.f32 %v2399_v7, %v1919_v23  ;;  %v2408_v0 = vmul.f32 %v2400_v2, %v1920_v50 }
 0x253   : > { %v5457_v48 = vadd.f32 %v2383_v30, %v2367_v8  ;;  %v2424_v22 = vmul.f32 %v2416_v19, %v5353_v29  ;;  %v2735_v27 = vmul.f32 0.8333333, %v5323_v5  ;;  %v2736_v61 = vmul.f32 0.8333333, %v5326_v16 }
 0x254   : > { %v5460_v55 = vadd.f32 %v2384_v37, %v2368_v18  ;;  %vm1481_vm7 = vcmp.ge.f32.partialorder %v4932_v47, -0.6  ;;  %v5465_v38 = vadd.f32 %v2423_v17, %v2407_v56  ;;  %vm1482_vm8 = vcmp.ge.f32.partialorder %v4948_v49, -0.6 }
 0x255   : > { %6955 = vst [vmem:[#allocation75_spill] sm:$0xff] %v5457_v48  ;;  %v5467_v33 = vadd.f32 %v2424_v22, %v2408_v0  ;;  %v2727_v60 = vmul.f32 %v2719_v53, %v5457_v48  ;;  %v5475_v63 = vsel %vm1481_vm7, 1.0, %v6851_v6  ;;  %vm1505_vm9 = vcmp.ge.f32.partialorder %v4932_v47, -0.2 }
 0x256   : > { %6956 = vst [vmem:[#allocation76_spill] sm:$0xff] %v5460_v55  ;;  %6957 = vst [vmem:[#allocation77_spill] sm:$0xff] %v5465_v38  ;;  %v2728_v29 = vmul.f32 %v2720_v44, %v5460_v55  ;;  %v2743_v5 = vmul.f32 %v2735_v27, %v5465_v38  ;;  %v5481_v46 = vsel %vm1482_vm8, 1.0, %v6851_v6  ;;  %vm1506_vm10 = vcmp.ge.f32.partialorder %v4948_v49, -0.2 }
 0x257   : > { %6958 = vst [vmem:[#allocation78_spill] sm:$0xff] %v5467_v33  ;;  %v2744_v16 = vmul.f32 %v2736_v61, %v5467_v33  ;;  %v3554_v13 = vsel %vm1505_vm9, 1.0, %v6851_v6  ;;  %v3555_v62 = vsel %vm1506_vm10, 1.0, %v6851_v6  ;;  %vm1529_vm11 = vcmp.ge.f32.partialorder %v4932_v47, 0.2 }
 0x258   : > { %vm1530_vm12 = vcmp.ge.f32.partialorder %v4948_v49, 0.2  ;;  %v3928_v8 = vpop.eup %3927  ;;  %v2751_v21 = vadd.f32 %v2743_v5, %v2727_v60  ;;  %v3562_v18 = vsel %vm1529_vm11, 1.0, %v6851_v6  ;;  %vm1577_vm13 = vcmp.ge.f32.partialorder %v4932_v47, 1.0 }
 0x259   : > { %v2752_v50 = vadd.f32 %v2744_v16, %v2728_v29  ;;  %v3930_v58 = vpop.eup %3929  ;;  %v3563_v30 = vsel %vm1530_vm12, 1.0, %v6851_v6  ;;  %vm1553_vm14 = vcmp.ge.f32.partialorder %v4932_v47, 0.6  ;;  %vm1554_vm15 = vcmp.ge.f32.partialorder %v4948_v49, 0.6 }
 0x25a   : > { %vm1578_vm0 = vcmp.ge.f32.partialorder %v4948_v49, 1.0  ;;  %v1365_v7 = vmul.f32 %v3928_v8, %v4907_v31  ;;  %v1366_v2 = vmul.f32 %v3930_v58, %v4911_v3  ;;  %v3570_v19 = vsel %vm1553_vm14, 1.0, %v6851_v6 }
 0x25b   : > { %v3571_v37 = vsel %vm1554_vm15, 1.0, %v6851_v6  ;;  %v3578_v17 = vsel %vm1577_vm13, 1.0, %v6851_v6  ;;  %v3579_v53 = vsel %vm1578_vm0, 1.0, %v6851_v6  ;;  %vm1601_vm1 = vcmp.ge.f32.partialorder %v4932_v47, 1.4 }
 0x25c   : > { %vm1602_vm2 = vcmp.ge.f32.partialorder %v4948_v49, 1.4  ;;  %v1373_v44 = vpack.c.bf16 %v1366_v2, %v1365_v7  ;;  %v3006_v56 = vpack.c.bf16 %v2752_v50, %v2751_v21  ;;  %v5503_v0 = vsel %vm1601_vm1, 1.0, %v6851_v6 }
 0x25d   : > { %6959 = vst [vmem:[#allocation79_spill] sm:$0xff] %v5503_v0  ;;  %v5506_v22 = vsel %vm1602_vm2, 1.0, %v6851_v6  ;;  %v5509_v27 = vsub.f32 %v5475_v63, %v3554_v13  ;;  %v5512_v61 = vsub.f32 %v5481_v46, %v3555_v62  ;;  %v5514_v60 = vsub.f32 %v3554_v13, %v3562_v18 }
 0x25e   : > { %6960 = vst [vmem:[#allocation80_spill] sm:$0xff] %v5506_v22  ;;  %v5516_v29 = vsub.f32 %v3555_v62, %v3563_v30  ;;  %3749 = vmatpush3.bf16.msra.mxu1 %v1373_v44  ;;  %v1721_v5 = vsub.f32 %v3562_v18, %v3570_v19  ;;  %v1722_v16 = vsub.f32 %v3563_v30, %v3571_v37  ;;  %v3650_v58 = vadd.f32 0.2, %v4932_v47 }
 0x25f   : > { %v1729_v8 = vsub.f32 %v3570_v19, %v3578_v17  ;;  %v1730_v21 = vsub.f32 %v3571_v37, %v3579_v53  ;;  %3750 = vmatprep.subr.bf16.mxu1 %v3006_v56  ;;  %v5519_v50 = vsub.f32 %v3578_v17, %v5503_v0  ;;  %v5523_v7 = vadd.f32 0.2, %v4948_v49 }
 0x260   : > { %v5526_v2 = vsub.f32 0.6, %v4932_v47  ;;  %v5529_v13 = vsub.f32 %v3579_v53, %v5506_v22  ;;  %v5532_v62 = vsub.f32 0.6, %v4948_v49  ;;  %v5535_v18 = vadd.f32 -0.2, %v4932_v47 }
 0x261   : > { %6961 = vst [vmem:[#allocation81_spill] sm:$0xff] %v5519_v50  ;;  %v5538_v30 = vadd.f32 -0.2, %v4948_v49  ;;  %v2049_v19 = vmul.f32 2.5, %v3650_v58  ;;  %v2050_v37 = vmul.f32 2.5, %v5523_v7  ;;  %v5543_v44 = vsub.f32 1.0, %v4932_v47 }
 0x262   : > { %6962 = vst [vmem:[#allocation82_spill] sm:$0xff] %v5529_v13  ;;  %6963 = vst [vmem:[#allocation83_spill] sm:$0xff] %v5535_v18  ;;  %v2073_v17 = vmul.f32 2.5, %v5526_v2  ;;  %v2074_v53 = vmul.f32 2.5, %v5532_v62  ;;  %v2105_v56 = vmul.f32 2.5, %v5535_v18  ;;  %v5549_v55 = vsub.f32 1.0, %v4948_v49 }
 0x263   : > { %6964 = vst [vmem:[#allocation84_spill] sm:$0xff] %v5538_v30  ;;  %6965 = vst [vmem:[#allocation85_spill] sm:$0xff] %v5543_v44  ;;  %v2106_v23 = vmul.f32 2.5, %v5538_v30  ;;  %v2057_v48 = vmul.f32 %v2049_v19, %v5514_v60  ;;  %v2058_v39 = vmul.f32 %v2050_v37, %v5516_v29  ;;  %v2129_v59 = vmul.f32 2.5, %v5543_v44 }
 0x264   : > { %6966 = vst [vmem:[#allocation86_spill] sm:$0xff] %v5549_v55  ;;  %v2081_v26 = vmul.f32 %v2073_v17, %v1721_v5  ;;  %v2082_v40 = vmul.f32 %v2074_v53, %v1722_v16  ;;  %v2113_v34 = vmul.f32 %v2105_v56, %v1721_v5  ;;  %v2130_v38 = vmul.f32 2.5, %v5549_v55 }
 0x265   : > { %v2114_v33 = vmul.f32 %v2106_v23, %v1722_v16  ;;  %v2137_v42 = vmul.f32 %v2129_v59, %v1729_v8  ;;  %v5558_v20 = vadd.f32 -0.6, %v4932_v47  ;;  %v5561_v41 = vadd.f32 -0.6, %v4948_v49 }
 0x266   : > { %v5555_v45 = vadd.f32 %v2081_v26, %v2057_v48  ;;  %v5563_v19 = vadd.f32 %v2082_v40, %v2058_v39  ;;  %v2138_v37 = vmul.f32 %v2130_v38, %v1730_v21  ;;  %v2177_v17 = vsub.f32 1.4, %v4932_v47 }
 0x267   : > { %6967 = vst [vmem:[#allocation87_spill] sm:$0xff] %v5558_v20  ;;  %6968 = vst [vmem:[#allocation88_spill] sm:$0xff] %v5561_v41  ;;  %v2178_v53 = vsub.f32 1.4, %v4948_v49  ;;  %v2145_v5 = vadd.f32 %v2137_v42, %v2113_v34  ;;  %v2161_v23 = vmul.f32 2.5, %v5558_v20  ;;  %v2162_v26 = vmul.f32 2.5, %v5561_v41 }
 0x268   : > { %v2521_v48 = vmul.f32 1.25, %v3650_v58  ;;  %v2146_v59 = vadd.f32 %v2138_v37, %v2114_v33  ;;  %v2185_v16 = vmul.f32 2.5, %v2177_v17  ;;  %v2522_v22 = vmul.f32 1.25, %v5523_v7 }
 0x269   : > { %v2186_v56 = vmul.f32 2.5, %v2178_v53  ;;  %v2169_v0 = vmul.f32 %v2161_v23, %v1729_v8  ;;  %v2170_v35 = vmul.f32 %v2162_v26, %v1730_v21  ;;  %v2537_v39 = vmul.f32 1.25, %v5543_v44 }
 0x26a   : > { %v2529_v40 = vmul.f32 %v2521_v48, %v5555_v45  ;;  %v2193_v38 = vmul.f32 %v2185_v16, %v5519_v50  ;;  %v2530_v42 = vmul.f32 %v2522_v22, %v5563_v19  ;;  %v2538_v41 = vmul.f32 1.25, %v5549_v55 }
 0x26b   : > { %v2194_v34 = vmul.f32 %v2186_v56, %v5529_v13  ;;  %v2545_v20 = vmul.f32 %v2537_v39, %v2145_v5  ;;  %v2561_v33 = vmul.f32 1.25, %v5535_v18  ;;  %v2562_v37 = vmul.f32 1.25, %v5538_v30 }
 0x26c   : > { %v2577_v14 = vmul.f32 1.25, %v2177_v17  ;;  %v5578_v8 = vadd.f32 %v2193_v38, %v2169_v0  ;;  %v2546_v23 = vmul.f32 %v2538_v41, %v2146_v59  ;;  %v2578_v26 = vmul.f32 1.25, %v2178_v53 }
 0x26d   : > { %v5580_v21 = vadd.f32 %v2194_v34, %v2170_v35  ;;  %vm1383_vm3 = vcmp.ge.f32.partialorder %v4905_v43, -2.2  ;;  %vm1384_vm4 = vcmp.ge.f32.partialorder %v4909_v1, -2.2  ;;  %v5584_v48 = vadd.f32 %v2545_v20, %v2529_v40 }
 0x26e   : > { %6969 = vst [vmem:[#allocation89_spill] sm:$0xff] %v5578_v8  ;;  %v2569_v22 = vmul.f32 %v2561_v33, %v2145_v5  ;;  %v2570_v16 = vmul.f32 %v2562_v37, %v2146_v59  ;;  %v2881_v56 = vmul.f32 0.8333333, %v3650_v58  ;;  %v5586_v39 = vadd.f32 %v2546_v23, %v2530_v42 }
 0x26f   : > { %6970 = vst [vmem:[#allocation90_spill] sm:$0xff] %v5580_v21  ;;  %6971 = vst [vmem:[#allocation91_spill] sm:$0xff] %v5584_v48  ;;  %v2585_v55 = vmul.f32 %v2577_v14, %v5578_v8  ;;  %v2586_v0 = vmul.f32 %v2578_v26, %v5580_v21  ;;  %v2882_v35 = vmul.f32 0.8333333, %v5523_v7  ;;  %v2897_v38 = vmul.f32 0.8333333, %v2177_v17 }
 0x270   : > { %6972 = vst [vmem:[#allocation92_spill] sm:$0xff] %v5586_v39  ;;  %v2889_v41 = vmul.f32 %v2881_v56, %v5584_v48  ;;  %v2898_v34 = vmul.f32 0.8333333, %v2178_v53  ;;  %vm1457_vm5 = vcmp.ge.f32.partialorder %v4932_v47, -1.0  ;;  %vm1458_vm6 = vcmp.ge.f32.partialorder %v4948_v49, -1.0 }
 0x271   : > { %v5593_v44 = vadd.f32 %v2585_v55, %v2569_v22  ;;  %v5595_v20 = vadd.f32 %v2586_v0, %v2570_v16  ;;  %v2890_v58 = vmul.f32 %v2882_v35, %v5586_v39  ;;  %v5600_v14 = vsel %vm1457_vm5, 1.0, %v6851_v6 }
 0x272   : > { %v5603_v5 = vsel %vm1458_vm6, 1.0, %v6851_v6  ;;  %v3634_v7 = vadd.f32 1.0, %v4932_v47  ;;  %v3635_v17 = vadd.f32 1.0, %v4948_v49  ;;  %v5611_v59 = vsub.f32 %v5600_v14, %v5475_v63 }
 0x273   : > { %6973 = vst [vmem:[#allocation93_spill] sm:$0xff] %v5593_v44  ;;  %6974 = vst [vmem:[#allocation94_spill] sm:$0xff] %v5595_v20  ;;  %v2905_v53 = vmul.f32 %v2897_v38, %v5593_v44  ;;  %v2906_v55 = vmul.f32 %v2898_v34, %v5595_v20  ;;  %v5615_v40 = vsub.f32 %v5603_v5, %v5481_v46  ;;  %v5618_v37 = vsub.f32 -0.2, %v4932_v47 }
 0x274   : > { %v1937_v42 = vmul.f32 2.5, %v3634_v7  ;;  %v1938_v33 = vmul.f32 2.5, %v3635_v17  ;;  %v5621_v23 = vsub.f32 -0.2, %v4948_v49  ;;  %v5624_v16 = vadd.f32 0.6, %v4932_v47 }
 0x275   : > { %v2913_v26 = vadd.f32 %v2905_v53, %v2889_v41  ;;  %v2914_v22 = vadd.f32 %v2906_v55, %v2890_v58  ;;  %v5627_v63 = vadd.f32 0.6, %v4948_v49  ;;  %v1961_v0 = vmul.f32 2.5, %v5618_v37 }
 0x276   : > { %6975 = vst [vmem:[#allocation95_spill] sm:$0xff] %v5624_v16  ;;  %v1945_v56 = vmul.f32 %v1937_v42, %v5611_v59  ;;  %v1946_v46 = vmul.f32 %v1938_v33, %v5615_v40  ;;  %v1962_v35 = vmul.f32 2.5, %v5621_v23  ;;  %v1993_v34 = vmul.f32 2.5, %v5624_v16 }
 0x277   : > { %6976 = vst [vmem:[#allocation96_spill] sm:$0xff] %v5627_v63  ;;  %v3039_v38 = vpack.c.bf16 %v2914_v22, %v2913_v26  ;;  %v1994_v41 = vmul.f32 2.5, %v5627_v63  ;;  %v5636_v58 = vsub.f32 0.2, %v4932_v47  ;;  %v1969_v55 = vmul.f32 %v1961_v0, %v5509_v27 }
 0x278   : > { %v1970_v42 = vmul.f32 %v1962_v35, %v5512_v61  ;;  %v5643_v33 = vsub.f32 0.2, %v4948_v49  ;;  %v5648_v26 = vsel %vm1383_vm3, 1.0, %v6851_v6  ;;  %v5653_v22 = vsel %vm1384_vm4, 1.0, %v6851_v6 }
 0x279   : > { %6977 = vst [vmem:[#allocation97_spill] sm:$0xff] %v5636_v58  ;;  %6979 = vst [vmem:[#allocation99_spill] sm:$0xff] %v5648_v26  ;;  %3780 = vmatprep.subr.bf16.mxu0 %v3039_v38  ;;  %v2001_v53 = vmul.f32 %v1993_v34, %v5509_v27  ;;  %v2017_v0 = vmul.f32 2.5, %v5636_v58  ;;  %v5657_v36 = vadd.f32 %v1969_v55, %v1945_v56  ;;  %v2441_v20 = vmul.f32 1.25, %v3634_v7 }
 0x27a   : > { %6978 = vst [vmem:[#allocation98_spill] sm:$0xff] %v5643_v33  ;;  %6980 = vst [vmem:[#allocation100_spill] sm:$0xff] %v5653_v22  ;;  %v5659_v35 = vadd.f32 %v1970_v42, %v1946_v46  ;;  %v2002_v4 = vmul.f32 %v1994_v41, %v5512_v61  ;;  %v2018_v39 = vmul.f32 2.5, %v5643_v33  ;;  %v2442_v44 = vmul.f32 1.25, %v3635_v17 }
 0x27b   : > { %v2025_v48 = vmul.f32 %v2017_v0, %v5514_v60  ;;  %v2457_v21 = vmul.f32 1.25, %v5636_v58  ;;  %v2458_v27 = vmul.f32 1.25, %v5643_v33  ;;  %v2481_v34 = vmul.f32 1.25, %v5624_v16 }
 0x27c   : > { %v2026_v38 = vmul.f32 %v2018_v39, %v5516_v29  ;;  %v2497_v56 = vmul.f32 1.25, %v5526_v2  ;;  %v2449_v55 = vmul.f32 %v2441_v20, %v5657_v36  ;;  %v2482_v61 = vmul.f32 1.25, %v5627_v63 }
 0x27d   : > { %v2033_v46 = vadd.f32 %v2025_v48, %v2001_v53  ;;  %v2498_v41 = vmul.f32 1.25, %v5532_v62  ;;  %v2450_v42 = vmul.f32 %v2442_v44, %v5659_v35  ;;  %v2801_v58 = vmul.f32 0.8333333, %v3634_v7 }
 0x27e   : > { %v2034_v60 = vadd.f32 %v2026_v38, %v2002_v4  ;;  %v2505_v0 = vmul.f32 %v2497_v56, %v5555_v45  ;;  %v1327_v16 = vsub.f32 0.0, %v4905_v43  ;;  %v2802_v53 = vmul.f32 0.8333333, %v3635_v17 }
 0x27f   : > { %v2465_v29 = vmul.f32 %v2457_v21, %v2033_v46  ;;  %v2489_v39 = vmul.f32 %v2481_v34, %v2033_v46  ;;  %v2506_v33 = vmul.f32 %v2498_v41, %v5563_v19  ;;  %v1328_v20 = vsub.f32 0.0, %v4909_v1 }
 0x280   : > { %v2466_v30 = vmul.f32 %v2458_v27, %v2034_v60  ;;  %v2490_v48 = vmul.f32 %v2482_v61, %v2034_v60  ;;  %v2817_v4 = vmul.f32 0.8333333, %v5526_v2  ;;  %v1337_v44 = vmul.f32 1.442695, %v1327_v16 }
 0x281   : > { %v5677_v63 = vadd.f32 %v2465_v29, %v2449_v55  ;;  %v5679_v18 = vadd.f32 %v2505_v0, %v2489_v39  ;;  %v2818_v19 = vmul.f32 0.8333333, %v5532_v62  ;;  %v1339_v7 = vmul.f32 1.442695, %v1328_v20 }
 0x282   : > { %v5682_v45 = vadd.f32 %v2466_v30, %v2450_v42  ;;  %v5684_v21 = vadd.f32 %v2506_v33, %v2490_v48  ;;  %3931 = vpow2.f32 %v1337_v44  ;;  %vm1385_vm7 = vcmp.ge.f32.partialorder %v4932_v47, -2.2 }
 0x283   : > { %6981 = vst [vmem:[#allocation101_spill] sm:$0xff] %v5677_v63  ;;  %6982 = vst [vmem:[#allocation102_spill] sm:$0xff] %v5679_v18  ;;  %v2809_v38 = vmul.f32 %v2801_v58, %v5677_v63  ;;  %v2825_v17 = vmul.f32 %v2817_v4, %v5679_v18  ;;  %3933 = vpow2.f32 %v1339_v7  ;;  %vm1409_vm8 = vcmp.ge.f32.partialorder %v4932_v47, -1.8 }
 0x284   : > { %6983 = vst [vmem:[#allocation103_spill] sm:$0xff] %v5682_v45  ;;  %6984 = vst [vmem:[#allocation104_spill] sm:$0xff] %v5684_v21  ;;  %v2810_v27 = vmul.f32 %v2802_v53, %v5682_v45  ;;  %v2826_v34 = vmul.f32 %v2818_v19, %v5684_v21  ;;  %vm1410_vm9 = vcmp.ge.f32.partialorder %v4948_v49, -1.8  ;;  %v5695_v62 = vsel %vm1409_vm8, 1.0, %v6851_v6 }
 0x285   : > { %v2833_v2 = vadd.f32 %v2825_v17, %v2809_v38  ;;  %vm1433_vm10 = vcmp.ge.f32.partialorder %v4932_v47, -1.4  ;;  %v5699_v16 = vsel %vm1410_vm9, 1.0, %v6851_v6  ;;  %vm1434_vm11 = vcmp.ge.f32.partialorder %v4948_v49, -1.4 }
 0x286   : > { %v2834_v30 = vadd.f32 %v2826_v34, %v2810_v27  ;;  %v3530_v58 = vsel %vm1433_vm10, 1.0, %v6851_v6  ;;  %v5706_v56 = vsel %vm1385_vm7, 1.0, %v6851_v6  ;;  %v3531_v46 = vsel %vm1434_vm11, 1.0, %v6851_v6 }
 0x287   : > { %v5710_v55 = vsub.f32 %v5695_v62, %v3530_v58  ;;  %v5713_v41 = vsub.f32 %v5699_v16, %v3531_v46  ;;  %v1689_v60 = vsub.f32 %v3530_v58, %v5600_v14  ;;  %v1690_v42 = vsub.f32 %v3531_v46, %v5603_v5 }
 0x288   : > { %v3023_v61 = vpack.c.bf16 %v2834_v30, %v2833_v2  ;;  %v3618_v0 = vadd.f32 1.8, %v4932_v47  ;;  %v3619_v29 = vadd.f32 1.8, %v4948_v49  ;;  %v6739_v39 = vsub.f32 -1.0, %v4932_v47 }
 0x289   : > { %6985 = vst [vmem:[#allocation105_spill] sm:$0xff] %v5710_v55  ;;  %6986 = vst [vmem:[#allocation106_spill] sm:$0xff] %v5713_v41  ;;  %v6740_v48 = vsub.f32 -1.0, %v4948_v49  ;;  %v5724_v20 = vadd.f32 1.4, %v4932_v47  ;;  %vm1579_vm3 = vcmp.ge.f32.partialorder %v4963_v11, 1.0 }
 0x28a   : > { %3781 = vmatpush3.bf16.msra.mxu0 %v3023_v61  ;;  %v5727_v4 = vadd.f32 1.4, %v4948_v49  ;;  %v5730_v14 = vsub.f32 -0.6, %v4932_v47  ;;  %v1825_v5 = vmul.f32 2.5, %v3618_v0  ;;  %v1826_v44 = vmul.f32 2.5, %v3619_v29 }
 0x28b   : > { %6987 = vst [vmem:[#allocation107_spill] sm:$0xff] %v5724_v20  ;;  %v1849_v19 = vmul.f32 2.5, %v6739_v39  ;;  %v1850_v7 = vmul.f32 2.5, %v6740_v48  ;;  %v1881_v38 = vmul.f32 2.5, %v5724_v20  ;;  %v5739_v27 = vsub.f32 -0.6, %v4948_v49 }
 0x28c   : > { %6988 = vst [vmem:[#allocation108_spill] sm:$0xff] %v5727_v4  ;;  %6989 = vst [vmem:[#allocation109_spill] sm:$0xff] %v5730_v14  ;;  %v1882_v17 = vmul.f32 2.5, %v5727_v4  ;;  %v1905_v34 = vmul.f32 2.5, %v5730_v14  ;;  %v3932_v2 = vpop.eup %3931  ;;  %vm1386_vm12 = vcmp.ge.f32.partialorder %v4948_v49, -2.2  ;;  %v1833_v30 = vmul.f32 %v1825_v5, %v5710_v55 }
 0x28d   : > { %6990 = vst [vmem:[#allocation110_spill] sm:$0xff] %v5739_v27  ;;  %v1834_v58 = vmul.f32 %v1826_v44, %v5713_v41  ;;  %v1857_v46 = vmul.f32 %v1849_v19, %v1689_v60  ;;  %v1858_v61 = vmul.f32 %v1850_v7, %v1690_v42  ;;  %v3934_v39 = vpop.eup %3933  ;;  %v1351_v48 = vadd.f32 1.0, %v3932_v2 }
 0x28e   : > { %v1889_v53 = vmul.f32 %v1881_v38, %v1689_v60  ;;  %v1890_v33 = vmul.f32 %v1882_v17, %v1690_v42  ;;  %v1906_v45 = vmul.f32 2.5, %v5739_v27  ;;  %v1352_v63 = vadd.f32 1.0, %v3934_v39 }
 0x28f   : > { %v5746_v32 = vadd.f32 %v1857_v46, %v1833_v30  ;;  %v5748_v22 = vadd.f32 %v1858_v61, %v1834_v58  ;;  %v1913_v57 = vmul.f32 %v1905_v34, %v5611_v59  ;;  %3935 = vrcp.f32 %v1351_v48 }
 0x290   : > { %v1914_v5 = vmul.f32 %v1906_v45, %v5615_v40  ;;  %v2361_v55 = vmul.f32 1.25, %v3618_v0  ;;  %v2362_v44 = vmul.f32 1.25, %v3619_v29  ;;  %3937 = vrcp.f32 %v1352_v63 }
 0x291   : > { %6991 = vst [vmem:[#allocation111_spill] sm:$0xff] %v5746_v32  ;;  %6992 = vst [vmem:[#allocation112_spill] sm:$0xff] %v5748_v22  ;;  %v1921_v19 = vadd.f32 %v1913_v57, %v1889_v53  ;;  %v2377_v7 = vmul.f32 1.25, %v5730_v14  ;;  %v2378_v60 = vmul.f32 1.25, %v5739_v27  ;;  %v2401_v17 = vmul.f32 1.25, %v5724_v20 }
 0x292   : > { %v1922_v42 = vadd.f32 %v1914_v5, %v1890_v33  ;;  %v2369_v39 = vmul.f32 %v2361_v55, %v5746_v32  ;;  %v2370_v38 = vmul.f32 %v2362_v44, %v5748_v22  ;;  %v2402_v59 = vmul.f32 1.25, %v5727_v4 }
 0x293   : > { %v2385_v2 = vmul.f32 %v2377_v7, %v1921_v19  ;;  %v2417_v40 = vmul.f32 1.25, %v5618_v37  ;;  %v2418_v45 = vmul.f32 1.25, %v5621_v23  ;;  %v2409_v57 = vmul.f32 %v2401_v17, %v1921_v19 }
 0x294   : > { %v2386_v63 = vmul.f32 %v2378_v60, %v1922_v42  ;;  %v2721_v48 = vmul.f32 0.8333333, %v3618_v0  ;;  %v2722_v53 = vmul.f32 0.8333333, %v3619_v29  ;;  %v2410_v33 = vmul.f32 %v2402_v59, %v1922_v42 }
 0x295   : > { %v5760_v34 = vadd.f32 %v2385_v2, %v2369_v39  ;;  %v2425_v55 = vmul.f32 %v2417_v40, %v5657_v36  ;;  %v2426_v30 = vmul.f32 %v2418_v45, %v5659_v35  ;;  %v2737_v46 = vmul.f32 0.8333333, %v5618_v37 }
 0x296   : > { %v5764_v58 = vadd.f32 %v2386_v63, %v2370_v38  ;;  %v2738_v61 = vmul.f32 0.8333333, %v5621_v23  ;;  %vm1483_vm13 = vcmp.ge.f32.partialorder %v4963_v11, -0.6  ;;  %vm1484_vm14 = vcmp.ge.f32.partialorder %v5127_v52, -0.6 }
 0x297   : > { %6993 = vst [vmem:[#allocation113_spill] sm:$0xff] %v5760_v34  ;;  %v5769_v5 = vadd.f32 %v2425_v55, %v2409_v57  ;;  %v5771_v44 = vadd.f32 %v2426_v30, %v2410_v33  ;;  %v2729_v0 = vmul.f32 %v2721_v48, %v5760_v34  ;;  %v5778_v36 = vsel %vm1386_vm12, 1.0, %v6851_v6 }
 0x298   : > { %6994 = vst [vmem:[#allocation114_spill] sm:$0xff] %v5764_v58  ;;  %v2730_v35 = vmul.f32 %v2722_v53, %v5764_v58  ;;  %v5782_v37 = vsel %vm1483_vm13, 1.0, %v6851_v6  ;;  %vm1507_vm15 = vcmp.ge.f32.partialorder %v4963_v11, -0.2  ;;  %v5788_v19 = vsel %vm1484_vm14, 1.0, %v6851_v6 }
 0x299   : > { %6995 = vst [vmem:[#allocation115_spill] sm:$0xff] %v5769_v5  ;;  %6996 = vst [vmem:[#allocation116_spill] sm:$0xff] %v5771_v44  ;;  %v2745_v23 = vmul.f32 %v2737_v46, %v5769_v5  ;;  %v2746_v29 = vmul.f32 %v2738_v61, %v5771_v44  ;;  %vm1508_vm0 = vcmp.ge.f32.partialorder %v5127_v52, -0.2  ;;  %v3936_v7 = vpop.eup %3935  ;;  %v3556_v60 = vsel %vm1507_vm15, 1.0, %v6851_v6 }
 0x29a   : > { %v3557_v42 = vsel %vm1508_vm0, 1.0, %v6851_v6  ;;  %vm1531_vm1 = vcmp.ge.f32.partialorder %v4963_v11, 0.2  ;;  %vm1532_vm2 = vcmp.ge.f32.partialorder %v5127_v52, 0.2  ;;  %v3938_v39 = vpop.eup %3937  ;;  %v1367_v38 = vmul.f32 %v3936_v7, %v4905_v43 }
 0x29b   : > { %v2753_v17 = vadd.f32 %v2745_v23, %v2729_v0  ;;  %v2754_v2 = vadd.f32 %v2746_v29, %v2730_v35  ;;  %v1368_v59 = vmul.f32 %v3938_v39, %v4909_v1  ;;  %v3564_v40 = vsel %vm1531_vm1, 1.0, %v6851_v6 }
 0x29c   : > { %vm1555_vm4 = vcmp.ge.f32.partialorder %v4963_v11, 0.6  ;;  %vm1556_vm5 = vcmp.ge.f32.partialorder %v5127_v52, 0.6  ;;  %v3565_v45 = vsel %vm1532_vm2, 1.0, %v6851_v6  ;;  %vm1580_vm6 = vcmp.ge.f32.partialorder %v5127_v52, 1.0 }
 0x29d   : > { %v3572_v63 = vsel %vm1555_vm4, 1.0, %v6851_v6  ;;  %v3573_v57 = vsel %vm1556_vm5, 1.0, %v6851_v6  ;;  %v1374_v48 = vpack.c.bf16 %v1368_v59, %v1367_v38  ;;  %v3580_v53 = vsel %vm1579_vm3, 1.0, %v6851_v6 }
 0x29e   : > { %v3581_v33 = vsel %vm1580_vm6, 1.0, %v6851_v6  ;;  %vm1603_vm7 = vcmp.ge.f32.partialorder %v4963_v11, 1.4  ;;  %v3007_v55 = vpack.c.bf16 %v2754_v2, %v2753_v17  ;;  %vm1604_vm8 = vcmp.ge.f32.partialorder %v5127_v52, 1.4 }
 0x29f   : > { %v5810_v30 = vsel %vm1603_vm7, 1.0, %v6851_v6  ;;  %v5813_v46 = vsub.f32 %v5782_v37, %v3556_v60  ;;  %3751 = vmatpush3.bf16.msra.mxu1 %v1374_v48  ;;  %v5816_v61 = vsel %vm1604_vm8, 1.0, %v6851_v6  ;;  %v5819_v0 = vsub.f32 %v5788_v19, %v3557_v42 }
 0x2a0   : > { %6997 = vst [vmem:[#allocation117_spill] sm:$0xff] %v5810_v30  ;;  %6998 = vst [vmem:[#allocation118_spill] sm:$0xff] %v5816_v61  ;;  %v5821_v35 = vsub.f32 %v3556_v60, %v3564_v40  ;;  %v5823_v23 = vsub.f32 %v3557_v42, %v3565_v45  ;;  %3752 = vmatprep.subr.bf16.mxu1 %v3007_v55  ;;  %v1723_v29 = vsub.f32 %v3564_v40, %v3572_v63 }
 0x2a1   : > { %v1724_v7 = vsub.f32 %v3565_v45, %v3573_v57  ;;  %v1731_v39 = vsub.f32 %v3572_v63, %v3580_v53  ;;  %v1732_v38 = vsub.f32 %v3573_v57, %v3581_v33  ;;  %v5826_v17 = vsub.f32 %v3580_v53, %v5810_v30 }
 0x2a2   : > { %v3652_v2 = vadd.f32 0.2, %v4963_v11  ;;  %v3653_v59 = vadd.f32 0.2, %v5127_v52  ;;  %v5831_v48 = vsub.f32 0.6, %v4963_v11  ;;  %v5834_v60 = vsub.f32 %v3581_v33, %v5816_v61 }
 0x2a3   : > { %v5837_v42 = vsub.f32 0.6, %v5127_v52  ;;  %v5840_v40 = vadd.f32 -0.2, %v4963_v11  ;;  %v5843_v45 = vadd.f32 -0.2, %v5127_v52 }
 0x2a4   : > { %6999 = vst [vmem:[#allocation119_spill] sm:$0xff] %v5834_v60  ;;  %v2051_v63 = vmul.f32 2.5, %v3652_v2  ;;  %v2052_v57 = vmul.f32 2.5, %v3653_v59  ;;  %v2075_v53 = vmul.f32 2.5, %v5831_v48  ;;  %v5847_v55 = vsub.f32 1.0, %v4963_v11 }
 0x2a5   : > { %7000 = vst [vmem:[#allocation120_spill] sm:$0xff] %v5843_v45  ;;  %v2076_v58 = vmul.f32 2.5, %v5837_v42  ;;  %v2107_v33 = vmul.f32 2.5, %v5840_v40  ;;  %v2108_v34 = vmul.f32 2.5, %v5843_v45  ;;  %v5853_v27 = vsub.f32 1.0, %v5127_v52 }
 0x2a6   : > { %7001 = vst [vmem:[#allocation121_spill] sm:$0xff] %v5847_v55  ;;  %v2059_v14 = vmul.f32 %v2051_v63, %v5821_v35  ;;  %v2060_v22 = vmul.f32 %v2052_v57, %v5823_v23  ;;  %v2083_v32 = vmul.f32 %v2075_v53, %v1723_v29  ;;  %v2131_v41 = vmul.f32 2.5, %v5847_v55 }
 0x2a7   : > { %7002 = vst [vmem:[#allocation122_spill] sm:$0xff] %v5853_v27  ;;  %v2084_v44 = vmul.f32 %v2076_v58, %v1724_v7  ;;  %v2115_v5 = vmul.f32 %v2107_v33, %v1723_v29  ;;  %v2116_v4 = vmul.f32 %v2108_v34, %v1724_v7  ;;  %v2132_v20 = vmul.f32 2.5, %v5853_v27 }
 0x2a8   : > { %v5859_v26 = vadd.f32 %v2083_v32, %v2059_v14  ;;  %v2139_v61 = vmul.f32 %v2131_v41, %v1731_v39  ;;  %v5862_v30 = vadd.f32 -0.6, %v4963_v11  ;;  %v5865_v21 = vadd.f32 -0.6, %v5127_v52 }
 0x2a9   : > { %v5867_v63 = vadd.f32 %v2084_v44, %v2060_v22  ;;  %v2140_v57 = vmul.f32 %v2132_v20, %v1732_v38  ;;  %v2179_v53 = vsub.f32 1.4, %v4963_v11  ;;  %v2180_v58 = vsub.f32 1.4, %v5127_v52 }
 0x2aa   : > { %7003 = vst [vmem:[#allocation123_spill] sm:$0xff] %v5862_v30  ;;  %7004 = vst [vmem:[#allocation124_spill] sm:$0xff] %v5865_v21  ;;  %v2147_v29 = vadd.f32 %v2139_v61, %v2115_v5  ;;  %v2163_v34 = vmul.f32 2.5, %v5862_v30  ;;  %v2164_v32 = vmul.f32 2.5, %v5865_v21  ;;  %v2523_v14 = vmul.f32 1.25, %v3652_v2 }
 0x2ab   : > { %v2148_v41 = vadd.f32 %v2140_v57, %v2116_v4  ;;  %v2187_v7 = vmul.f32 2.5, %v2179_v53  ;;  %v2188_v33 = vmul.f32 2.5, %v2180_v58  ;;  %v2524_v18 = vmul.f32 1.25, %v3653_v59 }
 0x2ac   : > { %v2171_v13 = vmul.f32 %v2163_v34, %v1731_v39  ;;  %v2172_v50 = vmul.f32 %v2164_v32, %v1732_v38  ;;  %v2531_v22 = vmul.f32 %v2523_v14, %v5859_v26  ;;  %v2539_v20 = vmul.f32 1.25, %v5847_v55 }
 0x2ad   : > { %v2195_v44 = vmul.f32 %v2187_v7, %v5826_v17  ;;  %v2196_v8 = vmul.f32 %v2188_v33, %v5834_v60  ;;  %v2532_v5 = vmul.f32 %v2524_v18, %v5867_v63  ;;  %v2540_v61 = vmul.f32 1.25, %v5853_v27 }
 0x2ae   : > { %v2547_v21 = vmul.f32 %v2539_v20, %v2147_v29  ;;  %v2563_v4 = vmul.f32 1.25, %v5840_v40  ;;  %v2564_v57 = vmul.f32 1.25, %v5843_v45  ;;  %v2579_v30 = vmul.f32 1.25, %v2179_v53 }
 0x2af   : > { %v5881_v39 = vadd.f32 %v2195_v44, %v2171_v13  ;;  %v5883_v38 = vadd.f32 %v2196_v8, %v2172_v50  ;;  %v2548_v34 = vmul.f32 %v2540_v61, %v2148_v41  ;;  %v2580_v32 = vmul.f32 1.25, %v2180_v58 }
 0x2b0   : > { %v5885_v14 = vadd.f32 %v2547_v21, %v2531_v22  ;;  %v2571_v7 = vmul.f32 %v2563_v4, %v2147_v29  ;;  %v2572_v33 = vmul.f32 %v2564_v57, %v2148_v41  ;;  %v2883_v55 = vmul.f32 0.8333333, %v3652_v2 }
 0x2b1   : > { %v5887_v18 = vadd.f32 %v2548_v34, %v2532_v5  ;;  %v2587_v20 = vmul.f32 %v2579_v30, %v5881_v39  ;;  %v2588_v27 = vmul.f32 %v2580_v32, %v5883_v38  ;;  %v2884_v60 = vmul.f32 0.8333333, %v3653_v59 }
 0x2b2   : > { %7005 = vst [vmem:[#allocation125_spill] sm:$0xff] %v5885_v14  ;;  %v2891_v45 = vmul.f32 %v2883_v55, %v5885_v14  ;;  %v2899_v13 = vmul.f32 0.8333333, %v2179_v53  ;;  %v2900_v44 = vmul.f32 0.8333333, %v2180_v58  ;;  %vm1459_vm9 = vcmp.ge.f32.partialorder %v4963_v11, -1.0 }
 0x2b3   : > { %7006 = vst [vmem:[#allocation126_spill] sm:$0xff] %v5887_v18  ;;  %v5893_v50 = vadd.f32 %v2587_v20, %v2571_v7  ;;  %v5895_v8 = vadd.f32 %v2588_v27, %v2572_v33  ;;  %v2892_v21 = vmul.f32 %v2884_v60, %v5887_v18  ;;  %vm1460_vm10 = vcmp.ge.f32.partialorder %v5127_v52, -1.0 }
 0x2b4   : > { %v5900_v2 = vsel %vm1459_vm9, 1.0, %v6851_v6  ;;  %v5903_v30 = vsel %vm1460_vm10, 1.0, %v6851_v6  ;;  %v3636_v59 = vadd.f32 1.0, %v4963_v11  ;;  %v3637_v55 = vadd.f32 1.0, %v5127_v52 }
 0x2b5   : > { %7007 = vst [vmem:[#allocation127_spill] sm:$0xff] %v5893_v50  ;;  %7008 = vst [vmem:[#allocation128_spill] sm:$0xff] %v5895_v8  ;;  %v2907_v53 = vmul.f32 %v2899_v13, %v5893_v50  ;;  %v2908_v58 = vmul.f32 %v2900_v44, %v5895_v8  ;;  %v5911_v27 = vsub.f32 %v5900_v2, %v5782_v37  ;;  %v5918_v22 = vsub.f32 -0.2, %v4963_v11 }
 0x2b6   : > { %v5915_v60 = vsub.f32 %v5903_v30, %v5788_v19  ;;  %v1939_v29 = vmul.f32 2.5, %v3636_v59  ;;  %v1940_v41 = vmul.f32 2.5, %v3637_v55  ;;  %v5921_v5 = vsub.f32 -0.2, %v5127_v52 }
 0x2b7   : > { %v2915_v61 = vadd.f32 %v2907_v53, %v2891_v45  ;;  %v2916_v4 = vadd.f32 %v2908_v58, %v2892_v21  ;;  %v5924_v57 = vadd.f32 0.6, %v4963_v11  ;;  %v5927_v37 = vadd.f32 0.6, %v5127_v52 }
 0x2b8   : > { %v1947_v34 = vmul.f32 %v1939_v29, %v5911_v27  ;;  %v1948_v19 = vmul.f32 %v1940_v41, %v5915_v60  ;;  %v1963_v32 = vmul.f32 2.5, %v5918_v22  ;;  %v1964_v7 = vmul.f32 2.5, %v5921_v5 }
 0x2b9   : > { %7009 = vst [vmem:[#allocation129_spill] sm:$0xff] %v5924_v57  ;;  %7010 = vst [vmem:[#allocation130_spill] sm:$0xff] %v5927_v37  ;;  %v3040_v33 = vpack.c.bf16 %v2916_v4, %v2915_v61  ;;  %v1995_v20 = vmul.f32 2.5, %v5924_v57  ;;  %v1996_v45 = vmul.f32 2.5, %v5927_v37  ;;  %v5936_v13 = vsub.f32 0.2, %v4963_v11 }
 0x2ba   : > { %v1971_v44 = vmul.f32 %v1963_v32, %v5813_v46  ;;  %v1972_v21 = vmul.f32 %v1964_v7, %v5819_v0  ;;  %v5941_v53 = vsub.f32 0.2, %v5127_v52  ;;  %v2443_v58 = vmul.f32 1.25, %v3636_v59 }
 0x2bb   : > { %7011 = vst [vmem:[#allocation131_spill] sm:$0xff] %v5936_v13  ;;  %3782 = vmatprep.subr.bf16.mxu0 %v3040_v33  ;;  %v2003_v29 = vmul.f32 %v1995_v20, %v5813_v46  ;;  %v2004_v41 = vmul.f32 %v1996_v45, %v5819_v0  ;;  %v2019_v61 = vmul.f32 2.5, %v5936_v13  ;;  %v2444_v4 = vmul.f32 1.25, %v3637_v55 }
 0x2bc   : > { %7012 = vst [vmem:[#allocation132_spill] sm:$0xff] %v5941_v53  ;;  %v5946_v18 = vadd.f32 %v1971_v44, %v1947_v34  ;;  %v5948_v14 = vadd.f32 %v1972_v21, %v1948_v19  ;;  %v2020_v32 = vmul.f32 2.5, %v5941_v53  ;;  %v2459_v7 = vmul.f32 1.25, %v5936_v13 }
 0x2bd   : > { %v2027_v8 = vmul.f32 %v2019_v61, %v5821_v35  ;;  %v2460_v50 = vmul.f32 1.25, %v5941_v53  ;;  %v2483_v33 = vmul.f32 1.25, %v5924_v57  ;;  %v2484_v46 = vmul.f32 1.25, %v5927_v37 }
 0x2be   : > { %v2028_v0 = vmul.f32 %v2020_v32, %v5823_v23  ;;  %v2451_v20 = vmul.f32 %v2443_v58, %v5946_v18  ;;  %v2452_v34 = vmul.f32 %v2444_v4, %v5948_v14  ;;  %v2499_v19 = vmul.f32 1.25, %v5831_v48 }
 0x2bf   : > { %v2035_v45 = vadd.f32 %v2027_v8, %v2003_v29  ;;  %v2500_v44 = vmul.f32 1.25, %v5837_v42  ;;  %v2803_v21 = vmul.f32 0.8333333, %v3636_v59  ;;  %v2804_v13 = vmul.f32 0.8333333, %v3637_v55 }
 0x2c0   : > { %v2036_v35 = vadd.f32 %v2028_v0, %v2004_v41  ;;  %v2507_v61 = vmul.f32 %v2499_v19, %v5859_v26  ;;  %v2819_v53 = vmul.f32 0.8333333, %v5831_v48  ;;  %v2820_v37 = vmul.f32 0.8333333, %v5837_v42 }
 0x2c1   : > { %v2467_v57 = vmul.f32 %v2459_v7, %v2035_v45  ;;  %v2491_v23 = vmul.f32 %v2483_v33, %v2035_v45  ;;  %v2508_v58 = vmul.f32 %v2500_v44, %v5867_v63  ;;  %vm1621_vm11 = vcmp.ge.f32.partialorder %v4907_v31, 1.8 }
 0x2c2   : > { %v2468_v4 = vmul.f32 %v2460_v50, %v2036_v35  ;;  %v2492_v32 = vmul.f32 %v2484_v46, %v2036_v35  ;;  %vm1622_vm12 = vcmp.ge.f32.partialorder %v4911_v3, 1.8  ;;  %v5968_v8 = vsel %vm1621_vm11, 1.0, %v6851_v6 }
 0x2c3   : > { %7013 = vst [vmem:[#allocation133_spill] sm:$0xff] %v5968_v8  ;;  %v5970_v59 = vadd.f32 %v2467_v57, %v2451_v20  ;;  %v5972_v26 = vadd.f32 %v2507_v61, %v2491_v23  ;;  %v5975_v48 = vsel %vm1622_vm12, 1.0, %v6851_v6  ;;  %v5979_v42 = vsub.f32 %v5046_v51, %v5968_v8 }
 0x2c4   : > { %7014 = vst [vmem:[#allocation134_spill] sm:$0xff] %v5975_v48  ;;  %v5981_v63 = vadd.f32 %v2468_v4, %v2452_v34  ;;  %v5983_v50 = vadd.f32 %v2508_v58, %v2492_v32  ;;  %v5987_v55 = vsub.f32 %v5049_v28, %v5975_v48  ;;  %v5990_v57 = vadd.f32 -1.0, %v4907_v31 }
 0x2c5   : > { %7015 = vst [vmem:[#allocation135_spill] sm:$0xff] %v5979_v42  ;;  %v2811_v29 = vmul.f32 %v2803_v21, %v5970_v59  ;;  %v2827_v41 = vmul.f32 %v2819_v53, %v5972_v26  ;;  %v5995_v7 = vadd.f32 -1.0, %v4911_v3  ;;  %v2229_v51 = vsub.f32 1.8, %v4907_v31 }
 0x2c6   : > { %7016 = vst [vmem:[#allocation136_spill] sm:$0xff] %v5987_v55  ;;  %7017 = vst [vmem:[#allocation137_spill] sm:$0xff] %v5990_v57  ;;  %v2812_v33 = vmul.f32 %v2804_v13, %v5981_v63  ;;  %v2828_v46 = vmul.f32 %v2820_v37, %v5983_v50  ;;  %v2213_v0 = vmul.f32 2.5, %v5990_v57  ;;  %v2230_v28 = vsub.f32 1.8, %v4911_v3 }
 0x2c7   : > { %7018 = vst [vmem:[#allocation138_spill] sm:$0xff] %v5995_v7  ;;  %v2835_v20 = vadd.f32 %v2827_v41, %v2811_v29  ;;  %v2214_v34 = vmul.f32 2.5, %v5995_v7  ;;  %v2237_v19 = vmul.f32 2.5, %v2229_v51  ;;  %v2597_v45 = vmul.f32 1.25, %v5094_v25 }
 0x2c8   : > { %v2836_v53 = vadd.f32 %v2828_v46, %v2812_v33  ;;  %v2221_v44 = vmul.f32 %v2213_v0, %v5058_v9  ;;  %v2238_v21 = vmul.f32 2.5, %v2230_v28  ;;  %v2598_v35 = vmul.f32 1.25, %v5097_v24  ;;  %v7020_v33 = vld [vmem:[#allocation35_spill] sm:$0xff] }
 0x2c9   : > { %v2222_v13 = vmul.f32 %v2214_v34, %v5061_v54  ;;  %v2245_v37 = vmul.f32 %v2237_v19, %v5979_v42  ;;  %v2605_v61 = vmul.f32 %v2597_v45, %v5115_v15  ;;  %v2613_v23 = vmul.f32 1.25, %v2229_v51  ;;  %v7022_v19 = vld [vmem:[#allocation16_spill] sm:$0xff]  ;;  %v7023_v45 = vld [vmem:[#allocation21_spill] sm:$0xff] }
 0x2ca   : > { %v3024_v58 = vpack.c.bf16 %v2836_v53, %v2835_v20  ;;  %v2246_v4 = vmul.f32 %v2238_v21, %v5987_v55  ;;  %v2606_v32 = vmul.f32 %v2598_v35, %v5117_v10  ;;  %v2614_v29 = vmul.f32 1.25, %v2230_v28  ;;  %v7024_v21 = vld [vmem:[#allocation13_spill] sm:$0xff] }
 0x2cb   : > { %v6011_v41 = vadd.f32 %v2245_v37, %v2221_v44  ;;  %v2917_v9 = vmul.f32 0.8333333, %v5072_v12  ;;  %v2918_v46 = vmul.f32 0.8333333, %v7020_v33  ;;  %v2933_v0 = vmul.f32 0.8333333, %v2229_v51 }
 0x2cc   : > { %3783 = vmatpush3.bf16.msra.mxu0 %v3024_v58  ;;  %v6015_v54 = vadd.f32 %v2246_v4, %v2222_v13  ;;  %v2934_v34 = vmul.f32 0.8333333, %v2230_v28  ;;  %v2837_v15 = vmul.f32 0.8333333, %v7022_v19  ;;  %v2838_v20 = vmul.f32 0.8333333, %v7023_v45 }
 0x2cd   : > { %7019 = vst [vmem:[#allocation139_spill] sm:$0xff] %v6011_v41  ;;  %v2621_v53 = vmul.f32 %v2613_v23, %v6011_v41  ;;  %v2925_v10 = vmul.f32 %v2917_v9, %v7024_v21  ;;  %v7025_v35 = vld [vmem:[#allocation17_spill] sm:$0xff]  ;;  %v7028_v58 = vld [vmem:[#allocation38_spill] sm:$0xff]  ;;  %v7029_v4 = vld [vmem:[#allocation19_spill] sm:$0xff]  ;;  %v1329_v23 = vsub.f32 0.0, %v4932_v47  ;;  %v1330_v9 = vsub.f32 0.0, %v4948_v49 }
 0x2ce   : > { %7021 = vst [vmem:[#allocation35_spill] sm:$0xff] %v6015_v54  ;;  %v2926_v44 = vmul.f32 %v2918_v46, %v7025_v35  ;;  %v7026_v37 = vld [vmem:[#allocation33_spill] sm:$0xff]  ;;  %v2622_v12 = vmul.f32 %v2614_v29, %v6015_v54  ;;  %v2846_v13 = vmul.f32 %v2838_v20, %v7028_v58  ;;  %v2854_v28 = vmul.f32 0.8333333, %v7029_v4  ;;  %v7031_v19 = vld [vmem:[#allocation24_spill] sm:$0xff] }
 0x2cf   : > { %v2853_v24 = vmul.f32 0.8333333, %v7026_v37  ;;  %v7027_v33 = vld [vmem:[#allocation37_spill] sm:$0xff]  ;;  %v6027_v25 = vadd.f32 %v2621_v53, %v2605_v61  ;;  %v7033_v46 = vld [vmem:[#allocation12_spill] sm:$0xff]  ;;  %vm1623_vm13 = vcmp.ge.f32.partialorder %v4905_v43, 1.8 }
 0x2d0   : > { %v2845_v51 = vmul.f32 %v2837_v15, %v7027_v33  ;;  %v6032_v21 = vadd.f32 %v2622_v12, %v2606_v32  ;;  %v2862_v35 = vmul.f32 %v2854_v28, %v7033_v46  ;;  %vm1624_vm14 = vcmp.ge.f32.partialorder %v4909_v1, 1.8  ;;  %v7042_v46 = vld [vmem:[#allocation47_spill] sm:$0xff]  ;;  %v7044_v29 = vld [vmem:[#allocation41_spill] sm:$0xff]  ;;  %v7049_v54 = vld [vmem:[#allocation44_spill] sm:$0xff] }
 0x2d1   : > { %7030 = vst [vmem:[#allocation16_spill] sm:$0xff] %v6027_v25  ;;  %v2861_v45 = vmul.f32 %v2853_v24, %v7031_v19  ;;  %v2941_v61 = vmul.f32 %v2933_v0, %v6027_v25  ;;  %v1341_v15 = vmul.f32 1.442695, %v1329_v23  ;;  %v1343_v20 = vmul.f32 1.442695, %v1330_v9  ;;  %v7036_v0 = vld [vmem:[#allocation39_spill] sm:$0xff] }
 0x2d2   : > { %7032 = vst [vmem:[#allocation21_spill] sm:$0xff] %v6032_v21  ;;  %v2942_v53 = vmul.f32 %v2934_v34, %v6032_v21  ;;  %v6044_v32 = vsel %vm1623_vm13, 1.0, %v6851_v6  ;;  %v6047_v37 = vsel %vm1624_vm14, 1.0, %v6851_v6  ;;  %v2870_v58 = vadd.f32 %v2862_v35, %v2846_v13  ;;  %v3895_v34 = vld [vmem:[%s6608_s2 + $0x4] ss:$20 sps:$4 sm:$0xff]   ;;  %v7050_v41 = vld [vmem:[#allocation53_spill] sm:$0xff] }
 0x2d3   : > { %7034 = vst [vmem:[#allocation13_spill] sm:$0xff] %v6044_v32  ;;  %7035 = vst [vmem:[#allocation17_spill] sm:$0xff] %v6047_v37  ;;  %v2949_v12 = vadd.f32 %v2941_v61, %v2925_v10  ;;  %v2869_v33 = vadd.f32 %v2861_v45, %v2845_v51  ;;  %3939 = vpow2.f32 %v1341_v15  ;;  %v6051_v28 = vsub.f32 %v7036_v0, %v6044_v32  ;;  %v7039_v23 = vld [vmem:[#allocation40_spill] sm:$0xff] }
 0x2d4   : > { %v2950_v4 = vadd.f32 %v2942_v53, %v2926_v44  ;;  %3941 = vpow2.f32 %v1343_v20  ;;  %v6054_v19 = vadd.f32 -1.0, %v4905_v43  ;;  %v6061_v9 = vsub.f32 %v7039_v23, %v6047_v37  ;;  %v7043_v61 = vld [vmem:[#allocation48_spill] sm:$0xff]  ;;  %3198 = vmatprep.mubr.bf16.mxu1 %v3895_v34  ;;  %v7048_v34 = vld [vmem:[#allocation42_spill] sm:$0xff] }
 0x2d5   : > { %7037 = vst [vmem:[#allocation33_spill] sm:$0xff] %v6051_v28  ;;  %v6064_v10 = vadd.f32 -1.0, %v4909_v1  ;;  %v2231_v44 = vsub.f32 1.8, %v4905_v43  ;;  %v2232_v51 = vsub.f32 1.8, %v4909_v1  ;;  %v3029_v20 = vpack.c.bf16 %v2870_v58, %v2869_v33 }
 0x2d6   : > { %7038 = vst [vmem:[#allocation37_spill] sm:$0xff] %v6054_v19  ;;  %7040 = vst [vmem:[#allocation38_spill] sm:$0xff] %v6061_v9  ;;  %v3045_v13 = vpack.c.bf16 %v2950_v4, %v2949_v12  ;;  %v2215_v45 = vmul.f32 2.5, %v6054_v19  ;;  %v2599_v35 = vmul.f32 1.25, %v7042_v46  ;;  %v2600_v15 = vmul.f32 1.25, %v7043_v61  ;;  %v7045_v12 = vld [vmem:[#allocation49_spill] sm:$0xff] }
 0x2d7   : > { %7041 = vst [vmem:[#allocation19_spill] sm:$0xff] %v6064_v10  ;;  %v2216_v53 = vmul.f32 2.5, %v6064_v10  ;;  %v2239_v0 = vmul.f32 2.5, %v2231_v44  ;;  %v2240_v23 = vmul.f32 2.5, %v2232_v51  ;;  %v3898_v24 = vld [vmem:[%s6608_s2 + $0xc] ss:$20 sps:$4 sm:$0xff]  }
 0x2d8   : > { %3784 = vmatprep.subr.bf16.mxu0 %v3045_v13  ;;  %v2223_v37 = vmul.f32 %v2215_v45, %v7044_v29  ;;  %v2607_v4 = vmul.f32 %v2599_v35, %v7045_v12  ;;  %v7046_v19 = vld [vmem:[#allocation50_spill] sm:$0xff]  ;;  %v7047_v46 = vld [vmem:[#allocation43_spill] sm:$0xff]  ;;  %v2615_v10 = vmul.f32 1.25, %v2231_v44  ;;  %3247 = vmatprep.mubr.bf16.mxu0 %v3898_v24  ;;  %v2616_v25 = vmul.f32 1.25, %v2232_v51 }
 0x2d9   : > { %v2608_v32 = vmul.f32 %v2600_v15, %v7046_v19  ;;  %v2919_v21 = vmul.f32 0.8333333, %v7047_v46  ;;  %3785 = vmatpush3.bf16.msra.mxu0 %v3029_v20  ;;  %v2224_v33 = vmul.f32 %v2216_v53, %v7048_v34  ;;  %v2247_v58 = vmul.f32 %v2239_v0, %v6051_v28  ;;  %v7053_v15 = vld [vmem:[#allocation54_spill] sm:$0xff] }
 0x2da   : > { %v2248_v61 = vmul.f32 %v2240_v23, %v6061_v9  ;;  %v2920_v13 = vmul.f32 0.8333333, %v7049_v54  ;;  %vm1387_vm15 = vcmp.ge.f32.partialorder %v4963_v11, -2.2  ;;  %v2935_v46 = vmul.f32 0.8333333, %v2231_v44 }
 0x2db   : > { %v2927_v29 = vmul.f32 %v2919_v21, %v7050_v41  ;;  %v6085_v45 = vadd.f32 %v2247_v58, %v2223_v37  ;;  %v2936_v35 = vmul.f32 0.8333333, %v2232_v51  ;;  %vm1388_vm0 = vcmp.ge.f32.partialorder %v5127_v52, -2.2 }
 0x2dc   : > { %v6087_v19 = vadd.f32 %v2248_v61, %v2224_v33  ;;  %v2928_v20 = vmul.f32 %v2920_v13, %v7053_v15  ;;  %vm1411_vm1 = vcmp.ge.f32.partialorder %v4963_v11, -1.8  ;;  %vm1412_vm2 = vcmp.ge.f32.partialorder %v5127_v52, -1.8 }
 0x2dd   : > { %7051 = vst [vmem:[#allocation24_spill] sm:$0xff] %v6085_v45  ;;  %v3940_v24 = vpop.eup %3939  ;;  %v2623_v54 = vmul.f32 %v2615_v10, %v6085_v45  ;;  %v6096_v21 = vsel %vm1387_vm15, 1.0, %v6851_v6  ;;  %v6099_v37 = vsel %vm1411_vm1, 1.0, %v6851_v6  ;;  %v6102_v61 = vsel %vm1412_vm2, 1.0, %v6851_v6 }
 0x2de   : > { %7052 = vst [vmem:[#allocation12_spill] sm:$0xff] %v6087_v19  ;;  %v2624_v41 = vmul.f32 %v2616_v25, %v6087_v19  ;;  %v3942_v44 = vpop.eup %3941  ;;  %v1353_v51 = vadd.f32 1.0, %v3940_v24  ;;  %vm1435_vm3 = vcmp.ge.f32.partialorder %v4963_v11, -1.4  ;;  %vm1436_vm4 = vcmp.ge.f32.partialorder %v5127_v52, -1.4 }
 0x2df   : > { %v1354_v53 = vadd.f32 1.0, %v3942_v44  ;;  %v6106_v0 = vadd.f32 %v2623_v54, %v2607_v4  ;;  %v3532_v25 = vsel %vm1435_vm3, 1.0, %v6851_v6  ;;  %v6114_v23 = vsel %vm1388_vm0, 1.0, %v6851_v6 }
 0x2e0   : > { %v6108_v10 = vadd.f32 %v2624_v41, %v2608_v32  ;;  %3943 = vrcp.f32 %v1353_v51  ;;  %v3533_v12 = vsel %vm1436_vm4, 1.0, %v6851_v6  ;;  %v6118_v34 = vsub.f32 %v6099_v37, %v3532_v25 }
 0x2e1   : > { %7054 = vst [vmem:[#allocation39_spill] sm:$0xff] %v6106_v0  ;;  %3945 = vrcp.f32 %v1354_v53  ;;  %v2943_v33 = vmul.f32 %v2935_v46, %v6106_v0  ;;  %v6123_v32 = vsub.f32 %v6102_v61, %v3533_v12  ;;  %v1691_v58 = vsub.f32 %v3532_v25, %v5900_v2 }
 0x2e2   : > { %7055 = vst [vmem:[#allocation40_spill] sm:$0xff] %v6108_v10  ;;  %v2944_v4 = vmul.f32 %v2936_v35, %v6108_v10  ;;  %v1692_v13 = vsub.f32 %v3533_v12, %v5903_v30  ;;  %v3620_v15 = vadd.f32 1.8, %v4963_v11  ;;  %v3621_v24 = vadd.f32 1.8, %v5127_v52 }
 0x2e3   : > { %v2951_v54 = vadd.f32 %v2943_v33, %v2927_v29  ;;  %v6794_v44 = vsub.f32 -1.0, %v4963_v11  ;;  %v6795_v51 = vsub.f32 -1.0, %v5127_v52  ;;  %v6132_v35 = vadd.f32 1.4, %v4963_v11 }
 0x2e4   : > { %v2952_v41 = vadd.f32 %v2944_v4, %v2928_v20  ;;  %v1827_v46 = vmul.f32 2.5, %v3620_v15  ;;  %v1828_v53 = vmul.f32 2.5, %v3621_v24  ;;  %v6135_v10 = vadd.f32 1.4, %v5127_v52 }
 0x2e5   : > { %v1851_v30 = vmul.f32 2.5, %v6794_v44  ;;  %v1852_v29 = vmul.f32 2.5, %v6795_v51  ;;  %v6142_v20 = vsub.f32 -0.6, %v4963_v11  ;;  %v1883_v33 = vmul.f32 2.5, %v6132_v35 }
 0x2e6   : > { %v3046_v2 = vpack.c.bf16 %v2952_v41, %v2951_v54  ;;  %v1835_v25 = vmul.f32 %v1827_v46, %v6118_v34  ;;  %v1836_v12 = vmul.f32 %v1828_v53, %v6123_v32  ;;  %v1884_v4 = vmul.f32 2.5, %v6135_v10 }
 0x2e7   : > { %v1859_v0 = vmul.f32 %v1851_v30, %v1691_v58  ;;  %v1860_v54 = vmul.f32 %v1852_v29, %v1692_v13  ;;  %v6149_v41 = vsub.f32 -0.6, %v5127_v52  ;;  %v1907_v44 = vmul.f32 2.5, %v6142_v20 }
 0x2e8   : > { %3786 = vmatprep.subr.bf16.mxu0 %v3046_v2  ;;  %v1891_v51 = vmul.f32 %v1883_v33, %v1691_v58  ;;  %v1892_v19 = vmul.f32 %v1884_v4, %v1692_v13  ;;  %v2363_v9 = vmul.f32 1.25, %v3620_v15  ;;  %v2364_v28 = vmul.f32 1.25, %v3621_v24 }
 0x2e9   : > { %7056 = vst [vmem:[#allocation41_spill] sm:$0xff] %v6149_v41  ;;  %v6152_v45 = vadd.f32 %v1859_v0, %v1835_v25  ;;  %v6154_v46 = vadd.f32 %v1860_v54, %v1836_v12  ;;  %v1908_v53 = vmul.f32 2.5, %v6149_v41  ;;  %v1915_v55 = vmul.f32 %v1907_v44, %v5911_v27 }
 0x2ea   : > { %v3944_v2 = vpop.eup %3943  ;;  %v2379_v30 = vmul.f32 1.25, %v6142_v20  ;;  %v2380_v29 = vmul.f32 1.25, %v6149_v41  ;;  %v2403_v42 = vmul.f32 1.25, %v6132_v35  ;;  %v2404_v58 = vmul.f32 1.25, %v6135_v10 }
 0x2eb   : > { %7057 = vst [vmem:[#allocation49_spill] sm:$0xff] %v6154_v46  ;;  %v3946_v13 = vpop.eup %3945  ;;  %v1369_v33 = vmul.f32 %v3944_v2, %v4932_v47  ;;  %v1916_v0 = vmul.f32 %v1908_v53, %v5915_v60  ;;  %v1923_v25 = vadd.f32 %v1915_v55, %v1891_v51  ;;  %v2371_v12 = vmul.f32 %v2363_v9, %v6152_v45 }
 0x2ec   : > { %v1370_v4 = vmul.f32 %v3946_v13, %v4948_v49  ;;  %v2372_v27 = vmul.f32 %v2364_v28, %v6154_v46  ;;  %v2419_v44 = vmul.f32 1.25, %v5918_v22  ;;  %v2420_v54 = vmul.f32 1.25, %v5921_v5  ;;  %v7090_v46 = vld [vmem:[#allocation86_spill] sm:$0xff] }
 0x2ed   : > { %v1924_v7 = vadd.f32 %v1916_v0, %v1892_v19  ;;  %v2387_v57 = vmul.f32 %v2379_v30, %v1923_v25  ;;  %v2411_v48 = vmul.f32 %v2403_v42, %v1923_v25  ;;  %v2723_v8 = vmul.f32 0.8333333, %v3620_v15  ;;  %v7059_v30 = vld [vmem:[#allocation55_spill] sm:$0xff]  ;;  %v7060_v15 = vld [vmem:[#allocation56_spill] sm:$0xff] }
 0x2ee   : > { %v1375_v41 = vpack.c.bf16 %v1370_v4, %v1369_v33  ;;  %v2427_v2 = vmul.f32 %v2419_v44, %v5946_v18  ;;  %v2428_v60 = vmul.f32 %v2420_v54, %v5948_v14  ;;  %v2724_v55 = vmul.f32 0.8333333, %v3621_v24  ;;  %v7066_v4 = vld [vmem:[#allocation51_spill] sm:$0xff] }
 0x2ef   : > { %v2388_v51 = vmul.f32 %v2380_v29, %v1924_v7  ;;  %v6171_v9 = vadd.f32 %v2387_v57, %v2371_v12  ;;  %v2412_v53 = vmul.f32 %v2404_v58, %v1924_v7  ;;  %v2739_v28 = vmul.f32 0.8333333, %v5918_v22  ;;  %v7062_v57 = vld [vmem:[#allocation45_spill] sm:$0xff]  ;;  %v7063_v22 = vld [vmem:[#allocation60_spill] sm:$0xff]  ;;  %v7065_v58 = vld [vmem:[#allocation46_spill] sm:$0xff] }
 0x2f0   : > { %3753 = vmatpush3.bf16.msra.mxu1 %v1375_v41  ;;  %v6174_v13 = vadd.f32 %v2427_v2, %v2411_v48  ;;  %v2740_v19 = vmul.f32 0.8333333, %v5921_v5  ;;  %v2839_v42 = vmul.f32 0.8333333, %v7059_v30  ;;  %v2840_v33 = vmul.f32 0.8333333, %v7060_v15 }
 0x2f1   : > { %7058 = vst [vmem:[#allocation50_spill] sm:$0xff] %v6171_v9  ;;  %v6179_v0 = vadd.f32 %v2388_v51, %v2372_v27  ;;  %v6181_v18 = vadd.f32 %v2428_v60, %v2412_v53  ;;  %v2731_v14 = vmul.f32 %v2723_v8, %v6171_v9  ;;  %v2855_v24 = vmul.f32 0.8333333, %v7062_v57  ;;  %v7064_v48 = vld [vmem:[#allocation62_spill] sm:$0xff]  ;;  %v7067_v8 = vld [vmem:[#allocation52_spill] sm:$0xff]  ;;  %v7089_v9 = vld [vmem:[#allocation85_spill] sm:$0xff] }
 0x2f2   : > { %v2747_v7 = vmul.f32 %v2739_v28, %v6174_v13  ;;  %v2847_v41 = vmul.f32 %v2839_v42, %v7063_v22  ;;  %v2848_v29 = vmul.f32 %v2840_v33, %v7064_v48  ;;  %v2856_v5 = vmul.f32 0.8333333, %v7065_v58  ;;  %v7072_v30 = vld [vmem:[#allocation80_spill] sm:$0xff] }
 0x2f3   : > { %7061 = vst [vmem:[#allocation43_spill] sm:$0xff] %v6179_v0  ;;  %v2732_v25 = vmul.f32 %v2724_v55, %v6179_v0  ;;  %v2748_v12 = vmul.f32 %v2740_v19, %v6181_v18  ;;  %v2863_v27 = vmul.f32 %v2855_v24, %v7066_v4  ;;  %vm1625_vm5 = vcmp.ge.f32.partialorder %v4932_v47, 1.8  ;;  %v7070_v55 = vld [vmem:[#allocation79_spill] sm:$0xff] }
 0x2f4   : > { %v2755_v44 = vadd.f32 %v2747_v7, %v2731_v14  ;;  %v2864_v54 = vmul.f32 %v2856_v5, %v7067_v8  ;;  %vm1626_vm6 = vcmp.ge.f32.partialorder %v4948_v49, 1.8  ;;  %v6196_v2 = vsel %vm1625_vm5, 1.0, %v6851_v6  ;;  %v7076_v7 = vld [vmem:[#allocation87_spill] sm:$0xff]  ;;  %v7079_v8 = vld [vmem:[#allocation81_spill] sm:$0xff] }
 0x2f5   : > { %7068 = vst [vmem:[#allocation42_spill] sm:$0xff] %v6196_v2  ;;  %v2756_v60 = vadd.f32 %v2748_v12, %v2732_v25  ;;  %v2871_v51 = vadd.f32 %v2863_v27, %v2847_v41  ;;  %v6199_v53 = vsel %vm1626_vm6, 1.0, %v6851_v6  ;;  %v6203_v28 = vsub.f32 %v7070_v55, %v6196_v2  ;;  %v7077_v12 = vld [vmem:[#allocation88_spill] sm:$0xff]  ;;  %v7078_v27 = vld [vmem:[#allocation89_spill] sm:$0xff]  ;;  %v7081_v41 = vld [vmem:[#allocation83_spill] sm:$0xff] }
 0x2f6   : > { %7069 = vst [vmem:[#allocation44_spill] sm:$0xff] %v6199_v53  ;;  %v2872_v19 = vadd.f32 %v2864_v54, %v2848_v29  ;;  %v6207_v42 = vsub.f32 %v7072_v30, %v6199_v53  ;;  %v6210_v15 = vadd.f32 -1.0, %v4932_v47  ;;  %v6213_v33 = vadd.f32 -1.0, %v4948_v49  ;;  %v7083_v53 = vld [vmem:[#allocation90_spill] sm:$0xff] }
 0x2f7   : > { %7071 = vst [vmem:[#allocation53_spill] sm:$0xff] %v6203_v28  ;;  %v3008_v14 = vpack.c.bf16 %v2756_v60, %v2755_v44  ;;  %v2233_v57 = vsub.f32 1.8, %v4932_v47  ;;  %v2234_v24 = vsub.f32 1.8, %v4948_v49  ;;  %v2601_v22 = vmul.f32 1.25, %v7076_v7 }
 0x2f8   : > { %7073 = vst [vmem:[#allocation54_spill] sm:$0xff] %v6207_v42  ;;  %7074 = vst [vmem:[#allocation55_spill] sm:$0xff] %v6210_v15  ;;  %v3030_v48 = vpack.c.bf16 %v2872_v19, %v2871_v51  ;;  %v2217_v29 = vmul.f32 2.5, %v6210_v15  ;;  %v2218_v58 = vmul.f32 2.5, %v6213_v33  ;;  %v2602_v4 = vmul.f32 1.25, %v7077_v12  ;;  %v7080_v60 = vld [vmem:[#allocation82_spill] sm:$0xff] }
 0x2f9   : > { %7075 = vst [vmem:[#allocation56_spill] sm:$0xff] %v6213_v33  ;;  %3754 = vmatprep.subr.bf16.mxu1 %v3008_v14  ;;  %v2241_v5 = vmul.f32 2.5, %v2233_v57  ;;  %v2242_v25 = vmul.f32 2.5, %v2234_v24  ;;  %v2609_v44 = vmul.f32 %v2601_v22, %v7078_v27  ;;  %v2617_v30 = vmul.f32 1.25, %v2233_v57  ;;  %v7082_v14 = vld [vmem:[#allocation84_spill] sm:$0xff]  ;;  %v7084_v22 = vld [vmem:[#allocation95_spill] sm:$0xff] }
 0x2fa   : > { %3787 = vmatpush3.bf16.msra.mxu0 %v3030_v48  ;;  %v2225_v54 = vmul.f32 %v2217_v29, %v7079_v8  ;;  %v2226_v55 = vmul.f32 %v2218_v58, %v7080_v60  ;;  %v2618_v7 = vmul.f32 1.25, %v2234_v24  ;;  %v2921_v33 = vmul.f32 0.8333333, %v7081_v41  ;;  %v7085_v58 = vld [vmem:[#allocation93_spill] sm:$0xff]  ;;  %v7086_v60 = vld [vmem:[#allocation94_spill] sm:$0xff] }
 0x2fb   : > { %v2249_v51 = vmul.f32 %v2241_v5, %v6203_v28  ;;  %v2250_v19 = vmul.f32 %v2242_v25, %v6207_v42  ;;  %v2922_v15 = vmul.f32 0.8333333, %v7082_v14  ;;  %v2610_v2 = vmul.f32 %v2602_v4, %v7083_v53  ;;  %v7087_v28 = vld [vmem:[#allocation96_spill] sm:$0xff]  ;;  %v7088_v42 = vld [vmem:[#allocation102_spill] sm:$0xff] }
 0x2fc   : > { %v2937_v12 = vmul.f32 0.8333333, %v2233_v57  ;;  %v2938_v0 = vmul.f32 0.8333333, %v2234_v24  ;;  %v2841_v48 = vmul.f32 0.8333333, %v7084_v22  ;;  %v2929_v8 = vmul.f32 %v2921_v33, %v7085_v58 }
 0x2fd   : > { %v6232_v27 = vadd.f32 %v2249_v51, %v2225_v54  ;;  %v6234_v29 = vadd.f32 %v2250_v19, %v2226_v55  ;;  %v2930_v5 = vmul.f32 %v2922_v15, %v7086_v60  ;;  %v2842_v25 = vmul.f32 0.8333333, %v7087_v28  ;;  %v7091_v55 = vld [vmem:[#allocation104_spill] sm:$0xff]  ;;  %v7092_v51 = vld [vmem:[#allocation91_spill] sm:$0xff] }
 0x2fe   : > { %v2849_v41 = vmul.f32 %v2841_v48, %v7088_v42  ;;  %v2857_v14 = vmul.f32 0.8333333, %v7089_v9  ;;  %v2858_v53 = vmul.f32 0.8333333, %v7090_v46  ;;  %v1331_v4 = vsub.f32 0.0, %v4963_v11  ;;  %v7093_v19 = vld [vmem:[#allocation92_spill] sm:$0xff] }
 0x2ff   : > { %v2625_v57 = vmul.f32 %v2617_v30, %v6232_v27  ;;  %v2626_v24 = vmul.f32 %v2618_v7, %v6234_v29  ;;  %v1332_v54 = vsub.f32 0.0, %v5127_v52  ;;  %v2850_v33 = vmul.f32 %v2842_v25, %v7091_v55 }
 0x300   : > { %v2865_v15 = vmul.f32 %v2857_v14, %v7092_v51  ;;  %v2866_v28 = vmul.f32 %v2858_v53, %v7093_v19  ;;  %vm1627_vm7 = vcmp.ge.f32.partialorder %v4963_v11, 1.8  ;;  %v1345_v46 = vmul.f32 1.442695, %v1331_v4  ;;  %v7105_v19 = vld [vmem:[#allocation124_spill] sm:$0xff] }
 0x301   : > { %v6250_v42 = vadd.f32 %v2625_v57, %v2609_v44  ;;  %v6252_v9 = vadd.f32 %v2626_v24, %v2610_v2  ;;  %v1347_v30 = vmul.f32 1.442695, %v1332_v54  ;;  %vm1628_vm8 = vcmp.ge.f32.partialorder %v5127_v52, 1.8 }
 0x302   : > { %v2873_v22 = vadd.f32 %v2865_v15, %v2849_v41  ;;  %v2874_v7 = vadd.f32 %v2866_v28, %v2850_v33  ;;  %v6256_v48 = vsel %vm1627_vm7, 1.0, %v6851_v6  ;;  %3947 = vpow2.f32 %v1345_v46  ;;  %v7098_v41 = vld [vmem:[#allocation117_spill] sm:$0xff]  ;;  %v7104_v33 = vld [vmem:[#allocation123_spill] sm:$0xff] }
 0x303   : > { %7094 = vst [vmem:[#allocation45_spill] sm:$0xff] %v6250_v42  ;;  %7095 = vst [vmem:[#allocation60_spill] sm:$0xff] %v6252_v9  ;;  %v2945_v58 = vmul.f32 %v2937_v12, %v6250_v42  ;;  %v2946_v60 = vmul.f32 %v2938_v0, %v6252_v9  ;;  %v6261_v25 = vsel %vm1628_vm8, 1.0, %v6851_v6  ;;  %3949 = vpow2.f32 %v1347_v30  ;;  %v7102_v12 = vld [vmem:[#allocation118_spill] sm:$0xff] }
 0x304   : > { %7096 = vst [vmem:[#allocation62_spill] sm:$0xff] %v6256_v48  ;;  %7097 = vst [vmem:[#allocation46_spill] sm:$0xff] %v6261_v25  ;;  %v3031_v44 = vpack.c.bf16 %v2874_v7, %v2873_v22  ;;  %v6267_v14 = vsub.f32 %v7098_v41, %v6256_v48  ;;  %v6270_v24 = vadd.f32 -1.0, %v4963_v11  ;;  %v6273_v0 = vadd.f32 -1.0, %v5127_v52 }
 0x305   : > { %v2953_v53 = vadd.f32 %v2945_v58, %v2929_v8  ;;  %v2954_v57 = vadd.f32 %v2946_v60, %v2930_v5  ;;  %v6277_v4 = vsub.f32 %v7102_v12, %v6261_v25  ;;  %v2235_v54 = vsub.f32 1.8, %v4963_v11  ;;  %v7106_v60 = vld [vmem:[#allocation119_spill] sm:$0xff] }
 0x306   : > { %7099 = vst [vmem:[#allocation51_spill] sm:$0xff] %v6267_v14  ;;  %7100 = vst [vmem:[#allocation52_spill] sm:$0xff] %v6270_v24  ;;  %v2236_v55 = vsub.f32 1.8, %v5127_v52  ;;  %v2603_v51 = vmul.f32 1.25, %v7104_v33  ;;  %v2219_v8 = vmul.f32 2.5, %v6270_v24 }
 0x307   : > { %7101 = vst [vmem:[#allocation79_spill] sm:$0xff] %v6273_v0  ;;  %7103 = vst [vmem:[#allocation80_spill] sm:$0xff] %v6277_v4  ;;  %v3047_v15 = vpack.c.bf16 %v2954_v57, %v2953_v53  ;;  %v2220_v5 = vmul.f32 2.5, %v6273_v0  ;;  %v2604_v28 = vmul.f32 1.25, %v7105_v19  ;;  %v2243_v46 = vmul.f32 2.5, %v2235_v54  ;;  %v7107_v33 = vld [vmem:[#allocation120_spill] sm:$0xff] }
 0x308   : > { %v2244_v30 = vmul.f32 2.5, %v2236_v55  ;;  %v2611_v22 = vmul.f32 %v2603_v51, %v5881_v39  ;;  %v2923_v7 = vmul.f32 0.8333333, %v5840_v40  ;;  %v2227_v58 = vmul.f32 %v2219_v8, %v5826_v17  ;;  %v7108_v24 = vld [vmem:[#allocation127_spill] sm:$0xff] }
 0x309   : > { %3788 = vmatprep.subr.bf16.mxu0 %v3047_v15  ;;  %v2228_v41 = vmul.f32 %v2220_v5, %v7106_v60  ;;  %v2612_v12 = vmul.f32 %v2604_v28, %v5883_v38  ;;  %v2619_v53 = vmul.f32 1.25, %v2235_v54  ;;  %v2251_v57 = vmul.f32 %v2243_v46, %v6267_v14  ;;  %v7109_v15 = vld [vmem:[#allocation30_spill] sm:$0xff]  ;;  %v7112_v38 = vld [vmem:[#allocation128_spill] sm:$0xff] }
 0x30a   : > { %3789 = vmatpush3.bf16.msra.mxu0 %v3031_v44  ;;  %v2252_v2 = vmul.f32 %v2244_v30, %v6277_v4  ;;  %v2620_v19 = vmul.f32 1.25, %v2236_v55  ;;  %v2924_v0 = vmul.f32 0.8333333, %v7107_v33  ;;  %v2931_v39 = vmul.f32 %v2923_v7, %v7108_v24  ;;  %v7113_v44 = vld [vmem:[#allocation31_spill] sm:$0xff]  ;;  %v7114_v60 = vld [vmem:[#allocation32_spill] sm:$0xff]  ;;  %v7115_v4 = vld [vmem:[#allocation22_spill] sm:$0xff] }
 0x30b   : > { %v2939_v51 = vmul.f32 0.8333333, %v2235_v54  ;;  %v2940_v40 = vmul.f32 0.8333333, %v2236_v55  ;;  %v2757_v25 = vmul.f32 0.8333333, %v7109_v15  ;;  %v6295_v17 = vadd.f32 %v2251_v57, %v2227_v58 }
 0x30c   : > { %v6297_v8 = vadd.f32 %v2252_v2, %v2228_v41  ;;  %v2932_v5 = vmul.f32 %v2924_v0, %v7112_v38  ;;  %v2758_v28 = vmul.f32 0.8333333, %v7113_v44  ;;  %v3948_v46 = vpop.eup %3947  ;;  %v2773_v14 = vmul.f32 0.8333333, %v7115_v4  ;;  %v7116_v33 = vld [vmem:[#allocation27_spill] sm:$0xff]  ;;  %v7117_v24 = vld [vmem:[#allocation129_spill] sm:$0xff] }
 0x30d   : > { %7110 = vst [vmem:[#allocation89_spill] sm:$0xff] %v6295_v17  ;;  %v2765_v30 = vmul.f32 %v2757_v25, %v7114_v60  ;;  %v2774_v48 = vmul.f32 0.8333333, %v7116_v33  ;;  %v2843_v54 = vmul.f32 0.8333333, %v7117_v24  ;;  %v3950_v55 = vpop.eup %3949  ;;  %v1355_v7 = vadd.f32 1.0, %v3948_v46 }
 0x30e   : > { %7111 = vst [vmem:[#allocation81_spill] sm:$0xff] %v6297_v8  ;;  %v2627_v58 = vmul.f32 %v2619_v53, %v6295_v17  ;;  %v2628_v2 = vmul.f32 %v2620_v19, %v6297_v8  ;;  %v7118_v41 = vld [vmem:[#allocation34_spill] sm:$0xff]  ;;  %v1356_v0 = vadd.f32 1.0, %v3950_v55  ;;  %v7119_v15 = vld [vmem:[#allocation28_spill] sm:$0xff]  ;;  %v7124_v24 = vld [vmem:[#allocation121_spill] sm:$0xff]  ;;  %vm3159_vm1 = vcmask 523264  }
 0x30f   : > { %v2766_v57 = vmul.f32 %v2758_v28, %v7118_v41  ;;  %v2781_v38 = vmul.f32 %v2773_v14, %v7119_v15  ;;  %v7120_v44 = vld [vmem:[#allocation36_spill] sm:$0xff]  ;;  %v7121_v25 = vld [vmem:[#allocation130_spill] sm:$0xff]  ;;  %3951 = vrcp.f32 %v1355_v7  ;;  %v2851_v46 = vmul.f32 %v2843_v54, %v5972_v26  ;;  %v7147_v17 = vld [vmem:[#allocation57_spill] sm:$0xff] }
 0x310   : > { %v2782_v9 = vmul.f32 %v2774_v48, %v7120_v44  ;;  %v2844_v60 = vmul.f32 0.8333333, %v7121_v25  ;;  %v6311_v4 = vadd.f32 %v2627_v58, %v2611_v22  ;;  %v6313_v33 = vadd.f32 %v2628_v2, %v2612_v12  ;;  %v7125_v7 = vld [vmem:[#allocation122_spill] sm:$0xff] }
 0x311   : > { %3953 = vrcp.f32 %v1356_v0  ;;  %v6316_v53 = vadd.f32 %v2781_v38, %v2765_v30  ;;  %v2859_v55 = vmul.f32 0.8333333, %v7124_v24  ;;  %v2860_v22 = vmul.f32 0.8333333, %v7125_v7  ;;  %v7128_v24 = vld [vmem:[#allocation65_spill] sm:$0xff]  ;;  %v7129_v7 = vld [vmem:[#allocation18_spill] sm:$0xff] }
 0x312   : > { %7122 = vst [vmem:[#allocation82_spill] sm:$0xff] %v6311_v4  ;;  %7123 = vst [vmem:[#allocation83_spill] sm:$0xff] %v6313_v33  ;;  %v6318_v19 = vadd.f32 %v2782_v9, %v2766_v57  ;;  %v2852_v28 = vmul.f32 %v2844_v60, %v5983_v50  ;;  %v2947_v14 = vmul.f32 %v2939_v51, %v6311_v4  ;;  %v3606_v26 = vadd.f32 2.2, %v4907_v31  ;;  %v7126_v50 = vld [vmem:[#allocation125_spill] sm:$0xff]  ;;  %v7127_v51 = vld [vmem:[#allocation126_spill] sm:$0xff] }
 0x313   : > { %v2948_v48 = vmul.f32 %v2940_v40, %v6313_v33  ;;  %v3607_v30 = vadd.f32 2.2, %v4911_v3  ;;  %v1781_v9 = vsub.f32 -1.4, %v4907_v31  ;;  %v2867_v2 = vmul.f32 %v2859_v55, %v7126_v50  ;;  %v7131_v4 = vld [vmem:[#allocation66_spill] sm:$0xff]  ;;  %v7134_v55 = vld [vmem:[#allocation9_spill] sm:$0xff] }
 0x314   : > { %v2955_v54 = vadd.f32 %v2947_v14, %v2931_v39  ;;  %v2868_v41 = vmul.f32 %v2860_v22, %v7127_v51  ;;  %v1765_v40 = vmul.f32 2.5, %v3606_v26  ;;  %v1782_v0 = vsub.f32 -1.4, %v4911_v3  ;;  %v7132_v39 = vld [vmem:[#allocation8_spill] sm:$0xff] }
 0x315   : > { %v2956_v58 = vadd.f32 %v2948_v48, %v2932_v5  ;;  %v1766_v57 = vmul.f32 2.5, %v3607_v30  ;;  %v1789_v15 = vmul.f32 2.5, %v1781_v9  ;;  %v2875_v44 = vadd.f32 %v2867_v2, %v2851_v46 }
 0x316   : > { %v2876_v25 = vadd.f32 %v2868_v41, %v2852_v28  ;;  %v2317_v60 = vmul.f32 1.25, %v3606_v26  ;;  %v7130_v12 = vsub.f32 %v7128_v24, %v7129_v7  ;;  %v7133_v5 = vsub.f32 %v7131_v4, %v7132_v39  ;;  %v3896_v4 = vld [vmem:[%s6608_s2 + $0x8] ss:$20 sps:$4 sm:$0xff]  }
 0x317   : > { %v3048_v38 = vpack.c.bf16 %v2956_v58, %v2955_v54  ;;  %v1790_v48 = vmul.f32 2.5, %v1782_v0  ;;  %v1797_v22 = vmul.f32 %v1789_v15, %v7134_v55  ;;  %v2318_v51 = vmul.f32 1.25, %v3607_v30  ;;  %v7137_v58 = vld [vmem:[#allocation29_spill] sm:$0xff]  ;;  %v7138_v0 = vld [vmem:[#allocation14_spill] sm:$0xff]  ;;  %v7141_v7 = vld [vmem:[#allocation11_spill] sm:$0xff] }
 0x318   : > { %v1773_v33 = vmul.f32 %v1765_v40, %v7130_v12  ;;  %v1774_v14 = vmul.f32 %v1766_v57, %v7133_v5  ;;  %v3032_v50 = vpack.c.bf16 %v2876_v25, %v2875_v44  ;;  %v7135_v9 = vsub.f32 -1.0, %v4907_v31  ;;  %v7140_v25 = vld [vmem:[#allocation10_spill] sm:$0xff]  ;;  %v7142_v55 = vld [vmem:[#allocation69_spill] sm:$0xff] }
 0x319   : > { %3790 = vmatprep.subr.bf16.mxu0 %v3048_v38  ;;  %v7136_v46 = vsub.f32 -1.0, %v4911_v3  ;;  %v1798_v2 = vmul.f32 %v1790_v48, %v7137_v58  ;;  %v2677_v12 = vmul.f32 0.8333333, %v3606_v26  ;;  %v2678_v40 = vmul.f32 0.8333333, %v3607_v30  ;;  %v3952_v57 = vpop.eup %3951  ;;  %v7139_v38 = vld [vmem:[#allocation15_spill] sm:$0xff] }
 0x31a   : > { %v2333_v54 = vmul.f32 1.25, %v7135_v9  ;;  %v1805_v41 = vadd.f32 %v1797_v22, %v1773_v33  ;;  %3791 = vmatpush3.bf16.msra.mxu0 %v3032_v50  ;;  %v2693_v24 = vmul.f32 0.8333333, %v7140_v25  ;;  %v2694_v39 = vmul.f32 0.8333333, %v7141_v7  ;;  %v7143_v9 = vld [vmem:[#allocation25_spill] sm:$0xff] }
 0x31b   : > { %v2334_v28 = vmul.f32 1.25, %v7136_v46  ;;  %v3901_v33 = vld [vmem:[%s6608_s2 + $0x34] ss:$20 sps:$4 sm:$0xff]   ;;  %v3954_v26 = vpop.eup %3953  ;;  %v1371_v30 = vmul.f32 %v3952_v57, %v4963_v11  ;;  %v1806_v5 = vadd.f32 %v1798_v2, %v1774_v14  ;;  %v2759_v22 = vmul.f32 0.8333333, %v7142_v55 }
 0x31c   : > { %v2341_v15 = vmul.f32 %v2333_v54, %v7138_v0  ;;  %v2325_v48 = vmul.f32 %v2317_v60, %v1805_v41  ;;  %v1372_v50 = vmul.f32 %v3954_v26, %v5127_v52  ;;  %v2701_v54 = vmul.f32 %v2693_v24, %v7143_v9  ;;  %v7144_v46 = vld [vmem:[#allocation26_spill] sm:$0xff]  ;;  %v7146_v7 = vld [vmem:[#allocation77_spill] sm:$0xff] }
 0x31d   : > { %v2342_v44 = vmul.f32 %v2334_v28, %v7139_v38  ;;  %v2702_v28 = vmul.f32 %v2694_v39, %v7144_v46  ;;  %v7145_v58 = vld [vmem:[#allocation70_spill] sm:$0xff]  ;;  %v2326_v38 = vmul.f32 %v2318_v51, %v1806_v5  ;;  %v2767_v8 = vmul.f32 %v2759_v22, %v7146_v7  ;;  %3248 = vmatmul.mubr.bf16.vlgmr.msra.gmra.mrb[16].mxu0 %v3896_v4  ;;  %v7150_v39 = vld [vmem:[#allocation59_spill] sm:$0xff] }
 0x31e   : > { %v2760_v0 = vmul.f32 0.8333333, %v7145_v58  ;;  %v2349_v25 = vadd.f32 %v2341_v15, %v2325_v48  ;;  %v2775_v42 = vmul.f32 0.8333333, %v7147_v17  ;;  %v1376_v57 = vpack.c.bf16 %v1372_v50, %v1371_v30  ;;  %v7148_v14 = vld [vmem:[#allocation78_spill] sm:$0xff]  ;;  %3255 = vmatprep.mubr.bf16.mxu0 %v3901_v33  ;;  %v7151_v15 = vld [vmem:[#allocation61_spill] sm:$0xff] }
 0x31f   : > { %v7149_v2 = vld [vmem:[#allocation58_spill] sm:$0xff]  ;;  %v3608_v26 = vadd.f32 2.2, %v4905_v43  ;;  %v2350_v24 = vadd.f32 %v2342_v44, %v2326_v38  ;;  %v3609_v51 = vadd.f32 2.2, %v4909_v1  ;;  %v7152_v30 = vpack.c.bf16 %v6318_v19, %v6316_v53  ;;  %v7153_v46 = vld [vmem:[#allocation99_spill] sm:$0xff] }
 0x320   : > { %v2768_v60 = vmul.f32 %v2760_v0, %v7148_v14  ;;  %v2776_v41 = vmul.f32 0.8333333, %v7149_v2  ;;  %v2685_v55 = vmul.f32 %v2677_v12, %v2349_v25  ;;  %v2783_v9 = vmul.f32 %v2775_v42, %v7150_v39  ;;  %3755 = vmatpush3.bf16.msra.mxu1 %v1376_v57  ;;  %v3904_v42 = vld [vmem:[%s6608_s2 + $0x30] ss:$20 sps:$4 sm:$0xff]   ;;  %v7154_v58 = vld [vmem:[#allocation63_spill] sm:$0xff] }
 0x321   : > { %v1767_v48 = vmul.f32 2.5, %v3608_v26  ;;  %v1783_v17 = vsub.f32 -1.4, %v4905_v43  ;;  %v1784_v4 = vsub.f32 -1.4, %v4909_v1  ;;  %3756 = vmatprep.subr.bf16.mxu1 %v7152_v30  ;;  %v2686_v22 = vmul.f32 %v2678_v40, %v2350_v24  ;;  %v7156_v14 = vld [vmem:[#allocation100_spill] sm:$0xff] }
 0x322   : > { %v2784_v5 = vmul.f32 %v2776_v41, %v7151_v15  ;;  %v2709_v33 = vadd.f32 %v2701_v54, %v2685_v55  ;;  %v2791_v44 = vadd.f32 %v2783_v9, %v2767_v8  ;;  %v1768_v12 = vmul.f32 2.5, %v3609_v51  ;;  %v7157_v2 = vld [vmem:[#allocation64_spill] sm:$0xff]  ;;  %v7159_v41 = vld [vmem:[#allocation67_spill] sm:$0xff] }
 0x323   : > { %v7155_v0 = vsub.f32 %v7153_v46, %v7154_v58  ;;  %v1791_v25 = vmul.f32 2.5, %v1783_v17  ;;  %v1792_v7 = vmul.f32 2.5, %v1784_v4  ;;  %v2710_v57 = vadd.f32 %v2702_v28, %v2686_v22  ;;  %v7160_v55 = vld [vmem:[#allocation68_spill] sm:$0xff]  ;;  %v7163_v22 = vld [vmem:[#allocation73_spill] sm:$0xff]  ;;  %v7164_v46 = vld [vmem:[#allocation71_spill] sm:$0xff] }
 0x324   : > { %v2792_v50 = vadd.f32 %v2784_v5, %v2768_v60  ;;  %v7158_v53 = vsub.f32 %v7156_v14, %v7157_v2  ;;  %v2319_v40 = vmul.f32 1.25, %v3608_v26  ;;  %v2320_v54 = vmul.f32 1.25, %v3609_v51 }
 0x325   : > { %v1775_v38 = vmul.f32 %v1767_v48, %v7155_v0  ;;  %v1799_v24 = vmul.f32 %v1791_v25, %v7159_v41  ;;  %v1800_v39 = vmul.f32 %v1792_v7, %v7160_v55  ;;  %v7161_v60 = vsub.f32 -1.0, %v4905_v43  ;;  %3256 = vmatmul.mubr.bf16.gmra.mrb[20].mxu0 %v3904_v42  ;;  %v7166_v0 = vld [vmem:[#allocation72_spill] sm:$0xff]  ;;  %v7167_v7 = vld [vmem:[#allocation107_spill] sm:$0xff] }
 0x326   : > { %v1776_v19 = vmul.f32 %v1768_v12, %v7158_v53  ;;  %v3014_v8 = vpack.c.bf16 %v2792_v50, %v2791_v44  ;;  %v2997_v15 = vpack.c.bf16 %v2710_v57, %v2709_v33  ;;  %v7162_v5 = vsub.f32 -1.0, %v4909_v1  ;;  %v7165_v50 = vld [vmem:[#allocation74_spill] sm:$0xff]  ;;  %v7168_v33 = vld [vmem:[#allocation108_spill] sm:$0xff] }
 0x327   : > { %v2335_v9 = vmul.f32 1.25, %v7161_v60  ;;  %v2679_v17 = vmul.f32 0.8333333, %v3608_v26  ;;  %v2680_v28 = vmul.f32 0.8333333, %v3609_v51  ;;  %v1807_v4 = vadd.f32 %v1799_v24, %v1775_v38  ;;  %v7169_v51 = vld [vmem:[#allocation75_spill] sm:$0xff] }
 0x328   : > { %v2336_v48 = vmul.f32 1.25, %v7162_v5  ;;  %v1808_v30 = vadd.f32 %v1800_v39, %v1776_v19  ;;  %v2695_v44 = vmul.f32 0.8333333, %v7164_v46  ;;  %3757 = vmatpush3.bf16.msra.mxu1 %v2997_v15  ;;  %v2696_v25 = vmul.f32 0.8333333, %v7166_v0  ;;  %v7170_v38 = vld [vmem:[#allocation97_spill] sm:$0xff] }
 0x329   : > { %v2343_v12 = vmul.f32 %v2335_v9, %v7163_v22  ;;  %v2761_v14 = vmul.f32 0.8333333, %v7167_v7  ;;  %v2762_v57 = vmul.f32 0.8333333, %v7168_v33  ;;  %3758 = vmatprep.subr.bf16.mxu1 %v3014_v8  ;;  %v2327_v2 = vmul.f32 %v2319_v40, %v1807_v4  ;;  %v7171_v19 = vld [vmem:[#allocation76_spill] sm:$0xff]  ;;  %v7172_v24 = vld [vmem:[#allocation115_spill] sm:$0xff] }
 0x32a   : > { %v2344_v58 = vmul.f32 %v2336_v48, %v7165_v50  ;;  %v2328_v26 = vmul.f32 %v2320_v54, %v1808_v30  ;;  %v2703_v42 = vmul.f32 %v2695_v44, %v7169_v51  ;;  %v2777_v53 = vmul.f32 0.8333333, %v7170_v38  ;;  %v7173_v39 = vld [vmem:[#allocation116_spill] sm:$0xff]  ;;  %v7174_v9 = vld [vmem:[#allocation98_spill] sm:$0xff]  ;;  %v7175_v22 = vld [vmem:[#allocation101_spill] sm:$0xff] }
 0x32b   : > { %v2704_v41 = vmul.f32 %v2696_v25, %v7171_v19  ;;  %v2769_v55 = vmul.f32 %v2761_v14, %v7172_v24  ;;  %v2770_v60 = vmul.f32 %v2762_v57, %v7173_v39  ;;  %v2778_v15 = vmul.f32 0.8333333, %v7174_v9  ;;  %v7176_v40 = vld [vmem:[#allocation103_spill] sm:$0xff] }
 0x32c   : > { %v2351_v5 = vadd.f32 %v2343_v12, %v2327_v2  ;;  %v2352_v48 = vadd.f32 %v2344_v58, %v2328_v26  ;;  %v2785_v46 = vmul.f32 %v2777_v53, %v7175_v22  ;;  %v3610_v8 = vadd.f32 2.2, %v4932_v47 }
 0x32d   : > { %v2786_v54 = vmul.f32 %v2778_v15, %v7176_v40  ;;  %v3611_v4 = vadd.f32 2.2, %v4948_v49  ;;  %v1785_v30 = vsub.f32 -1.4, %v4932_v47  ;;  %v1786_v44 = vsub.f32 -1.4, %v4948_v49 }
 0x32e   : > { %v2687_v50 = vmul.f32 %v2679_v17, %v2351_v5  ;;  %v2688_v0 = vmul.f32 %v2680_v28, %v2352_v48  ;;  %v2793_v25 = vadd.f32 %v2785_v46, %v2769_v55  ;;  %v1769_v7 = vmul.f32 2.5, %v3610_v8  ;;  %v7179_v17 = vld [vmem:[#allocation105_spill] sm:$0xff]  ;;  %v7180_v55 = vld [vmem:[#allocation106_spill] sm:$0xff]  ;;  %v7183_v46 = vld [vmem:[#allocation111_spill] sm:$0xff] }
 0x32f   : > { %v2794_v14 = vadd.f32 %v2786_v54, %v2770_v60  ;;  %v1770_v33 = vmul.f32 2.5, %v3611_v4  ;;  %v1793_v12 = vmul.f32 2.5, %v1785_v30  ;;  %v1794_v58 = vmul.f32 2.5, %v1786_v44  ;;  %v7185_v54 = vld [vmem:[#allocation109_spill] sm:$0xff]  ;;  %v7186_v44 = vld [vmem:[#allocation110_spill] sm:$0xff] }
 0x330   : > { %v2711_v57 = vadd.f32 %v2703_v42, %v2687_v50  ;;  %v2712_v2 = vadd.f32 %v2704_v41, %v2688_v0  ;;  %v7177_v26 = vsub.f32 %v5706_v56, %v5695_v62  ;;  %v2321_v38 = vmul.f32 1.25, %v3610_v8 }
 0x331   : > { %v3015_v53 = vpack.c.bf16 %v2794_v14, %v2793_v25  ;;  %v7178_v19 = vsub.f32 %v5778_v36, %v5699_v16  ;;  %v1801_v28 = vmul.f32 %v1793_v12, %v7179_v17  ;;  %v1802_v39 = vmul.f32 %v1794_v58, %v7180_v55  ;;  %v7184_v36 = vld [vmem:[#allocation112_spill] sm:$0xff]  ;;  %v7189_v58 = vld [vmem:[#allocation131_spill] sm:$0xff] }
 0x332   : > { %v1777_v51 = vmul.f32 %v1769_v7, %v7177_v26  ;;  %v2998_v60 = vpack.c.bf16 %v2712_v2, %v2711_v57  ;;  %v2322_v9 = vmul.f32 1.25, %v3611_v4  ;;  %v7181_v15 = vsub.f32 -1.0, %v4932_v47  ;;  %v7190_v2 = vld [vmem:[#allocation132_spill] sm:$0xff] }
 0x333   : > { %v1778_v24 = vmul.f32 %v1770_v33, %v7178_v19  ;;  %v7182_v41 = vsub.f32 -1.0, %v4948_v49  ;;  %v2681_v48 = vmul.f32 0.8333333, %v3610_v8  ;;  %v2682_v22 = vmul.f32 0.8333333, %v3611_v4  ;;  %v7187_v33 = vld [vmem:[#allocation113_spill] sm:$0xff] }
 0x334   : > { %v2337_v42 = vmul.f32 1.25, %v7181_v15  ;;  %v1809_v62 = vadd.f32 %v1801_v28, %v1777_v51  ;;  %3759 = vmatpush3.bf16.msra.mxu1 %v2998_v60  ;;  %v2697_v30 = vmul.f32 0.8333333, %v7185_v54  ;;  %v2698_v50 = vmul.f32 0.8333333, %v7186_v44  ;;  %v7188_v8 = vld [vmem:[#allocation114_spill] sm:$0xff] }
 0x335   : > { %v2338_v5 = vmul.f32 1.25, %v7182_v41  ;;  %v1810_v56 = vadd.f32 %v1802_v39, %v1778_v24  ;;  %3760 = vmatprep.subr.bf16.mxu1 %v3015_v53  ;;  %v2763_v7 = vmul.f32 0.8333333, %v6132_v35  ;;  %v2764_v14 = vmul.f32 0.8333333, %v6135_v10 }
 0x336   : > { %v2345_v16 = vmul.f32 %v2337_v42, %v7183_v46  ;;  %v2329_v0 = vmul.f32 %v2321_v38, %v1809_v62  ;;  %v2705_v12 = vmul.f32 %v2697_v30, %v7187_v33  ;;  %v2706_v4 = vmul.f32 %v2698_v50, %v7188_v8 }
 0x337   : > { %v2346_v40 = vmul.f32 %v2338_v5, %v7184_v36  ;;  %v2330_v25 = vmul.f32 %v2322_v9, %v1810_v56  ;;  %v2779_v57 = vmul.f32 0.8333333, %v7189_v58  ;;  %v2780_v26 = vmul.f32 0.8333333, %v7190_v2 }
 0x338   : > { %v2353_v51 = vadd.f32 %v2345_v16, %v2329_v0  ;;  %v2771_v24 = vmul.f32 %v2763_v7, %v6174_v13  ;;  %v2772_v53 = vmul.f32 %v2764_v14, %v6181_v18  ;;  %v3612_v10 = vadd.f32 2.2, %v4963_v11 }
 0x339   : > { %v2354_v19 = vadd.f32 %v2346_v40, %v2330_v25  ;;  %v2787_v38 = vmul.f32 %v2779_v57, %v5970_v59  ;;  %v2788_v35 = vmul.f32 %v2780_v26, %v5981_v63  ;;  %v3613_v17 = vadd.f32 2.2, %v5127_v52  ;;  %v7198_v57 = vld [vmem:[#allocation43_spill] sm:$0xff] }
 0x33a   : > { %v2689_v28 = vmul.f32 %v2681_v48, %v2353_v51  ;;  %v1787_v39 = vsub.f32 -1.4, %v4963_v11  ;;  %v1788_v60 = vsub.f32 -1.4, %v5127_v52  ;;  %v1771_v42 = vmul.f32 2.5, %v3612_v10 }
 0x33b   : > { %v2690_v55 = vmul.f32 %v2682_v22, %v2354_v19  ;;  %v2795_v9 = vadd.f32 %v2787_v38, %v2771_v24  ;;  %v2796_v15 = vadd.f32 %v2788_v35, %v2772_v53  ;;  %v1772_v13 = vmul.f32 2.5, %v3613_v17  ;;  %v7199_v53 = vld [vmem:[#allocation133_spill] sm:$0xff]  ;;  %v7200_v35 = vld [vmem:[#allocation134_spill] sm:$0xff] }
 0x33c   : > { %v2713_v41 = vadd.f32 %v2705_v12, %v2689_v28  ;;  %v1795_v5 = vmul.f32 2.5, %v1787_v39  ;;  %v1796_v59 = vmul.f32 2.5, %v1788_v60  ;;  %v7191_v63 = vsub.f32 %v6096_v21, %v6099_v37 }
 0x33d   : > { %v2714_v18 = vadd.f32 %v2706_v4, %v2690_v55  ;;  %v3016_v62 = vpack.c.bf16 %v2796_v15, %v2795_v9  ;;  %v7192_v48 = vsub.f32 %v6114_v23, %v6102_v61  ;;  %v2323_v46 = vmul.f32 1.25, %v3612_v10  ;;  %v7195_v23 = vld [vmem:[#allocation41_spill] sm:$0xff]  ;;  %v7197_v4 = vld [vmem:[#allocation50_spill] sm:$0xff] }
 0x33e   : > { %v1779_v56 = vmul.f32 %v1771_v42, %v7191_v63  ;;  %v1803_v36 = vmul.f32 %v1795_v5, %v6118_v34  ;;  %v1804_v40 = vmul.f32 %v1796_v59, %v6123_v32  ;;  %v2324_v54 = vmul.f32 1.25, %v3613_v17  ;;  %v7196_v32 = vld [vmem:[#allocation49_spill] sm:$0xff]  ;;  %v7204_v59 = vld [vmem:[#allocation136_spill] sm:$0xff] }
 0x33f   : > { %v1780_v22 = vmul.f32 %v1772_v13, %v7192_v48  ;;  %v2999_v16 = vpack.c.bf16 %v2714_v18, %v2713_v41  ;;  %v7193_v30 = vsub.f32 -1.0, %v4963_v11  ;;  %v7194_v50 = vsub.f32 -1.0, %v5127_v52  ;;  %v7201_v15 = vld [vmem:[#allocation137_spill] sm:$0xff]  ;;  %v7202_v13 = vld [vmem:[#allocation138_spill] sm:$0xff]  ;;  %v7203_v18 = vld [vmem:[#allocation135_spill] sm:$0xff] }
 0x340   : > { %v2683_v25 = vmul.f32 0.8333333, %v3612_v10  ;;  %v2684_v21 = vmul.f32 0.8333333, %v3613_v17  ;;  %v1811_v37 = vadd.f32 %v1803_v36, %v1779_v56  ;;  %v2699_v61 = vmul.f32 0.8333333, %v6142_v20 }
 0x341   : > { %v2339_v44 = vmul.f32 1.25, %v7193_v30  ;;  %v2340_v0 = vmul.f32 1.25, %v7194_v50  ;;  %3761 = vmatpush3.bf16.msra.mxu1 %v2999_v16  ;;  %v1812_v7 = vadd.f32 %v1804_v40, %v1780_v22  ;;  %v2700_v14 = vmul.f32 0.8333333, %v7195_v23  ;;  %v7206_v36 = vld [vmem:[#allocation35_spill] sm:$0xff]  ;;  %v7207_v50 = vld [vmem:[#allocation20_spill] sm:$0xff] }
 0x342   : > { %3762 = vmatprep.subr.bf16.mxu1 %v3016_v62  ;;  %vm1645_vm9 = vcmp.ge.f32.partialorder %v4907_v31, 2.2  ;;  %vm1646_vm10 = vcmp.ge.f32.partialorder %v4911_v3, 2.2  ;;  %v2331_v12 = vmul.f32 %v2323_v46, %v1811_v37  ;;  %v2707_v58 = vmul.f32 %v2699_v61, %v7197_v4  ;;  %v7205_v46 = vld [vmem:[#allocation139_spill] sm:$0xff] }
 0x343   : > { %v2347_v34 = vmul.f32 %v2339_v44, %v6152_v45  ;;  %v2348_v33 = vmul.f32 %v2340_v0, %v7196_v32  ;;  %v2332_v8 = vmul.f32 %v2324_v54, %v1812_v7  ;;  %v2708_v2 = vmul.f32 %v2700_v14, %v7198_v57  ;;  %v3893_v14 = vld [vmem:[%s6608_s2] ss:$20 sps:$4 sm:$0xff]  }
 0x344   : > { %v3598_v26 = vsel %vm1645_vm9, 1.0, %v6851_v6  ;;  %v3599_v20 = vsel %vm1646_vm10, 1.0, %v6851_v6  ;;  %v3678_v51 = vadd.f32 -1.4, %v4907_v31  ;;  %v3679_v45 = vadd.f32 -1.4, %v4911_v3 }
 0x345   : > { %v2355_v19 = vadd.f32 %v2347_v34, %v2331_v12  ;;  %v2356_v24 = vadd.f32 %v2348_v33, %v2332_v8  ;;  %v1749_v38 = vsub.f32 %v7199_v53, %v3598_v26  ;;  %v1750_v10 = vsub.f32 %v7200_v35, %v3599_v20  ;;  %v7209_v34 = vld [vmem:[#allocation16_spill] sm:$0xff]  ;;  %v7210_v33 = vld [vmem:[#allocation21_spill] sm:$0xff] }
 0x346   : > { %v2269_v17 = vmul.f32 2.5, %v3678_v51  ;;  %v2270_v28 = vmul.f32 2.5, %v3679_v45  ;;  %v2285_v55 = vsub.f32 2.2, %v4907_v31  ;;  %v2286_v39 = vsub.f32 2.2, %v4911_v3 }
 0x347   : > { %v2691_v60 = vmul.f32 %v2683_v25, %v2355_v19  ;;  %v2692_v9 = vmul.f32 %v2684_v21, %v2356_v24  ;;  %v2637_v42 = vmul.f32 1.25, %v7201_v15  ;;  %v2638_v41 = vmul.f32 1.25, %v7202_v13  ;;  %v7208_v25 = vld [vmem:[#allocation23_spill] sm:$0xff]  ;;  %v3899_v4 = vld [vmem:[%s6608_s2 + $0x2c] ss:$20 sps:$4 sm:$0xff]  }
 0x348   : > { %v2277_v5 = vmul.f32 %v2269_v17, %v7203_v18  ;;  %v2278_v62 = vmul.f32 %v2270_v28, %v7204_v59  ;;  %v2293_v63 = vmul.f32 2.5, %v2285_v55  ;;  %v2294_v56 = vmul.f32 2.5, %v2286_v39  ;;  %v7211_v26 = vld [vmem:[#allocation13_spill] sm:$0xff]  ;;  %v7215_v18 = vld [vmem:[#allocation24_spill] sm:$0xff] }
 0x349   : > { %v2715_v48 = vadd.f32 %v2707_v58, %v2691_v60  ;;  %v2716_v22 = vadd.f32 %v2708_v2, %v2692_v9  ;;  %v2645_v16 = vmul.f32 %v2637_v42, %v7205_v46  ;;  %v2646_v31 = vmul.f32 %v2638_v41, %v7206_v36  ;;  %v7212_v51 = vld [vmem:[#allocation17_spill] sm:$0xff]  ;;  %v7214_v9 = vld [vmem:[#allocation19_spill] sm:$0xff] }
 0x34a   : > { %v2301_v40 = vmul.f32 %v2293_v63, %v1749_v38  ;;  %v2302_v3 = vmul.f32 %v2294_v56, %v1750_v10  ;;  %v2653_v54 = vmul.f32 1.25, %v2285_v55  ;;  %v2654_v30 = vmul.f32 1.25, %v2286_v39  ;;  %v7213_v17 = vld [vmem:[#allocation37_spill] sm:$0xff] }
 0x34b   : > { %v3000_v44 = vpack.c.bf16 %v2716_v22, %v2715_v48  ;;  %v2957_v0 = vmul.f32 0.8333333, %v7207_v50  ;;  %v2958_v21 = vmul.f32 0.8333333, %v7208_v25  ;;  %v2973_v37 = vmul.f32 0.8333333, %v2285_v55 }
 0x34c   : > { %v2309_v7 = vadd.f32 %v2301_v40, %v2277_v5  ;;  %v2310_v61 = vadd.f32 %v2302_v3, %v2278_v62  ;;  %v2974_v23 = vmul.f32 0.8333333, %v2286_v39  ;;  %vm1647_vm11 = vcmp.ge.f32.partialorder %v4905_v43, 2.2  ;;  %v7216_v59 = vld [vmem:[#allocation33_spill] sm:$0xff]  ;;  %v7217_v62 = vld [vmem:[#allocation38_spill] sm:$0xff] }
 0x34d   : > { %3763 = vmatpush3.bf16.msra.mxu1 %v3000_v44  ;;  %v2965_v32 = vmul.f32 %v2957_v0, %v7209_v34  ;;  %v2966_v12 = vmul.f32 %v2958_v21, %v7210_v33  ;;  %vm1648_vm12 = vcmp.ge.f32.partialorder %v4909_v1, 2.2  ;;  %v3600_v8 = vsel %vm1647_vm11, 1.0, %v6851_v6  ;;  %v7218_v48 = vld [vmem:[#allocation12_spill] sm:$0xff] }
 0x34e   : > { %v2661_v58 = vmul.f32 %v2653_v54, %v2309_v7  ;;  %v2662_v57 = vmul.f32 %v2654_v30, %v2310_v61  ;;  %v3601_v2 = vsel %vm1648_vm12, 1.0, %v6851_v6  ;;  %v1751_v20 = vsub.f32 %v7211_v26, %v3600_v8  ;;  %v7219_v54 = vld [vmem:[#allocation47_spill] sm:$0xff]  ;;  %v7220_v44 = vld [vmem:[#allocation48_spill] sm:$0xff] }
 0x34f   : > { %v1752_v45 = vsub.f32 %v7212_v51, %v3601_v2  ;;  %v3680_v19 = vadd.f32 -1.4, %v4905_v43  ;;  %v3681_v24 = vadd.f32 -1.4, %v4909_v1  ;;  %v2287_v53 = vsub.f32 2.2, %v4905_v43 }
 0x350   : > { %v2669_v38 = vadd.f32 %v2661_v58, %v2645_v16  ;;  %v2670_v35 = vadd.f32 %v2662_v57, %v2646_v31  ;;  %3199 = vmatmul.mubr.bf16.vlgmr.msra.gmra.mrb[8].mxu1 %v3893_v14  ;;  %v2288_v10 = vsub.f32 2.2, %v4909_v1  ;;  %v2639_v28 = vmul.f32 1.25, %v7213_v17  ;;  %v3903_v31 = vld [vmem:[%s6608_s2 + $0x28] ss:$20 sps:$4 sm:$0xff]   ;;  %v7222_v14 = vld [vmem:[#allocation40_spill] sm:$0xff] }
 0x351   : > { %v2271_v55 = vmul.f32 2.5, %v3680_v19  ;;  %v2272_v39 = vmul.f32 2.5, %v3681_v24  ;;  %v2295_v60 = vmul.f32 2.5, %v2287_v53  ;;  %v2640_v15 = vmul.f32 1.25, %v7214_v9  ;;  %3206 = vmatprep.mubr.bf16.mxu1 %v3899_v4  ;;  %v7221_v61 = vld [vmem:[#allocation39_spill] sm:$0xff]  ;;  %v7223_v58 = vld [vmem:[#allocation42_spill] sm:$0xff] }
 0x352   : > { %v2981_v42 = vmul.f32 %v2973_v37, %v2669_v38  ;;  %v2982_v13 = vmul.f32 %v2974_v23, %v2670_v35  ;;  %v2296_v41 = vmul.f32 2.5, %v2288_v10  ;;  %v2647_v5 = vmul.f32 %v2639_v28, %v7215_v18  ;;  %v7225_v35 = vld [vmem:[#allocation55_spill] sm:$0xff]  ;;  %v7226_v28 = vld [vmem:[#allocation53_spill] sm:$0xff] }
 0x353   : > { %v2279_v43 = vmul.f32 %v2271_v55, %v7216_v59  ;;  %v2280_v63 = vmul.f32 %v2272_v39, %v7217_v62  ;;  %v2303_v56 = vmul.f32 %v2295_v60, %v1751_v20  ;;  %v2648_v1 = vmul.f32 %v2640_v15, %v7218_v48  ;;  %v7224_v20 = vld [vmem:[#allocation44_spill] sm:$0xff] }
 0x354   : > { %v2989_v22 = vadd.f32 %v2981_v42, %v2965_v32  ;;  %v2990_v46 = vadd.f32 %v2982_v13, %v2966_v12  ;;  %v2304_v16 = vmul.f32 %v2296_v41, %v1752_v45  ;;  %v2655_v36 = vmul.f32 1.25, %v2287_v53  ;;  %v7227_v60 = vld [vmem:[#allocation56_spill] sm:$0xff]  ;;  %v7228_v42 = vld [vmem:[#allocation54_spill] sm:$0xff] }
 0x355   : > { %v2311_v40 = vadd.f32 %v2303_v56, %v2279_v43  ;;  %v2656_v3 = vmul.f32 1.25, %v2288_v10  ;;  %v2959_v30 = vmul.f32 0.8333333, %v7219_v54  ;;  %v2960_v50 = vmul.f32 0.8333333, %v7220_v44  ;;  %v7232_v44 = vld [vmem:[#allocation60_spill] sm:$0xff] }
 0x356   : > { %v3053_v0 = vpack.c.bf16 %v2990_v46, %v2989_v22  ;;  %v2312_v25 = vadd.f32 %v2304_v16, %v2280_v63  ;;  %v2975_v21 = vmul.f32 0.8333333, %v2287_v53  ;;  %v2976_v37 = vmul.f32 0.8333333, %v2288_v10  ;;  %v7229_v63 = vld [vmem:[#allocation87_spill] sm:$0xff]  ;;  %v7230_v22 = vld [vmem:[#allocation88_spill] sm:$0xff] }
 0x357   : > { %v2663_v7 = vmul.f32 %v2655_v36, %v2311_v40  ;;  %v2967_v23 = vmul.f32 %v2959_v30, %v7221_v61  ;;  %v2968_v34 = vmul.f32 %v2960_v50, %v7222_v14  ;;  %vm1649_vm13 = vcmp.ge.f32.partialorder %v4932_v47, 2.2 }
 0x358   : > { %3822 = vmatprep.subr.bf16.mxu1 %v3053_v0  ;;  %v2664_v32 = vmul.f32 %v2656_v3, %v2312_v25  ;;  %vm1650_vm14 = vcmp.ge.f32.partialorder %v4948_v49, 2.2  ;;  %v3602_v33 = vsel %vm1649_vm13, 1.0, %v6851_v6  ;;  %v3682_v12 = vadd.f32 -1.4, %v4932_v47  ;;  %3207 = vmatmul.mubr.bf16.gmra.mrb[12].mxu1 %v3903_v31  ;;  %v7231_v31 = vld [vmem:[#allocation45_spill] sm:$0xff] }
 0x359   : > { %3823 = vmatpush3.bf16.msra.mxu1 %v3053_v0  ;;  %v2671_v8 = vadd.f32 %v2663_v7, %v2647_v5  ;;  %v3603_v4 = vsel %vm1650_vm14, 1.0, %v6851_v6  ;;  %v1753_v57 = vsub.f32 %v7223_v58, %v3602_v33  ;;  %v3683_v2 = vadd.f32 -1.4, %v4948_v49 }
 0x35a   : > { %v2672_v26 = vadd.f32 %v2664_v32, %v2648_v1  ;;  %v1754_v51 = vsub.f32 %v7224_v20, %v3603_v4  ;;  %v2273_v45 = vmul.f32 2.5, %v3682_v12  ;;  %v2289_v19 = vsub.f32 2.2, %v4932_v47  ;;  %v7235_v4 = vld [vmem:[#allocation51_spill] sm:$0xff] }
 0x35b   : > { %v2983_v24 = vmul.f32 %v2975_v21, %v2671_v8  ;;  %v2274_v53 = vmul.f32 2.5, %v3683_v2  ;;  %v2290_v38 = vsub.f32 2.2, %v4948_v49  ;;  %v2641_v10 = vmul.f32 1.25, %v7225_v35 }
 0x35c   : > { %v2984_v17 = vmul.f32 %v2976_v37, %v2672_v26  ;;  %v2281_v55 = vmul.f32 %v2273_v45, %v7226_v28  ;;  %v2297_v39 = vmul.f32 2.5, %v2289_v19  ;;  %v2642_v9 = vmul.f32 1.25, %v7227_v60  ;;  %v7233_v37 = vld [vmem:[#allocation62_spill] sm:$0xff]  ;;  %v7237_v45 = vld [vmem:[#allocation52_spill] sm:$0xff] }
 0x35d   : > { %v2991_v15 = vadd.f32 %v2983_v24, %v2967_v23  ;;  %v2282_v13 = vmul.f32 %v2274_v53, %v7228_v42  ;;  %v2298_v41 = vmul.f32 2.5, %v2290_v38  ;;  %v2649_v47 = vmul.f32 %v2641_v10, %v6232_v27  ;;  %v7238_v24 = vld [vmem:[#allocation79_spill] sm:$0xff] }
 0x35e   : > { %v2992_v18 = vadd.f32 %v2984_v17, %v2968_v34  ;;  %v2305_v5 = vmul.f32 %v2297_v39, %v1753_v57  ;;  %v2650_v59 = vmul.f32 %v2642_v9, %v6234_v29  ;;  %v2657_v49 = vmul.f32 1.25, %v2289_v19  ;;  %v7234_v34 = vld [vmem:[#allocation46_spill] sm:$0xff]  ;;  %v7239_v17 = vld [vmem:[#allocation89_spill] sm:$0xff] }
 0x35f   : > { %v2306_v43 = vmul.f32 %v2298_v41, %v1754_v51  ;;  %v2658_v62 = vmul.f32 1.25, %v2290_v38  ;;  %v2961_v56 = vmul.f32 0.8333333, %v7229_v63  ;;  %v2962_v46 = vmul.f32 0.8333333, %v7230_v22  ;;  %v7243_v63 = vld [vmem:[#allocation82_spill] sm:$0xff] }
 0x360   : > { %v3054_v48 = vpack.c.bf16 %v2992_v18, %v2991_v15  ;;  %v2313_v1 = vadd.f32 %v2305_v5, %v2281_v55  ;;  %v2977_v16 = vmul.f32 0.8333333, %v2289_v19  ;;  %v2978_v3 = vmul.f32 0.8333333, %v2290_v38  ;;  %v7240_v55 = vld [vmem:[#allocation81_spill] sm:$0xff]  ;;  %v7241_v18 = vld [vmem:[#allocation123_spill] sm:$0xff] }
 0x361   : > { %v2314_v36 = vadd.f32 %v2306_v43, %v2282_v13  ;;  %v2969_v40 = vmul.f32 %v2961_v56, %v7231_v31  ;;  %vm1651_vm15 = vcmp.ge.f32.partialorder %v4963_v11, 2.2  ;;  %vm1652_vm0 = vcmp.ge.f32.partialorder %v5127_v52, 2.2 }
 0x362   : > { %3824 = vmatprep.subr.bf16.mxu1 %v3054_v48  ;;  %v2665_v27 = vmul.f32 %v2657_v49, %v2313_v1  ;;  %v3604_v29 = vsel %vm1651_vm15, 1.0, %v6851_v6  ;;  %v3684_v54 = vadd.f32 -1.4, %v4963_v11  ;;  %v2970_v50 = vmul.f32 %v2962_v46, %v7232_v44 }
 0x363   : > { %3825 = vmatpush3.bf16.msra.mxu1 %v3054_v48  ;;  %v2666_v30 = vmul.f32 %v2658_v62, %v2314_v36  ;;  %v3605_v0 = vsel %vm1652_vm0, 1.0, %v6851_v6  ;;  %v3685_v25 = vadd.f32 -1.4, %v5127_v52  ;;  %v1755_v7 = vsub.f32 %v7233_v37, %v3604_v29  ;;  %v7236_v6 = vld [vmem:[#allocation80_spill] sm:$0xff]  ;;  %v7244_v48 = vld [vmem:[#allocation83_spill] sm:$0xff] }
 0x364   : > { %v2673_v21 = vadd.f32 %v2665_v27, %v2649_v47  ;;  %v2275_v61 = vmul.f32 2.5, %v3684_v54  ;;  %v2291_v23 = vsub.f32 2.2, %v4963_v11  ;;  %v1756_v32 = vsub.f32 %v7234_v34, %v3605_v0  ;;  %v3905_v11 = vld [vmem:[%s6608_s2 + $0x10] ss:$20 sps:$4 sm:$0xff]  }
 0x365   : > { %v2674_v14 = vadd.f32 %v2666_v30, %v2650_v59  ;;  %v2276_v33 = vmul.f32 2.5, %v3685_v25  ;;  %v2292_v12 = vsub.f32 2.2, %v5127_v52  ;;  %v2643_v19 = vmul.f32 1.25, %v7237_v45  ;;  %3830 = vmatprep.mubr.msk.bf16.mxu1 %vm3159_vm1, %v3905_v11  ;;  %v7242_v47 = vld [vmem:[#allocation124_spill] sm:$0xff] }
 0x366   : > { %v2985_v8 = vmul.f32 %v2977_v16, %v2673_v21  ;;  %v2283_v58 = vmul.f32 %v2275_v61, %v7235_v4  ;;  %v2299_v57 = vmul.f32 2.5, %v2291_v23  ;;  %v2644_v53 = vmul.f32 1.25, %v7238_v24 }
 0x367   : > { %v2986_v2 = vmul.f32 %v2978_v3, %v2674_v14  ;;  %v2284_v26 = vmul.f32 %v2276_v33, %v7236_v6  ;;  %v2300_v20 = vmul.f32 2.5, %v2292_v12  ;;  %v2651_v28 = vmul.f32 %v2643_v19, %v7239_v17  ;;  %v3906_v3 = vld [vmem:[%s6608_s2 + $0x38] ss:$20 sps:$4 sm:$0xff]  }
 0x368   : > { %v2307_v51 = vmul.f32 %v2299_v57, %v1755_v7  ;;  %v2993_v38 = vadd.f32 %v2985_v8, %v2969_v40  ;;  %v2652_v39 = vmul.f32 %v2644_v53, %v7240_v55  ;;  %v2659_v60 = vmul.f32 1.25, %v2291_v23 }
 0x369   : > { %v2994_v35 = vadd.f32 %v2986_v2, %v2970_v50  ;;  %v2308_v52 = vmul.f32 %v2300_v20, %v1756_v32  ;;  %v2660_v42 = vmul.f32 1.25, %v2292_v12  ;;  %v2963_v5 = vmul.f32 0.8333333, %v7241_v18 }
 0x36a   : > { %v2315_v10 = vadd.f32 %v2307_v51, %v2283_v58  ;;  %v2964_v59 = vmul.f32 0.8333333, %v7242_v47  ;;  %v2979_v49 = vmul.f32 0.8333333, %v2291_v23  ;;  %v2980_v22 = vmul.f32 0.8333333, %v2292_v12 }
 0x36b   : > { %v3055_v9 = vpack.c.bf16 %v2994_v35, %v2993_v38  ;;  %v2316_v15 = vadd.f32 %v2308_v52, %v2284_v26  ;;  %v2971_v56 = vmul.f32 %v2963_v5, %v7243_v63 }
 0x36c   : > { %v2667_v13 = vmul.f32 %v2659_v60, %v2315_v10  ;;  %v2972_v1 = vmul.f32 %v2964_v59, %v7244_v48 }
 0x36d   : > { %3826 = vmatprep.subr.bf16.mxu1 %v3055_v9  ;;  %v2668_v41 = vmul.f32 %v2660_v42, %v2316_v15 }
 0x36e   : > { %3827 = vmatpush3.bf16.msra.mxu1 %v3055_v9  ;;  %v2675_v43 = vadd.f32 %v2667_v13, %v2651_v28 }
 0x36f   : > { %v2676_v62 = vadd.f32 %v2668_v41, %v2652_v39 }
 0x370   : > { %v2987_v46 = vmul.f32 %v2979_v49, %v2675_v43 }
 0x371   : > { %v2988_v16 = vmul.f32 %v2980_v22, %v2676_v62 }
 0x372   : > { %v2995_v36 = vadd.f32 %v2987_v46, %v2971_v56 }
 0x373   : > { %v2996_v31 = vadd.f32 %v2988_v16, %v2972_v1 }
 0x375   : > { %v3056_v40 = vpack.c.bf16 %v2996_v31, %v2995_v36 }
 0x377   : > { %3828 = vmatprep.subr.bf16.mxu1 %v3056_v40 }
 0x378   : > { %3829 = vmatpush3.bf16.msra.mxu1 %v3056_v40 }
 0x37b   : > { %3831 = vmatmul.mubr.msk.bf16.vlgmr.msra.gmra.mrb[16].mxu1 %vm3159_vm1, %v3906_v3 }
 0x3f0   : > { %v3792_v27 = vpop.f32.mrb[16].mxu0 }
 0x3f1   : > { %v3793_v29 = vpop.f32.mrb[17].mxu0 }
 0x3f2   : > { %v3794_v54 = vadd.f32 %v3793_v29, %v3792_v27  ;;  %v3795_v30 = vpop.f32.mrb[18].mxu0 }
 0x3f3   : > { %v3796_v44 = vpop.f32.mrb[19].mxu0 }
 0x3f4   : > { %v3797_v50 = vadd.f32 %v3796_v44, %v3795_v30 }
 0x3f8   : > { %v3798_v0 = vpop.f32.mrb[20].mxu0 }
 0x3f9   : > { %v3799_v25 = vpop.f32.mrb[21].mxu0 }
 0x3fa   : > { %v3800_v21 = vadd.f32 %v3799_v25, %v3798_v0  ;;  %v3801_v37 = vpop.f32.mrb[22].mxu0 }
 0x3fb   : > { %v3802_v7 = vpop.f32.mrb[23].mxu0 }
 0x3fc   : > { %v3803_v61 = vadd.f32 %v3802_v7, %v3801_v37 }
 0x423   : > { %v3764_v23 = vpop.f32.mrb[8].mxu1 }
 0x424   : > { %v3765_v14 = vpop.f32.mrb[9].mxu1 }
 0x425   : > { %v3766_v34 = vadd.f32 %v3765_v14, %v3764_v23  ;;  %v3767_v32 = vpop.f32.mrb[10].mxu1 }
 0x426   : > { %v3768_v33 = vpop.f32.mrb[11].mxu1 }
 0x427   : > { %v3769_v12 = vadd.f32 %v3768_v33, %v3767_v32  ;;  %v3250_v8 = vadd.f32 %v3794_v54, %v3766_v34 }
 0x429   : > { %v3253_v4 = vadd.f32 %v3797_v50, %v3769_v12 }
 0x42b   : > { %v3770_v58 = vpop.f32.mrb[12].mxu1 }
 0x42c   : > { %v3771_v57 = vpop.f32.mrb[13].mxu1 }
 0x42d   : > { %v3772_v2 = vadd.f32 %v3771_v57, %v3770_v58  ;;  %v3773_v6 = vpop.f32.mrb[14].mxu1 }
 0x42e   : > { %v3774_v26 = vpop.f32.mrb[15].mxu1 }
 0x42f   : > { %v3775_v20 = vadd.f32 %v3774_v26, %v3773_v6  ;;  %v3258_v51 = vadd.f32 %v3800_v21, %v3772_v2 }
 0x431   : > { %v3261_v45 = vadd.f32 %v3803_v61, %v3775_v20 }
 0x44e   : > { %v3832_v19 = vpop.f32.mrb[16].mxu1 }
 0x44f   : > { %v3307_v24 = vadd.f32 %v3832_v19, %v3258_v51  ;;  %v3298_v53 = vpop.f32.mrb[17].mxu1 }
 0x450   : > { %v3299_v11 = vadd.f32 %v3298_v53, %v3250_v8  ;;  %v3833_v38 = vpop.f32.mrb[18].mxu1 }
 0x451   : > { %3315 = vst [vmem:[%s214_s28 + $0x10] sm:$0xff] %v3307_v24  ;;  %v3310_v35 = vadd.f32 %v3833_v38, %v3261_v45  ;;  %v3301_v52 = vpop.f32.mrb[19].mxu1 }
 0x452   : > { %3313 = vst [vmem:[%s214_s28] sm:$0xff] %v3299_v11  ;;  %v3302_v10 = vadd.f32 %v3301_v52, %v3253_v4 }
 0x453   : > { %3316 = vst [vmem:[%s214_s28 + $0x18] sm:$0xff] %v3310_v35 }
 0x454   : > { %3314 = vst [vmem:[%s214_s28 + $0x8] sm:$0xff] %v3302_v10 }
 0x455   : > { %3972 = shalt.err (!%p3969_p5)
}
 0x456   : > { %s3973_s4 = scalar_lea.hbm %s6560_s7, 512  ;;  %s3977_s20 = scalar_lea.hbm %s6609_s3, 1024 }
 0x457   : > { %p3974_p7 = scmp.ne.s32.totalorder %s6560_s7, %s3973_s4  ;;  %p3978_p12 = scmp.lt.u32.totalorder %s6560_s7, %s6609_s3 }
 0x458   : > { %p3979_p13 = scmp.lt.u32.totalorder %s3977_s20, %s3973_s4  ;;  %p3981_p1 = scmp.lt.u32.totalorder %s3973_s4, %s6560_s7 }
 0x459   : > { %p3975_p10 = pnand %p3974_p7, %p4086_p6 }
 0x45a   : > { %p3980_p0 = por %p3979_p13, %p3978_p12 }
 0x45b   : > { %p3976_p11 = pneg %p3975_p10 }
 0x45c   : > { %p3982_p2 = por %p3981_p1, %p3980_p0 }
 0x45e   : > { %p3983_p3 = pnand %p3982_p2, %p3976_p11 }
 0x460   : > { %3986 = shalt.err (!%p3983_p3)
}
 0x461   : > { %s4025_s26 = smov 128   ;;  %s4026_s27 = smov 256  }
 0x462   : > { %s4027_s28 = smov 8  }
 0x463   : > { %3834 = dma.vmem_to_hbm [thread:$0]  (%p4086_p6), %s6555_s29, 512, %s6560_s7, %s6564_s16, %s4025_s26, %s4026_s27, %s4027_s28  }
 0x464 PF: > { %s3345_s30 = sand.u32 1, %s4009_s12   ;;  %p3837_p4 = pnand %p3400_p9, %p4090_p8 }
 0x465   : > { %s3346_s6 = scalar_lea.sflag [#allocation6], %s3345_s30 }
 0x466   : > { %4004 = dma.done.wait (!%p3837_p4), %s3346_s6, 512  }
 0x467   : > { %4006 = vsyncadd (!%p3837_p4), %s3346_s6, 4294966784  ;;  %p13_p5 = scmp.ge.s32.totalorder %s4071_s18, 4   ;;  %s7245_s12 = smov %s4013_s13 }
 0x468   : > { %s7246_s13 = smov %s4017_s14  ;;  %s7247_s14 = smov %s4084_s21 }
 0x469   : > { %s7248_s15 = smov %s4071_s18  ;;  %15 = sbr.rel (!%p13_p5) target bundleno = 3 (0x3), region = 110 }
 0x470   :  { %3351 = vsyncpa [#allocation6], 1 }
 0x471   :  { %3353 = vsyncpa [#allocation6 + $0x1], 1 }

</bundles_post_ra>
